<compile_context>
chip_gen: v5e
topology: v5e:2x2
jax: 0.10.0
libtpu: 0.0.40
codegen_flags: <defaults>
</compile_context>

<pallas_src>
import numpy as np
import jax
import jax.numpy as jnp
from jax.experimental import pallas as pl
from jax.experimental.pallas import tpu as pltpu

# Hyperparameters mirroring VisualServoingLSTM(rnn_type='LSTM', ...)
VEL_DIMS = 6
LSTM_UNITS = 6
LAYERS = 5
SEQ_LEN = 5
N_FEATS = 16            # number of feature points in Lsx / Lsy

H = LSTM_UNITS
HP = 128                # lane width of every tile
SP = 8                  # sublane height of state tiles
GATE_BLK = 32           # each gate (i,f,g,o) owns a 32-lane sub-block of one 128-lane column
H_OFF = 8               # lane offset of h inside the fused [x | h] contraction tile
F2_OFF = HP // 2        # lane offset of the Lsy half of the fused output tile


def _vs_lstm_kernel(vel_ref, h0_ref, c0_ref, w_ref, b_ref, lt_ref, out_ref):
    f32 = jnp.float32
    bf16 = jnp.bfloat16
    # Hoisted constants (JAX does not CSE broadcast_in_dim -> build them once).
    lane = jax.lax.broadcasted_iota(jnp.int32, (SP, HP), 1)
    ig_mask = lane < GATE_BLK   # keep i*g only inside the i-gate block -> pad lanes of c stay 0

    x = vel_ref[...]                                   # (8, 128), vel in sublane 0 lanes 0..5
    h = [h0_ref[l] for l in range(LAYERS)]             # each (8, 128)
    c = [c0_ref[l] for l in range(LAYERS)]
    b = [b_ref[l] for l in range(LAYERS)]              # bias loads hoisted out of the time loop
    s = jnp.zeros_like(x)                              # running sum_t of top-layer output

    # NOTE: (t+l) wavefront reordering is NOT applicable: the top layer's output is fed
    # back as the next time step's input, so all SEQ_LEN*LAYERS cells are strictly serial.
    for _t in range(SEQ_LEN):
        layer_in = x
        for l in range(LAYERS):
            # Fused [x | h] -> gates: x in lanes 0..5, h in lanes 8..13; one MXU push
            # per cell at DEFAULT (single-pass bf16) precision.
            xh = layer_in + pltpu.roll(h[l], shift=H_OFF, axis=1)
            gates = jnp.dot(xh, w_ref[l], preferred_element_type=f32) + b[l]    # (8, 128)
            # i/f/o columns of W,B are pre-scaled by 0.5 (pack_lstm_params), so a single
            # tanh over the whole vreg gives tanh(z) in the g block and tanh(z/2) in the
            # i/f/o blocks; sigmoid(z) = 0.5*tanh(z/2) + 0.5 recovers the sigmoid gates.
            th = jnp.tanh(gates)           # one EUP pass covers all four gate blocks
            sg = 0.5 * th + 0.5            # VPU: exact sigmoid for the pre-scaled blocks
            i_g = sg                                                   # i already at lanes 0..
            f_g = pltpu.roll(sg, shift=HP - 1 * GATE_BLK, axis=1)      # f block -> lanes 0..
            g_g = pltpu.roll(th, shift=HP - 2 * GATE_BLK, axis=1)      # g block -> lanes 0..
            o_g = pltpu.roll(sg, shift=HP - 3 * GATE_BLK, axis=1)      # o block -> lanes 0..
            ig = jnp.where(ig_mask, i_g * g_g, 0.0)   # zero outside the i block: keeps c clean
            c[l] = f_g * c[l] + ig
            h[l] = o_g * jnp.tanh(c[l])
            layer_in = h[l]
        x = h[LAYERS - 1]      # torch feeds `out` back as the next-step input
        s = s + x

    # f_hat = [Lsx @ s | Lsy @ s] as one lane-dense (8,128) output tile (Lsy half at lane 64).
    # Accuracy: hand-rolled bf16_3x (== Precision.HIGH) -> 3 DEFAULT-precision MXU passes,
    # ~f32 accurate, half the cost of HIGHEST and guaranteed to lower.
    lt = lt_ref[...]
    lt_hi = lt.astype(bf16).astype(f32)
    lt_lo = lt - lt_hi
    s_hi = s.astype(bf16).astype(f32)
    s_lo = s - s_hi
    out_ref[...] = (jnp.dot(s_hi, lt_hi, preferred_element_type=f32)
                    + jnp.dot(s_lo, lt_hi, preferred_element_type=f32)
                    + jnp.dot(s_hi, lt_lo, preferred_element_type=f32))


def pack_lstm_params(params):
    """One-time host-side packing of torch-layout LSTM params into fused tiles.

    W[l]: (128, 128); rows 0..in_dim-1 hold W_ih^T, rows 8..13 hold W_hh^T; gate g of
          torch order (i,f,g,o) occupies lanes [g*32, g*32+6).
    B[l]: (8, 128); b_ih + b_hh in sublane 0 at the same gate lanes, zero elsewhere.
    The i/f/o gate columns (and bias lanes) carry a 0.5 pre-scale so the kernel can use a
    single tanh + the identity sigmoid(z) = 0.5*(1 + tanh(z/2)); the g block is UNscaled.
    """
    assert H <= H_OFF, "hidden size must fit below the W_hh row offset"
    assert H <= GATE_BLK and 4 * GATE_BLK <= HP, "gate blocks must fit disjoint 32-lane slots"
    gate_scale = (0.5, 0.5, 1.0, 0.5)   # torch gate order (i, f, g, o)
    W = np.zeros((LAYERS, HP, HP), np.float32)
    B = np.zeros((LAYERS, SP, HP), np.float32)
    for l, (w_ih, w_hh, b_ih, b_hh) in enumerate(params):
        w_ih = np.asarray(w_ih, np.float32)
        w_hh = np.asarray(w_hh, np.float32)
        b_ih = np.asarray(b_ih, np.float32)
        b_hh = np.asarray(b_hh, np.float32)
        in_dim = w_ih.shape[1]
        assert in_dim <= H_OFF, "input dim must not overlap the W_hh rows"
        for g in range(4):
            sc = gate_scale[g]
            base = g * GATE_BLK
            W[l, :in_dim, base:base + H] = sc * w_ih[g * H:(g + 1) * H, :].T
            W[l, H_OFF:H_OFF + H, base:base + H] = sc * w_hh[g * H:(g + 1) * H, :].T
            B[l, 0, base:base + H] = sc * (b_ih[g * H:(g + 1) * H] + b_hh[g * H:(g + 1) * H])
    return jnp.asarray(W), jnp.asarray(B)


@jax.jit
def visual_servoing_forward(vel, lsx, lsy, w_packed, b_packed, h0, c0):
    """vel: (6,), lsx/lsy: (1, N, 6), w_packed/b_packed from pack_lstm_params,
    h0/c0: (LAYERS, 1, 6). Returns f_hat of shape (1, N, 2), matching the torch module.
    Whole thing (padding + kernel + unpack) compiles to ONE executable."""
    n = lsx.shape[1]
    assert n <= F2_OFF, "feature count must fit in one 64-lane half of the output tile"

    vel_p = jnp.zeros((SP, HP), jnp.float32).at[0, :VEL_DIMS].set(
        jnp.asarray(vel, jnp.float32).reshape(-1))
    h0_p = jnp.zeros((LAYERS, SP, HP), jnp.float32).at[:, 0, :H].set(
        h0[:, 0, :].astype(jnp.float32))
    c0_p = jnp.zeros((LAYERS, SP, HP), jnp.float32).at[:, 0, :H].set(
        c0[:, 0, :].astype(jnp.float32))
    lt_p = jnp.zeros((HP, HP), jnp.float32)
    lt_p = lt_p.at[:VEL_DIMS, :n].set(jnp.transpose(lsx[0].astype(jnp.float32)))
    lt_p = lt_p.at[:VEL_DIMS, F2_OFF:F2_OFF + n].set(jnp.transpose(lsy[0].astype(jnp.float32)))

    out = pl.pallas_call(
        _vs_lstm_kernel,
        out_shape=jax.ShapeDtypeStruct((SP, HP), jnp.float32),
        in_specs=[pl.BlockSpec(memory_space=pltpu.MemorySpace.VMEM)] * 6,
        out_specs=pl.BlockSpec(memory_space=pltpu.MemorySpace.VMEM),
    )(vel_p, h0_p, c0_p, w_packed, b_packed, lt_p)

    f1 = out[0, :n]
    f2 = out[0, F2_OFF:F2_OFF + n]
    return jnp.stack([f1, f2], axis=-1).reshape(1, n, 2)


def reference_forward(vel, lsx, lsy, params, h0, c0):
    """Pure NumPy (float64) re-implementation of the torch forward, for checking."""
    sig = lambda z: 1.0 / (1.0 + np.exp(-z))
    x = np.asarray(vel, np.float64).reshape(-1)
    h = [np.asarray(h0[l, 0], np.float64) for l in range(LAYERS)]
    c = [np.asarray(c0[l, 0], np.float64) for l in range(LAYERS)]
    s = np.zeros(H, np.float64)
    for _t in range(SEQ_LEN):
        inp = x
        for l, (w_ih, w_hh, b_ih, b_hh) in enumerate(params):
            g = (np.asarray(w_ih, np.float64) @ inp + np.asarray(b_ih, np.float64)
                 + np.asarray(w_hh, np.float64) @ h[l] + np.asarray(b_hh, np.float64))
            i = sig(g[0:H]); f = sig(g[H:2 * H]); gg = np.tanh(g[2 * H:3 * H]); o = sig(g[3 * H:4 * H])
            c[l] = f * c[l] + i * gg
            h[l] = o * np.tanh(c[l])
            inp = h[l]
        x = h[-1]
        s = s + x
    lsx64 = np.asarray(lsx, np.float64)[0]
    lsy64 = np.asarray(lsy, np.float64)[0]
    f1 = lsx64 @ s
    f2 = lsy64 @ s
    return np.stack([f1, f2], axis=-1)[None]  # (1, N, 2)


if __name__ == "__main__":
    key = jax.random.PRNGKey(0)
    keys = jax.random.split(key, 5 + 4 * LAYERS)
    kinit = 1.0 / np.sqrt(H)

    vel = jax.random.normal(keys[0], (VEL_DIMS,), jnp.float32)
    lsx = jax.random.normal(keys[1], (1, N_FEATS, VEL_DIMS), jnp.float32)
    lsy = jax.random.normal(keys[2], (1, N_FEATS, VEL_DIMS), jnp.float32)
    h0 = jax.random.normal(keys[3], (LAYERS, 1, H), jnp.float32)   # init_hidden: randn
    c0 = jax.random.normal(keys[4], (LAYERS, 1, H), jnp.float32)

    params = []
    ki = 5
    for l in range(LAYERS):
        in_dim = VEL_DIMS if l == 0 else LSTM_UNITS
        w_ih = jax.random.uniform(keys[ki + 0], (4 * H, in_dim), jnp.float32, -kinit, kinit)
        w_hh = jax.random.uniform(keys[ki + 1], (4 * H, H), jnp.float32, -kinit, kinit)
        b_ih = jax.random.uniform(keys[ki + 2], (4 * H,), jnp.float32, -kinit, kinit)
        b_hh = jax.random.uniform(keys[ki + 3], (4 * H,), jnp.float32, -kinit, kinit)
        params.append((w_ih, w_hh, b_ih, b_hh))
        ki += 4

    # One-time parameter packing (hoisted out of the per-call path).
    np_params = [tuple(np.asarray(p) for p in ps) for ps in params]
    w_packed, b_packed = pack_lstm_params(np_params)

    f_hat = visual_servoing_forward(vel, lsx, lsy, w_packed, b_packed, h0, c0)
    f_hat = jax.block_until_ready(f_hat)

    ref = reference_forward(np.asarray(vel), np.asarray(lsx), np.asarray(lsy),
                            np_params, np.asarray(h0), np.asarray(c0))
    np.testing.assert_allclose(np.asarray(f_hat), ref, rtol=5e-2, atol=5e-2)
    print("KERNEL_OK")
</pallas_src>

<mosaic_0001>
module attributes {stable_mosaic.version = 11 : i64} {
  func.func @_vs_lstm_kernel(%arg0: memref<8x128xf32, #tpu.memory_space<vmem>>, %arg1: memref<5x8x128xf32, #tpu.memory_space<vmem>>, %arg2: memref<5x8x128xf32, #tpu.memory_space<vmem>>, %arg3: memref<5x128x128xf32, #tpu.memory_space<vmem>>, %arg4: memref<5x8x128xf32, #tpu.memory_space<vmem>>, %arg5: memref<128x128xf32, #tpu.memory_space<vmem>>, %arg6: memref<8x128xf32, #tpu.memory_space<vmem>>) attributes {dimension_semantics = [], scalar_prefetch = 0 : i64, scratch_operands = 0 : i64, tpu.core_type = #tpu.core_type<tc>} {
    %0 = tpu.iota {dimensions = array<i32: 1>} : vector<8x128xi32>
    %c32_i32 = arith.constant 32 : i32
    %1 = vector.broadcast %c32_i32 : i32 to vector<8x128xi32>
    %2 = arith.cmpi slt, %0, %1 : vector<8x128xi32>
    %c0 = arith.constant 0 : index
    %c0_0 = arith.constant 0 : index
    %3 = vector.load %arg0[%c0, %c0_0] : memref<8x128xf32, #tpu.memory_space<vmem>>, vector<8x128xf32>
    %c0_1 = arith.constant 0 : index
    %c0_2 = arith.constant 0 : index
    %c0_3 = arith.constant 0 : index
    %4 = vector.load %arg1[%c0_1, %c0_2, %c0_3] : memref<5x8x128xf32, #tpu.memory_space<vmem>>, vector<1x8x128xf32>
    %5 = vector.shape_cast %4 : vector<1x8x128xf32> to vector<8x128xf32>
    %c1 = arith.constant 1 : index
    %c0_4 = arith.constant 0 : index
    %c0_5 = arith.constant 0 : index
    %6 = vector.load %arg1[%c1, %c0_4, %c0_5] : memref<5x8x128xf32, #tpu.memory_space<vmem>>, vector<1x8x128xf32>
    %7 = vector.shape_cast %6 : vector<1x8x128xf32> to vector<8x128xf32>
    %c2 = arith.constant 2 : index
    %c0_6 = arith.constant 0 : index
    %c0_7 = arith.constant 0 : index
    %8 = vector.load %arg1[%c2, %c0_6, %c0_7] : memref<5x8x128xf32, #tpu.memory_space<vmem>>, vector<1x8x128xf32>
    %9 = vector.shape_cast %8 : vector<1x8x128xf32> to vector<8x128xf32>
    %c3 = arith.constant 3 : index
    %c0_8 = arith.constant 0 : index
    %c0_9 = arith.constant 0 : index
    %10 = vector.load %arg1[%c3, %c0_8, %c0_9] : memref<5x8x128xf32, #tpu.memory_space<vmem>>, vector<1x8x128xf32>
    %11 = vector.shape_cast %10 : vector<1x8x128xf32> to vector<8x128xf32>
    %c4 = arith.constant 4 : index
    %c0_10 = arith.constant 0 : index
    %c0_11 = arith.constant 0 : index
    %12 = vector.load %arg1[%c4, %c0_10, %c0_11] : memref<5x8x128xf32, #tpu.memory_space<vmem>>, vector<1x8x128xf32>
    %13 = vector.shape_cast %12 : vector<1x8x128xf32> to vector<8x128xf32>
    %c0_12 = arith.constant 0 : index
    %c0_13 = arith.constant 0 : index
    %c0_14 = arith.constant 0 : index
    %14 = vector.load %arg2[%c0_12, %c0_13, %c0_14] : memref<5x8x128xf32, #tpu.memory_space<vmem>>, vector<1x8x128xf32>
    %15 = vector.shape_cast %14 : vector<1x8x128xf32> to vector<8x128xf32>
    %c1_15 = arith.constant 1 : index
    %c0_16 = arith.constant 0 : index
    %c0_17 = arith.constant 0 : index
    %16 = vector.load %arg2[%c1_15, %c0_16, %c0_17] : memref<5x8x128xf32, #tpu.memory_space<vmem>>, vector<1x8x128xf32>
    %17 = vector.shape_cast %16 : vector<1x8x128xf32> to vector<8x128xf32>
    %c2_18 = arith.constant 2 : index
    %c0_19 = arith.constant 0 : index
    %c0_20 = arith.constant 0 : index
    %18 = vector.load %arg2[%c2_18, %c0_19, %c0_20] : memref<5x8x128xf32, #tpu.memory_space<vmem>>, vector<1x8x128xf32>
    %19 = vector.shape_cast %18 : vector<1x8x128xf32> to vector<8x128xf32>
    %c3_21 = arith.constant 3 : index
    %c0_22 = arith.constant 0 : index
    %c0_23 = arith.constant 0 : index
    %20 = vector.load %arg2[%c3_21, %c0_22, %c0_23] : memref<5x8x128xf32, #tpu.memory_space<vmem>>, vector<1x8x128xf32>
    %21 = vector.shape_cast %20 : vector<1x8x128xf32> to vector<8x128xf32>
    %c4_24 = arith.constant 4 : index
    %c0_25 = arith.constant 0 : index
    %c0_26 = arith.constant 0 : index
    %22 = vector.load %arg2[%c4_24, %c0_25, %c0_26] : memref<5x8x128xf32, #tpu.memory_space<vmem>>, vector<1x8x128xf32>
    %23 = vector.shape_cast %22 : vector<1x8x128xf32> to vector<8x128xf32>
    %c0_27 = arith.constant 0 : index
    %c0_28 = arith.constant 0 : index
    %c0_29 = arith.constant 0 : index
    %24 = vector.load %arg4[%c0_27, %c0_28, %c0_29] : memref<5x8x128xf32, #tpu.memory_space<vmem>>, vector<1x8x128xf32>
    %25 = vector.shape_cast %24 : vector<1x8x128xf32> to vector<8x128xf32>
    %c1_30 = arith.constant 1 : index
    %c0_31 = arith.constant 0 : index
    %c0_32 = arith.constant 0 : index
    %26 = vector.load %arg4[%c1_30, %c0_31, %c0_32] : memref<5x8x128xf32, #tpu.memory_space<vmem>>, vector<1x8x128xf32>
    %27 = vector.shape_cast %26 : vector<1x8x128xf32> to vector<8x128xf32>
    %c2_33 = arith.constant 2 : index
    %c0_34 = arith.constant 0 : index
    %c0_35 = arith.constant 0 : index
    %28 = vector.load %arg4[%c2_33, %c0_34, %c0_35] : memref<5x8x128xf32, #tpu.memory_space<vmem>>, vector<1x8x128xf32>
    %29 = vector.shape_cast %28 : vector<1x8x128xf32> to vector<8x128xf32>
    %c3_36 = arith.constant 3 : index
    %c0_37 = arith.constant 0 : index
    %c0_38 = arith.constant 0 : index
    %30 = vector.load %arg4[%c3_36, %c0_37, %c0_38] : memref<5x8x128xf32, #tpu.memory_space<vmem>>, vector<1x8x128xf32>
    %31 = vector.shape_cast %30 : vector<1x8x128xf32> to vector<8x128xf32>
    %c4_39 = arith.constant 4 : index
    %c0_40 = arith.constant 0 : index
    %c0_41 = arith.constant 0 : index
    %32 = vector.load %arg4[%c4_39, %c0_40, %c0_41] : memref<5x8x128xf32, #tpu.memory_space<vmem>>, vector<1x8x128xf32>
    %33 = vector.shape_cast %32 : vector<1x8x128xf32> to vector<8x128xf32>
    %cst = arith.constant 0.000000e+00 : f32
    %34 = vector.broadcast %cst : f32 to vector<8x128xf32>
    %c8_i32 = arith.constant 8 : i32
    %35 = tpu.dynamic_rotate %5 by %c8_i32 dim 1 : vector<8x128xf32>, i32 -> vector<8x128xf32>
    %36 = arith.addf %3, %35 : vector<8x128xf32>
    %c0_42 = arith.constant 0 : index
    %c0_43 = arith.constant 0 : index
    %c0_44 = arith.constant 0 : index
    %37 = vector.load %arg3[%c0_42, %c0_43, %c0_44] : memref<5x128x128xf32, #tpu.memory_space<vmem>>, vector<1x128x128xf32>
    %38 = vector.shape_cast %37 : vector<1x128x128xf32> to vector<128x128xf32>
    %cst_45 = arith.constant dense<0.000000e+00> : vector<8x128xf32>
    %39 = tpu.matmul %36, %38, %cst_45 {dimension_numbers = #tpu.dot_dimension_numbers<[1], [0], [0], [1], [0, 0, 1, 1], [], []>} : vector<8x128xf32>, vector<128x128xf32>, vector<8x128xf32> -> vector<8x128xf32>
    %40 = arith.addf %39, %25 : vector<8x128xf32>
    %41 = math.tanh %40 : vector<8x128xf32>
    %cst_46 = arith.constant 5.000000e-01 : f32
    %42 = vector.broadcast %cst_46 : f32 to vector<8x128xf32>
    %43 = arith.mulf %42, %41 : vector<8x128xf32>
    %cst_47 = arith.constant 5.000000e-01 : f32
    %44 = vector.broadcast %cst_47 : f32 to vector<8x128xf32>
    %45 = arith.addf %43, %44 : vector<8x128xf32>
    %c96_i32 = arith.constant 96 : i32
    %46 = tpu.dynamic_rotate %45 by %c96_i32 dim 1 : vector<8x128xf32>, i32 -> vector<8x128xf32>
    %c64_i32 = arith.constant 64 : i32
    %47 = tpu.dynamic_rotate %41 by %c64_i32 dim 1 : vector<8x128xf32>, i32 -> vector<8x128xf32>
    %c32_i32_48 = arith.constant 32 : i32
    %48 = tpu.dynamic_rotate %45 by %c32_i32_48 dim 1 : vector<8x128xf32>, i32 -> vector<8x128xf32>
    %49 = arith.mulf %45, %47 : vector<8x128xf32>
    %cst_49 = arith.constant 0.000000e+00 : f32
    %50 = vector.broadcast %cst_49 : f32 to vector<8x128xf32>
    %51 = arith.select %2, %49, %50 : vector<8x128xi1>, vector<8x128xf32>
    %52 = arith.mulf %46, %15 : vector<8x128xf32>
    %53 = arith.addf %52, %51 : vector<8x128xf32>
    %54 = math.tanh %53 : vector<8x128xf32>
    %55 = arith.mulf %48, %54 : vector<8x128xf32>
    %c8_i32_50 = arith.constant 8 : i32
    %56 = tpu.dynamic_rotate %7 by %c8_i32_50 dim 1 : vector<8x128xf32>, i32 -> vector<8x128xf32>
    %57 = arith.addf %55, %56 : vector<8x128xf32>
    %c1_51 = arith.constant 1 : index
    %c0_52 = arith.constant 0 : index
    %c0_53 = arith.constant 0 : index
    %58 = vector.load %arg3[%c1_51, %c0_52, %c0_53] : memref<5x128x128xf32, #tpu.memory_space<vmem>>, vector<1x128x128xf32>
    %59 = vector.shape_cast %58 : vector<1x128x128xf32> to vector<128x128xf32>
    %cst_54 = arith.constant dense<0.000000e+00> : vector<8x128xf32>
    %60 = tpu.matmul %57, %59, %cst_54 {dimension_numbers = #tpu.dot_dimension_numbers<[1], [0], [0], [1], [0, 0, 1, 1], [], []>} : vector<8x128xf32>, vector<128x128xf32>, vector<8x128xf32> -> vector<8x128xf32>
    %61 = arith.addf %60, %27 : vector<8x128xf32>
    %62 = math.tanh %61 : vector<8x128xf32>
    %cst_55 = arith.constant 5.000000e-01 : f32
    %63 = vector.broadcast %cst_55 : f32 to vector<8x128xf32>
    %64 = arith.mulf %63, %62 : vector<8x128xf32>
    %cst_56 = arith.constant 5.000000e-01 : f32
    %65 = vector.broadcast %cst_56 : f32 to vector<8x128xf32>
    %66 = arith.addf %64, %65 : vector<8x128xf32>
    %c96_i32_57 = arith.constant 96 : i32
    %67 = tpu.dynamic_rotate %66 by %c96_i32_57 dim 1 : vector<8x128xf32>, i32 -> vector<8x128xf32>
    %c64_i32_58 = arith.constant 64 : i32
    %68 = tpu.dynamic_rotate %62 by %c64_i32_58 dim 1 : vector<8x128xf32>, i32 -> vector<8x128xf32>
    %c32_i32_59 = arith.constant 32 : i32
    %69 = tpu.dynamic_rotate %66 by %c32_i32_59 dim 1 : vector<8x128xf32>, i32 -> vector<8x128xf32>
    %70 = arith.mulf %66, %68 : vector<8x128xf32>
    %cst_60 = arith.constant 0.000000e+00 : f32
    %71 = vector.broadcast %cst_60 : f32 to vector<8x128xf32>
    %72 = arith.select %2, %70, %71 : vector<8x128xi1>, vector<8x128xf32>
    %73 = arith.mulf %67, %17 : vector<8x128xf32>
    %74 = arith.addf %73, %72 : vector<8x128xf32>
    %75 = math.tanh %74 : vector<8x128xf32>
    %76 = arith.mulf %69, %75 : vector<8x128xf32>
    %c8_i32_61 = arith.constant 8 : i32
    %77 = tpu.dynamic_rotate %9 by %c8_i32_61 dim 1 : vector<8x128xf32>, i32 -> vector<8x128xf32>
    %78 = arith.addf %76, %77 : vector<8x128xf32>
    %c2_62 = arith.constant 2 : index
    %c0_63 = arith.constant 0 : index
    %c0_64 = arith.constant 0 : index
    %79 = vector.load %arg3[%c2_62, %c0_63, %c0_64] : memref<5x128x128xf32, #tpu.memory_space<vmem>>, vector<1x128x128xf32>
    %80 = vector.shape_cast %79 : vector<1x128x128xf32> to vector<128x128xf32>
    %cst_65 = arith.constant dense<0.000000e+00> : vector<8x128xf32>
    %81 = tpu.matmul %78, %80, %cst_65 {dimension_numbers = #tpu.dot_dimension_numbers<[1], [0], [0], [1], [0, 0, 1, 1], [], []>} : vector<8x128xf32>, vector<128x128xf32>, vector<8x128xf32> -> vector<8x128xf32>
    %82 = arith.addf %81, %29 : vector<8x128xf32>
    %83 = math.tanh %82 : vector<8x128xf32>
    %cst_66 = arith.constant 5.000000e-01 : f32
    %84 = vector.broadcast %cst_66 : f32 to vector<8x128xf32>
    %85 = arith.mulf %84, %83 : vector<8x128xf32>
    %cst_67 = arith.constant 5.000000e-01 : f32
    %86 = vector.broadcast %cst_67 : f32 to vector<8x128xf32>
    %87 = arith.addf %85, %86 : vector<8x128xf32>
    %c96_i32_68 = arith.constant 96 : i32
    %88 = tpu.dynamic_rotate %87 by %c96_i32_68 dim 1 : vector<8x128xf32>, i32 -> vector<8x128xf32>
    %c64_i32_69 = arith.constant 64 : i32
    %89 = tpu.dynamic_rotate %83 by %c64_i32_69 dim 1 : vector<8x128xf32>, i32 -> vector<8x128xf32>
    %c32_i32_70 = arith.constant 32 : i32
    %90 = tpu.dynamic_rotate %87 by %c32_i32_70 dim 1 : vector<8x128xf32>, i32 -> vector<8x128xf32>
    %91 = arith.mulf %87, %89 : vector<8x128xf32>
    %cst_71 = arith.constant 0.000000e+00 : f32
    %92 = vector.broadcast %cst_71 : f32 to vector<8x128xf32>
    %93 = arith.select %2, %91, %92 : vector<8x128xi1>, vector<8x128xf32>
    %94 = arith.mulf %88, %19 : vector<8x128xf32>
    %95 = arith.addf %94, %93 : vector<8x128xf32>
    %96 = math.tanh %95 : vector<8x128xf32>
    %97 = arith.mulf %90, %96 : vector<8x128xf32>
    %c8_i32_72 = arith.constant 8 : i32
    %98 = tpu.dynamic_rotate %11 by %c8_i32_72 dim 1 : vector<8x128xf32>, i32 -> vector<8x128xf32>
    %99 = arith.addf %97, %98 : vector<8x128xf32>
    %c3_73 = arith.constant 3 : index
    %c0_74 = arith.constant 0 : index
    %c0_75 = arith.constant 0 : index
    %100 = vector.load %arg3[%c3_73, %c0_74, %c0_75] : memref<5x128x128xf32, #tpu.memory_space<vmem>>, vector<1x128x128xf32>
    %101 = vector.shape_cast %100 : vector<1x128x128xf32> to vector<128x128xf32>
    %cst_76 = arith.constant dense<0.000000e+00> : vector<8x128xf32>
    %102 = tpu.matmul %99, %101, %cst_76 {dimension_numbers = #tpu.dot_dimension_numbers<[1], [0], [0], [1], [0, 0, 1, 1], [], []>} : vector<8x128xf32>, vector<128x128xf32>, vector<8x128xf32> -> vector<8x128xf32>
    %103 = arith.addf %102, %31 : vector<8x128xf32>
    %104 = math.tanh %103 : vector<8x128xf32>
    %cst_77 = arith.constant 5.000000e-01 : f32
    %105 = vector.broadcast %cst_77 : f32 to vector<8x128xf32>
    %106 = arith.mulf %105, %104 : vector<8x128xf32>
    %cst_78 = arith.constant 5.000000e-01 : f32
    %107 = vector.broadcast %cst_78 : f32 to vector<8x128xf32>
    %108 = arith.addf %106, %107 : vector<8x128xf32>
    %c96_i32_79 = arith.constant 96 : i32
    %109 = tpu.dynamic_rotate %108 by %c96_i32_79 dim 1 : vector<8x128xf32>, i32 -> vector<8x128xf32>
    %c64_i32_80 = arith.constant 64 : i32
    %110 = tpu.dynamic_rotate %104 by %c64_i32_80 dim 1 : vector<8x128xf32>, i32 -> vector<8x128xf32>
    %c32_i32_81 = arith.constant 32 : i32
    %111 = tpu.dynamic_rotate %108 by %c32_i32_81 dim 1 : vector<8x128xf32>, i32 -> vector<8x128xf32>
    %112 = arith.mulf %108, %110 : vector<8x128xf32>
    %cst_82 = arith.constant 0.000000e+00 : f32
    %113 = vector.broadcast %cst_82 : f32 to vector<8x128xf32>
    %114 = arith.select %2, %112, %113 : vector<8x128xi1>, vector<8x128xf32>
    %115 = arith.mulf %109, %21 : vector<8x128xf32>
    %116 = arith.addf %115, %114 : vector<8x128xf32>
    %117 = math.tanh %116 : vector<8x128xf32>
    %118 = arith.mulf %111, %117 : vector<8x128xf32>
    %c8_i32_83 = arith.constant 8 : i32
    %119 = tpu.dynamic_rotate %13 by %c8_i32_83 dim 1 : vector<8x128xf32>, i32 -> vector<8x128xf32>
    %120 = arith.addf %118, %119 : vector<8x128xf32>
    %c4_84 = arith.constant 4 : index
    %c0_85 = arith.constant 0 : index
    %c0_86 = arith.constant 0 : index
    %121 = vector.load %arg3[%c4_84, %c0_85, %c0_86] : memref<5x128x128xf32, #tpu.memory_space<vmem>>, vector<1x128x128xf32>
    %122 = vector.shape_cast %121 : vector<1x128x128xf32> to vector<128x128xf32>
    %cst_87 = arith.constant dense<0.000000e+00> : vector<8x128xf32>
    %123 = tpu.matmul %120, %122, %cst_87 {dimension_numbers = #tpu.dot_dimension_numbers<[1], [0], [0], [1], [0, 0, 1, 1], [], []>} : vector<8x128xf32>, vector<128x128xf32>, vector<8x128xf32> -> vector<8x128xf32>
    %124 = arith.addf %123, %33 : vector<8x128xf32>
    %125 = math.tanh %124 : vector<8x128xf32>
    %cst_88 = arith.constant 5.000000e-01 : f32
    %126 = vector.broadcast %cst_88 : f32 to vector<8x128xf32>
    %127 = arith.mulf %126, %125 : vector<8x128xf32>
    %cst_89 = arith.constant 5.000000e-01 : f32
    %128 = vector.broadcast %cst_89 : f32 to vector<8x128xf32>
    %129 = arith.addf %127, %128 : vector<8x128xf32>
    %c96_i32_90 = arith.constant 96 : i32
    %130 = tpu.dynamic_rotate %129 by %c96_i32_90 dim 1 : vector<8x128xf32>, i32 -> vector<8x128xf32>
    %c64_i32_91 = arith.constant 64 : i32
    %131 = tpu.dynamic_rotate %125 by %c64_i32_91 dim 1 : vector<8x128xf32>, i32 -> vector<8x128xf32>
    %c32_i32_92 = arith.constant 32 : i32
    %132 = tpu.dynamic_rotate %129 by %c32_i32_92 dim 1 : vector<8x128xf32>, i32 -> vector<8x128xf32>
    %133 = arith.mulf %129, %131 : vector<8x128xf32>
    %cst_93 = arith.constant 0.000000e+00 : f32
    %134 = vector.broadcast %cst_93 : f32 to vector<8x128xf32>
    %135 = arith.select %2, %133, %134 : vector<8x128xi1>, vector<8x128xf32>
    %136 = arith.mulf %130, %23 : vector<8x128xf32>
    %137 = arith.addf %136, %135 : vector<8x128xf32>
    %138 = math.tanh %137 : vector<8x128xf32>
    %139 = arith.mulf %132, %138 : vector<8x128xf32>
    %140 = arith.addf %34, %139 : vector<8x128xf32>
    %c8_i32_94 = arith.constant 8 : i32
    %141 = tpu.dynamic_rotate %55 by %c8_i32_94 dim 1 : vector<8x128xf32>, i32 -> vector<8x128xf32>
    %142 = arith.addf %139, %141 : vector<8x128xf32>
    %c0_95 = arith.constant 0 : index
    %c0_96 = arith.constant 0 : index
    %c0_97 = arith.constant 0 : index
    %143 = vector.load %arg3[%c0_95, %c0_96, %c0_97] : memref<5x128x128xf32, #tpu.memory_space<vmem>>, vector<1x128x128xf32>
    %144 = vector.shape_cast %143 : vector<1x128x128xf32> to vector<128x128xf32>
    %cst_98 = arith.constant dense<0.000000e+00> : vector<8x128xf32>
    %145 = tpu.matmul %142, %144, %cst_98 {dimension_numbers = #tpu.dot_dimension_numbers<[1], [0], [0], [1], [0, 0, 1, 1], [], []>} : vector<8x128xf32>, vector<128x128xf32>, vector<8x128xf32> -> vector<8x128xf32>
    %146 = arith.addf %145, %25 : vector<8x128xf32>
    %147 = math.tanh %146 : vector<8x128xf32>
    %cst_99 = arith.constant 5.000000e-01 : f32
    %148 = vector.broadcast %cst_99 : f32 to vector<8x128xf32>
    %149 = arith.mulf %148, %147 : vector<8x128xf32>
    %cst_100 = arith.constant 5.000000e-01 : f32
    %150 = vector.broadcast %cst_100 : f32 to vector<8x128xf32>
    %151 = arith.addf %149, %150 : vector<8x128xf32>
    %c96_i32_101 = arith.constant 96 : i32
    %152 = tpu.dynamic_rotate %151 by %c96_i32_101 dim 1 : vector<8x128xf32>, i32 -> vector<8x128xf32>
    %c64_i32_102 = arith.constant 64 : i32
    %153 = tpu.dynamic_rotate %147 by %c64_i32_102 dim 1 : vector<8x128xf32>, i32 -> vector<8x128xf32>
    %c32_i32_103 = arith.constant 32 : i32
    %154 = tpu.dynamic_rotate %151 by %c32_i32_103 dim 1 : vector<8x128xf32>, i32 -> vector<8x128xf32>
    %155 = arith.mulf %151, %153 : vector<8x128xf32>
    %cst_104 = arith.constant 0.000000e+00 : f32
    %156 = vector.broadcast %cst_104 : f32 to vector<8x128xf32>
    %157 = arith.select %2, %155, %156 : vector<8x128xi1>, vector<8x128xf32>
    %158 = arith.mulf %152, %53 : vector<8x128xf32>
    %159 = arith.addf %158, %157 : vector<8x128xf32>
    %160 = math.tanh %159 : vector<8x128xf32>
    %161 = arith.mulf %154, %160 : vector<8x128xf32>
    %c8_i32_105 = arith.constant 8 : i32
    %162 = tpu.dynamic_rotate %76 by %c8_i32_105 dim 1 : vector<8x128xf32>, i32 -> vector<8x128xf32>
    %163 = arith.addf %161, %162 : vector<8x128xf32>
    %c1_106 = arith.constant 1 : index
    %c0_107 = arith.constant 0 : index
    %c0_108 = arith.constant 0 : index
    %164 = vector.load %arg3[%c1_106, %c0_107, %c0_108] : memref<5x128x128xf32, #tpu.memory_space<vmem>>, vector<1x128x128xf32>
    %165 = vector.shape_cast %164 : vector<1x128x128xf32> to vector<128x128xf32>
    %cst_109 = arith.constant dense<0.000000e+00> : vector<8x128xf32>
    %166 = tpu.matmul %163, %165, %cst_109 {dimension_numbers = #tpu.dot_dimension_numbers<[1], [0], [0], [1], [0, 0, 1, 1], [], []>} : vector<8x128xf32>, vector<128x128xf32>, vector<8x128xf32> -> vector<8x128xf32>
    %167 = arith.addf %166, %27 : vector<8x128xf32>
    %168 = math.tanh %167 : vector<8x128xf32>
    %cst_110 = arith.constant 5.000000e-01 : f32
    %169 = vector.broadcast %cst_110 : f32 to vector<8x128xf32>
    %170 = arith.mulf %169, %168 : vector<8x128xf32>
    %cst_111 = arith.constant 5.000000e-01 : f32
    %171 = vector.broadcast %cst_111 : f32 to vector<8x128xf32>
    %172 = arith.addf %170, %171 : vector<8x128xf32>
    %c96_i32_112 = arith.constant 96 : i32
    %173 = tpu.dynamic_rotate %172 by %c96_i32_112 dim 1 : vector<8x128xf32>, i32 -> vector<8x128xf32>
    %c64_i32_113 = arith.constant 64 : i32
    %174 = tpu.dynamic_rotate %168 by %c64_i32_113 dim 1 : vector<8x128xf32>, i32 -> vector<8x128xf32>
    %c32_i32_114 = arith.constant 32 : i32
    %175 = tpu.dynamic_rotate %172 by %c32_i32_114 dim 1 : vector<8x128xf32>, i32 -> vector<8x128xf32>
    %176 = arith.mulf %172, %174 : vector<8x128xf32>
    %cst_115 = arith.constant 0.000000e+00 : f32
    %177 = vector.broadcast %cst_115 : f32 to vector<8x128xf32>
    %178 = arith.select %2, %176, %177 : vector<8x128xi1>, vector<8x128xf32>
    %179 = arith.mulf %173, %74 : vector<8x128xf32>
    %180 = arith.addf %179, %178 : vector<8x128xf32>
    %181 = math.tanh %180 : vector<8x128xf32>
    %182 = arith.mulf %175, %181 : vector<8x128xf32>
    %c8_i32_116 = arith.constant 8 : i32
    %183 = tpu.dynamic_rotate %97 by %c8_i32_116 dim 1 : vector<8x128xf32>, i32 -> vector<8x128xf32>
    %184 = arith.addf %182, %183 : vector<8x128xf32>
    %c2_117 = arith.constant 2 : index
    %c0_118 = arith.constant 0 : index
    %c0_119 = arith.constant 0 : index
    %185 = vector.load %arg3[%c2_117, %c0_118, %c0_119] : memref<5x128x128xf32, #tpu.memory_space<vmem>>, vector<1x128x128xf32>
    %186 = vector.shape_cast %185 : vector<1x128x128xf32> to vector<128x128xf32>
    %cst_120 = arith.constant dense<0.000000e+00> : vector<8x128xf32>
    %187 = tpu.matmul %184, %186, %cst_120 {dimension_numbers = #tpu.dot_dimension_numbers<[1], [0], [0], [1], [0, 0, 1, 1], [], []>} : vector<8x128xf32>, vector<128x128xf32>, vector<8x128xf32> -> vector<8x128xf32>
    %188 = arith.addf %187, %29 : vector<8x128xf32>
    %189 = math.tanh %188 : vector<8x128xf32>
    %cst_121 = arith.constant 5.000000e-01 : f32
    %190 = vector.broadcast %cst_121 : f32 to vector<8x128xf32>
    %191 = arith.mulf %190, %189 : vector<8x128xf32>
    %cst_122 = arith.constant 5.000000e-01 : f32
    %192 = vector.broadcast %cst_122 : f32 to vector<8x128xf32>
    %193 = arith.addf %191, %192 : vector<8x128xf32>
    %c96_i32_123 = arith.constant 96 : i32
    %194 = tpu.dynamic_rotate %193 by %c96_i32_123 dim 1 : vector<8x128xf32>, i32 -> vector<8x128xf32>
    %c64_i32_124 = arith.constant 64 : i32
    %195 = tpu.dynamic_rotate %189 by %c64_i32_124 dim 1 : vector<8x128xf32>, i32 -> vector<8x128xf32>
    %c32_i32_125 = arith.constant 32 : i32
    %196 = tpu.dynamic_rotate %193 by %c32_i32_125 dim 1 : vector<8x128xf32>, i32 -> vector<8x128xf32>
    %197 = arith.mulf %193, %195 : vector<8x128xf32>
    %cst_126 = arith.constant 0.000000e+00 : f32
    %198 = vector.broadcast %cst_126 : f32 to vector<8x128xf32>
    %199 = arith.select %2, %197, %198 : vector<8x128xi1>, vector<8x128xf32>
    %200 = arith.mulf %194, %95 : vector<8x128xf32>
    %201 = arith.addf %200, %199 : vector<8x128xf32>
    %202 = math.tanh %201 : vector<8x128xf32>
    %203 = arith.mulf %196, %202 : vector<8x128xf32>
    %c8_i32_127 = arith.constant 8 : i32
    %204 = tpu.dynamic_rotate %118 by %c8_i32_127 dim 1 : vector<8x128xf32>, i32 -> vector<8x128xf32>
    %205 = arith.addf %203, %204 : vector<8x128xf32>
    %c3_128 = arith.constant 3 : index
    %c0_129 = arith.constant 0 : index
    %c0_130 = arith.constant 0 : index
    %206 = vector.load %arg3[%c3_128, %c0_129, %c0_130] : memref<5x128x128xf32, #tpu.memory_space<vmem>>, vector<1x128x128xf32>
    %207 = vector.shape_cast %206 : vector<1x128x128xf32> to vector<128x128xf32>
    %cst_131 = arith.constant dense<0.000000e+00> : vector<8x128xf32>
    %208 = tpu.matmul %205, %207, %cst_131 {dimension_numbers = #tpu.dot_dimension_numbers<[1], [0], [0], [1], [0, 0, 1, 1], [], []>} : vector<8x128xf32>, vector<128x128xf32>, vector<8x128xf32> -> vector<8x128xf32>
    %209 = arith.addf %208, %31 : vector<8x128xf32>
    %210 = math.tanh %209 : vector<8x128xf32>
    %cst_132 = arith.constant 5.000000e-01 : f32
    %211 = vector.broadcast %cst_132 : f32 to vector<8x128xf32>
    %212 = arith.mulf %211, %210 : vector<8x128xf32>
    %cst_133 = arith.constant 5.000000e-01 : f32
    %213 = vector.broadcast %cst_133 : f32 to vector<8x128xf32>
    %214 = arith.addf %212, %213 : vector<8x128xf32>
    %c96_i32_134 = arith.constant 96 : i32
    %215 = tpu.dynamic_rotate %214 by %c96_i32_134 dim 1 : vector<8x128xf32>, i32 -> vector<8x128xf32>
    %c64_i32_135 = arith.constant 64 : i32
    %216 = tpu.dynamic_rotate %210 by %c64_i32_135 dim 1 : vector<8x128xf32>, i32 -> vector<8x128xf32>
    %c32_i32_136 = arith.constant 32 : i32
    %217 = tpu.dynamic_rotate %214 by %c32_i32_136 dim 1 : vector<8x128xf32>, i32 -> vector<8x128xf32>
    %218 = arith.mulf %214, %216 : vector<8x128xf32>
    %cst_137 = arith.constant 0.000000e+00 : f32
    %219 = vector.broadcast %cst_137 : f32 to vector<8x128xf32>
    %220 = arith.select %2, %218, %219 : vector<8x128xi1>, vector<8x128xf32>
    %221 = arith.mulf %215, %116 : vector<8x128xf32>
    %222 = arith.addf %221, %220 : vector<8x128xf32>
    %223 = math.tanh %222 : vector<8x128xf32>
    %224 = arith.mulf %217, %223 : vector<8x128xf32>
    %c8_i32_138 = arith.constant 8 : i32
    %225 = tpu.dynamic_rotate %139 by %c8_i32_138 dim 1 : vector<8x128xf32>, i32 -> vector<8x128xf32>
    %226 = arith.addf %224, %225 : vector<8x128xf32>
    %c4_139 = arith.constant 4 : index
    %c0_140 = arith.constant 0 : index
    %c0_141 = arith.constant 0 : index
    %227 = vector.load %arg3[%c4_139, %c0_140, %c0_141] : memref<5x128x128xf32, #tpu.memory_space<vmem>>, vector<1x128x128xf32>
    %228 = vector.shape_cast %227 : vector<1x128x128xf32> to vector<128x128xf32>
    %cst_142 = arith.constant dense<0.000000e+00> : vector<8x128xf32>
    %229 = tpu.matmul %226, %228, %cst_142 {dimension_numbers = #tpu.dot_dimension_numbers<[1], [0], [0], [1], [0, 0, 1, 1], [], []>} : vector<8x128xf32>, vector<128x128xf32>, vector<8x128xf32> -> vector<8x128xf32>
    %230 = arith.addf %229, %33 : vector<8x128xf32>
    %231 = math.tanh %230 : vector<8x128xf32>
    %cst_143 = arith.constant 5.000000e-01 : f32
    %232 = vector.broadcast %cst_143 : f32 to vector<8x128xf32>
    %233 = arith.mulf %232, %231 : vector<8x128xf32>
    %cst_144 = arith.constant 5.000000e-01 : f32
    %234 = vector.broadcast %cst_144 : f32 to vector<8x128xf32>
    %235 = arith.addf %233, %234 : vector<8x128xf32>
    %c96_i32_145 = arith.constant 96 : i32
    %236 = tpu.dynamic_rotate %235 by %c96_i32_145 dim 1 : vector<8x128xf32>, i32 -> vector<8x128xf32>
    %c64_i32_146 = arith.constant 64 : i32
    %237 = tpu.dynamic_rotate %231 by %c64_i32_146 dim 1 : vector<8x128xf32>, i32 -> vector<8x128xf32>
    %c32_i32_147 = arith.constant 32 : i32
    %238 = tpu.dynamic_rotate %235 by %c32_i32_147 dim 1 : vector<8x128xf32>, i32 -> vector<8x128xf32>
    %239 = arith.mulf %235, %237 : vector<8x128xf32>
    %cst_148 = arith.constant 0.000000e+00 : f32
    %240 = vector.broadcast %cst_148 : f32 to vector<8x128xf32>
    %241 = arith.select %2, %239, %240 : vector<8x128xi1>, vector<8x128xf32>
    %242 = arith.mulf %236, %137 : vector<8x128xf32>
    %243 = arith.addf %242, %241 : vector<8x128xf32>
    %244 = math.tanh %243 : vector<8x128xf32>
    %245 = arith.mulf %238, %244 : vector<8x128xf32>
    %246 = arith.addf %140, %245 : vector<8x128xf32>
    %c8_i32_149 = arith.constant 8 : i32
    %247 = tpu.dynamic_rotate %161 by %c8_i32_149 dim 1 : vector<8x128xf32>, i32 -> vector<8x128xf32>
    %248 = arith.addf %245, %247 : vector<8x128xf32>
    %c0_150 = arith.constant 0 : index
    %c0_151 = arith.constant 0 : index
    %c0_152 = arith.constant 0 : index
    %249 = vector.load %arg3[%c0_150, %c0_151, %c0_152] : memref<5x128x128xf32, #tpu.memory_space<vmem>>, vector<1x128x128xf32>
    %250 = vector.shape_cast %249 : vector<1x128x128xf32> to vector<128x128xf32>
    %cst_153 = arith.constant dense<0.000000e+00> : vector<8x128xf32>
    %251 = tpu.matmul %248, %250, %cst_153 {dimension_numbers = #tpu.dot_dimension_numbers<[1], [0], [0], [1], [0, 0, 1, 1], [], []>} : vector<8x128xf32>, vector<128x128xf32>, vector<8x128xf32> -> vector<8x128xf32>
    %252 = arith.addf %251, %25 : vector<8x128xf32>
    %253 = math.tanh %252 : vector<8x128xf32>
    %cst_154 = arith.constant 5.000000e-01 : f32
    %254 = vector.broadcast %cst_154 : f32 to vector<8x128xf32>
    %255 = arith.mulf %254, %253 : vector<8x128xf32>
    %cst_155 = arith.constant 5.000000e-01 : f32
    %256 = vector.broadcast %cst_155 : f32 to vector<8x128xf32>
    %257 = arith.addf %255, %256 : vector<8x128xf32>
    %c96_i32_156 = arith.constant 96 : i32
    %258 = tpu.dynamic_rotate %257 by %c96_i32_156 dim 1 : vector<8x128xf32>, i32 -> vector<8x128xf32>
    %c64_i32_157 = arith.constant 64 : i32
    %259 = tpu.dynamic_rotate %253 by %c64_i32_157 dim 1 : vector<8x128xf32>, i32 -> vector<8x128xf32>
    %c32_i32_158 = arith.constant 32 : i32
    %260 = tpu.dynamic_rotate %257 by %c32_i32_158 dim 1 : vector<8x128xf32>, i32 -> vector<8x128xf32>
    %261 = arith.mulf %257, %259 : vector<8x128xf32>
    %cst_159 = arith.constant 0.000000e+00 : f32
    %262 = vector.broadcast %cst_159 : f32 to vector<8x128xf32>
    %263 = arith.select %2, %261, %262 : vector<8x128xi1>, vector<8x128xf32>
    %264 = arith.mulf %258, %159 : vector<8x128xf32>
    %265 = arith.addf %264, %263 : vector<8x128xf32>
    %266 = math.tanh %265 : vector<8x128xf32>
    %267 = arith.mulf %260, %266 : vector<8x128xf32>
    %c8_i32_160 = arith.constant 8 : i32
    %268 = tpu.dynamic_rotate %182 by %c8_i32_160 dim 1 : vector<8x128xf32>, i32 -> vector<8x128xf32>
    %269 = arith.addf %267, %268 : vector<8x128xf32>
    %c1_161 = arith.constant 1 : index
    %c0_162 = arith.constant 0 : index
    %c0_163 = arith.constant 0 : index
    %270 = vector.load %arg3[%c1_161, %c0_162, %c0_163] : memref<5x128x128xf32, #tpu.memory_space<vmem>>, vector<1x128x128xf32>
    %271 = vector.shape_cast %270 : vector<1x128x128xf32> to vector<128x128xf32>
    %cst_164 = arith.constant dense<0.000000e+00> : vector<8x128xf32>
    %272 = tpu.matmul %269, %271, %cst_164 {dimension_numbers = #tpu.dot_dimension_numbers<[1], [0], [0], [1], [0, 0, 1, 1], [], []>} : vector<8x128xf32>, vector<128x128xf32>, vector<8x128xf32> -> vector<8x128xf32>
    %273 = arith.addf %272, %27 : vector<8x128xf32>
    %274 = math.tanh %273 : vector<8x128xf32>
    %cst_165 = arith.constant 5.000000e-01 : f32
    %275 = vector.broadcast %cst_165 : f32 to vector<8x128xf32>
    %276 = arith.mulf %275, %274 : vector<8x128xf32>
    %cst_166 = arith.constant 5.000000e-01 : f32
    %277 = vector.broadcast %cst_166 : f32 to vector<8x128xf32>
    %278 = arith.addf %276, %277 : vector<8x128xf32>
    %c96_i32_167 = arith.constant 96 : i32
    %279 = tpu.dynamic_rotate %278 by %c96_i32_167 dim 1 : vector<8x128xf32>, i32 -> vector<8x128xf32>
    %c64_i32_168 = arith.constant 64 : i32
    %280 = tpu.dynamic_rotate %274 by %c64_i32_168 dim 1 : vector<8x128xf32>, i32 -> vector<8x128xf32>
    %c32_i32_169 = arith.constant 32 : i32
    %281 = tpu.dynamic_rotate %278 by %c32_i32_169 dim 1 : vector<8x128xf32>, i32 -> vector<8x128xf32>
    %282 = arith.mulf %278, %280 : vector<8x128xf32>
    %cst_170 = arith.constant 0.000000e+00 : f32
    %283 = vector.broadcast %cst_170 : f32 to vector<8x128xf32>
    %284 = arith.select %2, %282, %283 : vector<8x128xi1>, vector<8x128xf32>
    %285 = arith.mulf %279, %180 : vector<8x128xf32>
    %286 = arith.addf %285, %284 : vector<8x128xf32>
    %287 = math.tanh %286 : vector<8x128xf32>
    %288 = arith.mulf %281, %287 : vector<8x128xf32>
    %c8_i32_171 = arith.constant 8 : i32
    %289 = tpu.dynamic_rotate %203 by %c8_i32_171 dim 1 : vector<8x128xf32>, i32 -> vector<8x128xf32>
    %290 = arith.addf %288, %289 : vector<8x128xf32>
    %c2_172 = arith.constant 2 : index
    %c0_173 = arith.constant 0 : index
    %c0_174 = arith.constant 0 : index
    %291 = vector.load %arg3[%c2_172, %c0_173, %c0_174] : memref<5x128x128xf32, #tpu.memory_space<vmem>>, vector<1x128x128xf32>
    %292 = vector.shape_cast %291 : vector<1x128x128xf32> to vector<128x128xf32>
    %cst_175 = arith.constant dense<0.000000e+00> : vector<8x128xf32>
    %293 = tpu.matmul %290, %292, %cst_175 {dimension_numbers = #tpu.dot_dimension_numbers<[1], [0], [0], [1], [0, 0, 1, 1], [], []>} : vector<8x128xf32>, vector<128x128xf32>, vector<8x128xf32> -> vector<8x128xf32>
    %294 = arith.addf %293, %29 : vector<8x128xf32>
    %295 = math.tanh %294 : vector<8x128xf32>
    %cst_176 = arith.constant 5.000000e-01 : f32
    %296 = vector.broadcast %cst_176 : f32 to vector<8x128xf32>
    %297 = arith.mulf %296, %295 : vector<8x128xf32>
    %cst_177 = arith.constant 5.000000e-01 : f32
    %298 = vector.broadcast %cst_177 : f32 to vector<8x128xf32>
    %299 = arith.addf %297, %298 : vector<8x128xf32>
    %c96_i32_178 = arith.constant 96 : i32
    %300 = tpu.dynamic_rotate %299 by %c96_i32_178 dim 1 : vector<8x128xf32>, i32 -> vector<8x128xf32>
    %c64_i32_179 = arith.constant 64 : i32
    %301 = tpu.dynamic_rotate %295 by %c64_i32_179 dim 1 : vector<8x128xf32>, i32 -> vector<8x128xf32>
    %c32_i32_180 = arith.constant 32 : i32
    %302 = tpu.dynamic_rotate %299 by %c32_i32_180 dim 1 : vector<8x128xf32>, i32 -> vector<8x128xf32>
    %303 = arith.mulf %299, %301 : vector<8x128xf32>
    %cst_181 = arith.constant 0.000000e+00 : f32
    %304 = vector.broadcast %cst_181 : f32 to vector<8x128xf32>
    %305 = arith.select %2, %303, %304 : vector<8x128xi1>, vector<8x128xf32>
    %306 = arith.mulf %300, %201 : vector<8x128xf32>
    %307 = arith.addf %306, %305 : vector<8x128xf32>
    %308 = math.tanh %307 : vector<8x128xf32>
    %309 = arith.mulf %302, %308 : vector<8x128xf32>
    %c8_i32_182 = arith.constant 8 : i32
    %310 = tpu.dynamic_rotate %224 by %c8_i32_182 dim 1 : vector<8x128xf32>, i32 -> vector<8x128xf32>
    %311 = arith.addf %309, %310 : vector<8x128xf32>
    %c3_183 = arith.constant 3 : index
    %c0_184 = arith.constant 0 : index
    %c0_185 = arith.constant 0 : index
    %312 = vector.load %arg3[%c3_183, %c0_184, %c0_185] : memref<5x128x128xf32, #tpu.memory_space<vmem>>, vector<1x128x128xf32>
    %313 = vector.shape_cast %312 : vector<1x128x128xf32> to vector<128x128xf32>
    %cst_186 = arith.constant dense<0.000000e+00> : vector<8x128xf32>
    %314 = tpu.matmul %311, %313, %cst_186 {dimension_numbers = #tpu.dot_dimension_numbers<[1], [0], [0], [1], [0, 0, 1, 1], [], []>} : vector<8x128xf32>, vector<128x128xf32>, vector<8x128xf32> -> vector<8x128xf32>
    %315 = arith.addf %314, %31 : vector<8x128xf32>
    %316 = math.tanh %315 : vector<8x128xf32>
    %cst_187 = arith.constant 5.000000e-01 : f32
    %317 = vector.broadcast %cst_187 : f32 to vector<8x128xf32>
    %318 = arith.mulf %317, %316 : vector<8x128xf32>
    %cst_188 = arith.constant 5.000000e-01 : f32
    %319 = vector.broadcast %cst_188 : f32 to vector<8x128xf32>
    %320 = arith.addf %318, %319 : vector<8x128xf32>
    %c96_i32_189 = arith.constant 96 : i32
    %321 = tpu.dynamic_rotate %320 by %c96_i32_189 dim 1 : vector<8x128xf32>, i32 -> vector<8x128xf32>
    %c64_i32_190 = arith.constant 64 : i32
    %322 = tpu.dynamic_rotate %316 by %c64_i32_190 dim 1 : vector<8x128xf32>, i32 -> vector<8x128xf32>
    %c32_i32_191 = arith.constant 32 : i32
    %323 = tpu.dynamic_rotate %320 by %c32_i32_191 dim 1 : vector<8x128xf32>, i32 -> vector<8x128xf32>
    %324 = arith.mulf %320, %322 : vector<8x128xf32>
    %cst_192 = arith.constant 0.000000e+00 : f32
    %325 = vector.broadcast %cst_192 : f32 to vector<8x128xf32>
    %326 = arith.select %2, %324, %325 : vector<8x128xi1>, vector<8x128xf32>
    %327 = arith.mulf %321, %222 : vector<8x128xf32>
    %328 = arith.addf %327, %326 : vector<8x128xf32>
    %329 = math.tanh %328 : vector<8x128xf32>
    %330 = arith.mulf %323, %329 : vector<8x128xf32>
    %c8_i32_193 = arith.constant 8 : i32
    %331 = tpu.dynamic_rotate %245 by %c8_i32_193 dim 1 : vector<8x128xf32>, i32 -> vector<8x128xf32>
    %332 = arith.addf %330, %331 : vector<8x128xf32>
    %c4_194 = arith.constant 4 : index
    %c0_195 = arith.constant 0 : index
    %c0_196 = arith.constant 0 : index
    %333 = vector.load %arg3[%c4_194, %c0_195, %c0_196] : memref<5x128x128xf32, #tpu.memory_space<vmem>>, vector<1x128x128xf32>
    %334 = vector.shape_cast %333 : vector<1x128x128xf32> to vector<128x128xf32>
    %cst_197 = arith.constant dense<0.000000e+00> : vector<8x128xf32>
    %335 = tpu.matmul %332, %334, %cst_197 {dimension_numbers = #tpu.dot_dimension_numbers<[1], [0], [0], [1], [0, 0, 1, 1], [], []>} : vector<8x128xf32>, vector<128x128xf32>, vector<8x128xf32> -> vector<8x128xf32>
    %336 = arith.addf %335, %33 : vector<8x128xf32>
    %337 = math.tanh %336 : vector<8x128xf32>
    %cst_198 = arith.constant 5.000000e-01 : f32
    %338 = vector.broadcast %cst_198 : f32 to vector<8x128xf32>
    %339 = arith.mulf %338, %337 : vector<8x128xf32>
    %cst_199 = arith.constant 5.000000e-01 : f32
    %340 = vector.broadcast %cst_199 : f32 to vector<8x128xf32>
    %341 = arith.addf %339, %340 : vector<8x128xf32>
    %c96_i32_200 = arith.constant 96 : i32
    %342 = tpu.dynamic_rotate %341 by %c96_i32_200 dim 1 : vector<8x128xf32>, i32 -> vector<8x128xf32>
    %c64_i32_201 = arith.constant 64 : i32
    %343 = tpu.dynamic_rotate %337 by %c64_i32_201 dim 1 : vector<8x128xf32>, i32 -> vector<8x128xf32>
    %c32_i32_202 = arith.constant 32 : i32
    %344 = tpu.dynamic_rotate %341 by %c32_i32_202 dim 1 : vector<8x128xf32>, i32 -> vector<8x128xf32>
    %345 = arith.mulf %341, %343 : vector<8x128xf32>
    %cst_203 = arith.constant 0.000000e+00 : f32
    %346 = vector.broadcast %cst_203 : f32 to vector<8x128xf32>
    %347 = arith.select %2, %345, %346 : vector<8x128xi1>, vector<8x128xf32>
    %348 = arith.mulf %342, %243 : vector<8x128xf32>
    %349 = arith.addf %348, %347 : vector<8x128xf32>
    %350 = math.tanh %349 : vector<8x128xf32>
    %351 = arith.mulf %344, %350 : vector<8x128xf32>
    %352 = arith.addf %246, %351 : vector<8x128xf32>
    %c8_i32_204 = arith.constant 8 : i32
    %353 = tpu.dynamic_rotate %267 by %c8_i32_204 dim 1 : vector<8x128xf32>, i32 -> vector<8x128xf32>
    %354 = arith.addf %351, %353 : vector<8x128xf32>
    %c0_205 = arith.constant 0 : index
    %c0_206 = arith.constant 0 : index
    %c0_207 = arith.constant 0 : index
    %355 = vector.load %arg3[%c0_205, %c0_206, %c0_207] : memref<5x128x128xf32, #tpu.memory_space<vmem>>, vector<1x128x128xf32>
    %356 = vector.shape_cast %355 : vector<1x128x128xf32> to vector<128x128xf32>
    %cst_208 = arith.constant dense<0.000000e+00> : vector<8x128xf32>
    %357 = tpu.matmul %354, %356, %cst_208 {dimension_numbers = #tpu.dot_dimension_numbers<[1], [0], [0], [1], [0, 0, 1, 1], [], []>} : vector<8x128xf32>, vector<128x128xf32>, vector<8x128xf32> -> vector<8x128xf32>
    %358 = arith.addf %357, %25 : vector<8x128xf32>
    %359 = math.tanh %358 : vector<8x128xf32>
    %cst_209 = arith.constant 5.000000e-01 : f32
    %360 = vector.broadcast %cst_209 : f32 to vector<8x128xf32>
    %361 = arith.mulf %360, %359 : vector<8x128xf32>
    %cst_210 = arith.constant 5.000000e-01 : f32
    %362 = vector.broadcast %cst_210 : f32 to vector<8x128xf32>
    %363 = arith.addf %361, %362 : vector<8x128xf32>
    %c96_i32_211 = arith.constant 96 : i32
    %364 = tpu.dynamic_rotate %363 by %c96_i32_211 dim 1 : vector<8x128xf32>, i32 -> vector<8x128xf32>
    %c64_i32_212 = arith.constant 64 : i32
    %365 = tpu.dynamic_rotate %359 by %c64_i32_212 dim 1 : vector<8x128xf32>, i32 -> vector<8x128xf32>
    %c32_i32_213 = arith.constant 32 : i32
    %366 = tpu.dynamic_rotate %363 by %c32_i32_213 dim 1 : vector<8x128xf32>, i32 -> vector<8x128xf32>
    %367 = arith.mulf %363, %365 : vector<8x128xf32>
    %cst_214 = arith.constant 0.000000e+00 : f32
    %368 = vector.broadcast %cst_214 : f32 to vector<8x128xf32>
    %369 = arith.select %2, %367, %368 : vector<8x128xi1>, vector<8x128xf32>
    %370 = arith.mulf %364, %265 : vector<8x128xf32>
    %371 = arith.addf %370, %369 : vector<8x128xf32>
    %372 = math.tanh %371 : vector<8x128xf32>
    %373 = arith.mulf %366, %372 : vector<8x128xf32>
    %c8_i32_215 = arith.constant 8 : i32
    %374 = tpu.dynamic_rotate %288 by %c8_i32_215 dim 1 : vector<8x128xf32>, i32 -> vector<8x128xf32>
    %375 = arith.addf %373, %374 : vector<8x128xf32>
    %c1_216 = arith.constant 1 : index
    %c0_217 = arith.constant 0 : index
    %c0_218 = arith.constant 0 : index
    %376 = vector.load %arg3[%c1_216, %c0_217, %c0_218] : memref<5x128x128xf32, #tpu.memory_space<vmem>>, vector<1x128x128xf32>
    %377 = vector.shape_cast %376 : vector<1x128x128xf32> to vector<128x128xf32>
    %cst_219 = arith.constant dense<0.000000e+00> : vector<8x128xf32>
    %378 = tpu.matmul %375, %377, %cst_219 {dimension_numbers = #tpu.dot_dimension_numbers<[1], [0], [0], [1], [0, 0, 1, 1], [], []>} : vector<8x128xf32>, vector<128x128xf32>, vector<8x128xf32> -> vector<8x128xf32>
    %379 = arith.addf %378, %27 : vector<8x128xf32>
    %380 = math.tanh %379 : vector<8x128xf32>
    %cst_220 = arith.constant 5.000000e-01 : f32
    %381 = vector.broadcast %cst_220 : f32 to vector<8x128xf32>
    %382 = arith.mulf %381, %380 : vector<8x128xf32>
    %cst_221 = arith.constant 5.000000e-01 : f32
    %383 = vector.broadcast %cst_221 : f32 to vector<8x128xf32>
    %384 = arith.addf %382, %383 : vector<8x128xf32>
    %c96_i32_222 = arith.constant 96 : i32
    %385 = tpu.dynamic_rotate %384 by %c96_i32_222 dim 1 : vector<8x128xf32>, i32 -> vector<8x128xf32>
    %c64_i32_223 = arith.constant 64 : i32
    %386 = tpu.dynamic_rotate %380 by %c64_i32_223 dim 1 : vector<8x128xf32>, i32 -> vector<8x128xf32>
    %c32_i32_224 = arith.constant 32 : i32
    %387 = tpu.dynamic_rotate %384 by %c32_i32_224 dim 1 : vector<8x128xf32>, i32 -> vector<8x128xf32>
    %388 = arith.mulf %384, %386 : vector<8x128xf32>
    %cst_225 = arith.constant 0.000000e+00 : f32
    %389 = vector.broadcast %cst_225 : f32 to vector<8x128xf32>
    %390 = arith.select %2, %388, %389 : vector<8x128xi1>, vector<8x128xf32>
    %391 = arith.mulf %385, %286 : vector<8x128xf32>
    %392 = arith.addf %391, %390 : vector<8x128xf32>
    %393 = math.tanh %392 : vector<8x128xf32>
    %394 = arith.mulf %387, %393 : vector<8x128xf32>
    %c8_i32_226 = arith.constant 8 : i32
    %395 = tpu.dynamic_rotate %309 by %c8_i32_226 dim 1 : vector<8x128xf32>, i32 -> vector<8x128xf32>
    %396 = arith.addf %394, %395 : vector<8x128xf32>
    %c2_227 = arith.constant 2 : index
    %c0_228 = arith.constant 0 : index
    %c0_229 = arith.constant 0 : index
    %397 = vector.load %arg3[%c2_227, %c0_228, %c0_229] : memref<5x128x128xf32, #tpu.memory_space<vmem>>, vector<1x128x128xf32>
    %398 = vector.shape_cast %397 : vector<1x128x128xf32> to vector<128x128xf32>
    %cst_230 = arith.constant dense<0.000000e+00> : vector<8x128xf32>
    %399 = tpu.matmul %396, %398, %cst_230 {dimension_numbers = #tpu.dot_dimension_numbers<[1], [0], [0], [1], [0, 0, 1, 1], [], []>} : vector<8x128xf32>, vector<128x128xf32>, vector<8x128xf32> -> vector<8x128xf32>
    %400 = arith.addf %399, %29 : vector<8x128xf32>
    %401 = math.tanh %400 : vector<8x128xf32>
    %cst_231 = arith.constant 5.000000e-01 : f32
    %402 = vector.broadcast %cst_231 : f32 to vector<8x128xf32>
    %403 = arith.mulf %402, %401 : vector<8x128xf32>
    %cst_232 = arith.constant 5.000000e-01 : f32
    %404 = vector.broadcast %cst_232 : f32 to vector<8x128xf32>
    %405 = arith.addf %403, %404 : vector<8x128xf32>
    %c96_i32_233 = arith.constant 96 : i32
    %406 = tpu.dynamic_rotate %405 by %c96_i32_233 dim 1 : vector<8x128xf32>, i32 -> vector<8x128xf32>
    %c64_i32_234 = arith.constant 64 : i32
    %407 = tpu.dynamic_rotate %401 by %c64_i32_234 dim 1 : vector<8x128xf32>, i32 -> vector<8x128xf32>
    %c32_i32_235 = arith.constant 32 : i32
    %408 = tpu.dynamic_rotate %405 by %c32_i32_235 dim 1 : vector<8x128xf32>, i32 -> vector<8x128xf32>
    %409 = arith.mulf %405, %407 : vector<8x128xf32>
    %cst_236 = arith.constant 0.000000e+00 : f32
    %410 = vector.broadcast %cst_236 : f32 to vector<8x128xf32>
    %411 = arith.select %2, %409, %410 : vector<8x128xi1>, vector<8x128xf32>
    %412 = arith.mulf %406, %307 : vector<8x128xf32>
    %413 = arith.addf %412, %411 : vector<8x128xf32>
    %414 = math.tanh %413 : vector<8x128xf32>
    %415 = arith.mulf %408, %414 : vector<8x128xf32>
    %c8_i32_237 = arith.constant 8 : i32
    %416 = tpu.dynamic_rotate %330 by %c8_i32_237 dim 1 : vector<8x128xf32>, i32 -> vector<8x128xf32>
    %417 = arith.addf %415, %416 : vector<8x128xf32>
    %c3_238 = arith.constant 3 : index
    %c0_239 = arith.constant 0 : index
    %c0_240 = arith.constant 0 : index
    %418 = vector.load %arg3[%c3_238, %c0_239, %c0_240] : memref<5x128x128xf32, #tpu.memory_space<vmem>>, vector<1x128x128xf32>
    %419 = vector.shape_cast %418 : vector<1x128x128xf32> to vector<128x128xf32>
    %cst_241 = arith.constant dense<0.000000e+00> : vector<8x128xf32>
    %420 = tpu.matmul %417, %419, %cst_241 {dimension_numbers = #tpu.dot_dimension_numbers<[1], [0], [0], [1], [0, 0, 1, 1], [], []>} : vector<8x128xf32>, vector<128x128xf32>, vector<8x128xf32> -> vector<8x128xf32>
    %421 = arith.addf %420, %31 : vector<8x128xf32>
    %422 = math.tanh %421 : vector<8x128xf32>
    %cst_242 = arith.constant 5.000000e-01 : f32
    %423 = vector.broadcast %cst_242 : f32 to vector<8x128xf32>
    %424 = arith.mulf %423, %422 : vector<8x128xf32>
    %cst_243 = arith.constant 5.000000e-01 : f32
    %425 = vector.broadcast %cst_243 : f32 to vector<8x128xf32>
    %426 = arith.addf %424, %425 : vector<8x128xf32>
    %c96_i32_244 = arith.constant 96 : i32
    %427 = tpu.dynamic_rotate %426 by %c96_i32_244 dim 1 : vector<8x128xf32>, i32 -> vector<8x128xf32>
    %c64_i32_245 = arith.constant 64 : i32
    %428 = tpu.dynamic_rotate %422 by %c64_i32_245 dim 1 : vector<8x128xf32>, i32 -> vector<8x128xf32>
    %c32_i32_246 = arith.constant 32 : i32
    %429 = tpu.dynamic_rotate %426 by %c32_i32_246 dim 1 : vector<8x128xf32>, i32 -> vector<8x128xf32>
    %430 = arith.mulf %426, %428 : vector<8x128xf32>
    %cst_247 = arith.constant 0.000000e+00 : f32
    %431 = vector.broadcast %cst_247 : f32 to vector<8x128xf32>
    %432 = arith.select %2, %430, %431 : vector<8x128xi1>, vector<8x128xf32>
    %433 = arith.mulf %427, %328 : vector<8x128xf32>
    %434 = arith.addf %433, %432 : vector<8x128xf32>
    %435 = math.tanh %434 : vector<8x128xf32>
    %436 = arith.mulf %429, %435 : vector<8x128xf32>
    %c8_i32_248 = arith.constant 8 : i32
    %437 = tpu.dynamic_rotate %351 by %c8_i32_248 dim 1 : vector<8x128xf32>, i32 -> vector<8x128xf32>
    %438 = arith.addf %436, %437 : vector<8x128xf32>
    %c4_249 = arith.constant 4 : index
    %c0_250 = arith.constant 0 : index
    %c0_251 = arith.constant 0 : index
    %439 = vector.load %arg3[%c4_249, %c0_250, %c0_251] : memref<5x128x128xf32, #tpu.memory_space<vmem>>, vector<1x128x128xf32>
    %440 = vector.shape_cast %439 : vector<1x128x128xf32> to vector<128x128xf32>
    %cst_252 = arith.constant dense<0.000000e+00> : vector<8x128xf32>
    %441 = tpu.matmul %438, %440, %cst_252 {dimension_numbers = #tpu.dot_dimension_numbers<[1], [0], [0], [1], [0, 0, 1, 1], [], []>} : vector<8x128xf32>, vector<128x128xf32>, vector<8x128xf32> -> vector<8x128xf32>
    %442 = arith.addf %441, %33 : vector<8x128xf32>
    %443 = math.tanh %442 : vector<8x128xf32>
    %cst_253 = arith.constant 5.000000e-01 : f32
    %444 = vector.broadcast %cst_253 : f32 to vector<8x128xf32>
    %445 = arith.mulf %444, %443 : vector<8x128xf32>
    %cst_254 = arith.constant 5.000000e-01 : f32
    %446 = vector.broadcast %cst_254 : f32 to vector<8x128xf32>
    %447 = arith.addf %445, %446 : vector<8x128xf32>
    %c96_i32_255 = arith.constant 96 : i32
    %448 = tpu.dynamic_rotate %447 by %c96_i32_255 dim 1 : vector<8x128xf32>, i32 -> vector<8x128xf32>
    %c64_i32_256 = arith.constant 64 : i32
    %449 = tpu.dynamic_rotate %443 by %c64_i32_256 dim 1 : vector<8x128xf32>, i32 -> vector<8x128xf32>
    %c32_i32_257 = arith.constant 32 : i32
    %450 = tpu.dynamic_rotate %447 by %c32_i32_257 dim 1 : vector<8x128xf32>, i32 -> vector<8x128xf32>
    %451 = arith.mulf %447, %449 : vector<8x128xf32>
    %cst_258 = arith.constant 0.000000e+00 : f32
    %452 = vector.broadcast %cst_258 : f32 to vector<8x128xf32>
    %453 = arith.select %2, %451, %452 : vector<8x128xi1>, vector<8x128xf32>
    %454 = arith.mulf %448, %349 : vector<8x128xf32>
    %455 = arith.addf %454, %453 : vector<8x128xf32>
    %456 = math.tanh %455 : vector<8x128xf32>
    %457 = arith.mulf %450, %456 : vector<8x128xf32>
    %458 = arith.addf %352, %457 : vector<8x128xf32>
    %c8_i32_259 = arith.constant 8 : i32
    %459 = tpu.dynamic_rotate %373 by %c8_i32_259 dim 1 : vector<8x128xf32>, i32 -> vector<8x128xf32>
    %460 = arith.addf %457, %459 : vector<8x128xf32>
    %c0_260 = arith.constant 0 : index
    %c0_261 = arith.constant 0 : index
    %c0_262 = arith.constant 0 : index
    %461 = vector.load %arg3[%c0_260, %c0_261, %c0_262] : memref<5x128x128xf32, #tpu.memory_space<vmem>>, vector<1x128x128xf32>
    %462 = vector.shape_cast %461 : vector<1x128x128xf32> to vector<128x128xf32>
    %cst_263 = arith.constant dense<0.000000e+00> : vector<8x128xf32>
    %463 = tpu.matmul %460, %462, %cst_263 {dimension_numbers = #tpu.dot_dimension_numbers<[1], [0], [0], [1], [0, 0, 1, 1], [], []>} : vector<8x128xf32>, vector<128x128xf32>, vector<8x128xf32> -> vector<8x128xf32>
    %464 = arith.addf %463, %25 : vector<8x128xf32>
    %465 = math.tanh %464 : vector<8x128xf32>
    %cst_264 = arith.constant 5.000000e-01 : f32
    %466 = vector.broadcast %cst_264 : f32 to vector<8x128xf32>
    %467 = arith.mulf %466, %465 : vector<8x128xf32>
    %cst_265 = arith.constant 5.000000e-01 : f32
    %468 = vector.broadcast %cst_265 : f32 to vector<8x128xf32>
    %469 = arith.addf %467, %468 : vector<8x128xf32>
    %c96_i32_266 = arith.constant 96 : i32
    %470 = tpu.dynamic_rotate %469 by %c96_i32_266 dim 1 : vector<8x128xf32>, i32 -> vector<8x128xf32>
    %c64_i32_267 = arith.constant 64 : i32
    %471 = tpu.dynamic_rotate %465 by %c64_i32_267 dim 1 : vector<8x128xf32>, i32 -> vector<8x128xf32>
    %c32_i32_268 = arith.constant 32 : i32
    %472 = tpu.dynamic_rotate %469 by %c32_i32_268 dim 1 : vector<8x128xf32>, i32 -> vector<8x128xf32>
    %473 = arith.mulf %469, %471 : vector<8x128xf32>
    %cst_269 = arith.constant 0.000000e+00 : f32
    %474 = vector.broadcast %cst_269 : f32 to vector<8x128xf32>
    %475 = arith.select %2, %473, %474 : vector<8x128xi1>, vector<8x128xf32>
    %476 = arith.mulf %470, %371 : vector<8x128xf32>
    %477 = arith.addf %476, %475 : vector<8x128xf32>
    %478 = math.tanh %477 : vector<8x128xf32>
    %479 = arith.mulf %472, %478 : vector<8x128xf32>
    %c8_i32_270 = arith.constant 8 : i32
    %480 = tpu.dynamic_rotate %394 by %c8_i32_270 dim 1 : vector<8x128xf32>, i32 -> vector<8x128xf32>
    %481 = arith.addf %479, %480 : vector<8x128xf32>
    %c1_271 = arith.constant 1 : index
    %c0_272 = arith.constant 0 : index
    %c0_273 = arith.constant 0 : index
    %482 = vector.load %arg3[%c1_271, %c0_272, %c0_273] : memref<5x128x128xf32, #tpu.memory_space<vmem>>, vector<1x128x128xf32>
    %483 = vector.shape_cast %482 : vector<1x128x128xf32> to vector<128x128xf32>
    %cst_274 = arith.constant dense<0.000000e+00> : vector<8x128xf32>
    %484 = tpu.matmul %481, %483, %cst_274 {dimension_numbers = #tpu.dot_dimension_numbers<[1], [0], [0], [1], [0, 0, 1, 1], [], []>} : vector<8x128xf32>, vector<128x128xf32>, vector<8x128xf32> -> vector<8x128xf32>
    %485 = arith.addf %484, %27 : vector<8x128xf32>
    %486 = math.tanh %485 : vector<8x128xf32>
    %cst_275 = arith.constant 5.000000e-01 : f32
    %487 = vector.broadcast %cst_275 : f32 to vector<8x128xf32>
    %488 = arith.mulf %487, %486 : vector<8x128xf32>
    %cst_276 = arith.constant 5.000000e-01 : f32
    %489 = vector.broadcast %cst_276 : f32 to vector<8x128xf32>
    %490 = arith.addf %488, %489 : vector<8x128xf32>
    %c96_i32_277 = arith.constant 96 : i32
    %491 = tpu.dynamic_rotate %490 by %c96_i32_277 dim 1 : vector<8x128xf32>, i32 -> vector<8x128xf32>
    %c64_i32_278 = arith.constant 64 : i32
    %492 = tpu.dynamic_rotate %486 by %c64_i32_278 dim 1 : vector<8x128xf32>, i32 -> vector<8x128xf32>
    %c32_i32_279 = arith.constant 32 : i32
    %493 = tpu.dynamic_rotate %490 by %c32_i32_279 dim 1 : vector<8x128xf32>, i32 -> vector<8x128xf32>
    %494 = arith.mulf %490, %492 : vector<8x128xf32>
    %cst_280 = arith.constant 0.000000e+00 : f32
    %495 = vector.broadcast %cst_280 : f32 to vector<8x128xf32>
    %496 = arith.select %2, %494, %495 : vector<8x128xi1>, vector<8x128xf32>
    %497 = arith.mulf %491, %392 : vector<8x128xf32>
    %498 = arith.addf %497, %496 : vector<8x128xf32>
    %499 = math.tanh %498 : vector<8x128xf32>
    %500 = arith.mulf %493, %499 : vector<8x128xf32>
    %c8_i32_281 = arith.constant 8 : i32
    %501 = tpu.dynamic_rotate %415 by %c8_i32_281 dim 1 : vector<8x128xf32>, i32 -> vector<8x128xf32>
    %502 = arith.addf %500, %501 : vector<8x128xf32>
    %c2_282 = arith.constant 2 : index
    %c0_283 = arith.constant 0 : index
    %c0_284 = arith.constant 0 : index
    %503 = vector.load %arg3[%c2_282, %c0_283, %c0_284] : memref<5x128x128xf32, #tpu.memory_space<vmem>>, vector<1x128x128xf32>
    %504 = vector.shape_cast %503 : vector<1x128x128xf32> to vector<128x128xf32>
    %cst_285 = arith.constant dense<0.000000e+00> : vector<8x128xf32>
    %505 = tpu.matmul %502, %504, %cst_285 {dimension_numbers = #tpu.dot_dimension_numbers<[1], [0], [0], [1], [0, 0, 1, 1], [], []>} : vector<8x128xf32>, vector<128x128xf32>, vector<8x128xf32> -> vector<8x128xf32>
    %506 = arith.addf %505, %29 : vector<8x128xf32>
    %507 = math.tanh %506 : vector<8x128xf32>
    %cst_286 = arith.constant 5.000000e-01 : f32
    %508 = vector.broadcast %cst_286 : f32 to vector<8x128xf32>
    %509 = arith.mulf %508, %507 : vector<8x128xf32>
    %cst_287 = arith.constant 5.000000e-01 : f32
    %510 = vector.broadcast %cst_287 : f32 to vector<8x128xf32>
    %511 = arith.addf %509, %510 : vector<8x128xf32>
    %c96_i32_288 = arith.constant 96 : i32
    %512 = tpu.dynamic_rotate %511 by %c96_i32_288 dim 1 : vector<8x128xf32>, i32 -> vector<8x128xf32>
    %c64_i32_289 = arith.constant 64 : i32
    %513 = tpu.dynamic_rotate %507 by %c64_i32_289 dim 1 : vector<8x128xf32>, i32 -> vector<8x128xf32>
    %c32_i32_290 = arith.constant 32 : i32
    %514 = tpu.dynamic_rotate %511 by %c32_i32_290 dim 1 : vector<8x128xf32>, i32 -> vector<8x128xf32>
    %515 = arith.mulf %511, %513 : vector<8x128xf32>
    %cst_291 = arith.constant 0.000000e+00 : f32
    %516 = vector.broadcast %cst_291 : f32 to vector<8x128xf32>
    %517 = arith.select %2, %515, %516 : vector<8x128xi1>, vector<8x128xf32>
    %518 = arith.mulf %512, %413 : vector<8x128xf32>
    %519 = arith.addf %518, %517 : vector<8x128xf32>
    %520 = math.tanh %519 : vector<8x128xf32>
    %521 = arith.mulf %514, %520 : vector<8x128xf32>
    %c8_i32_292 = arith.constant 8 : i32
    %522 = tpu.dynamic_rotate %436 by %c8_i32_292 dim 1 : vector<8x128xf32>, i32 -> vector<8x128xf32>
    %523 = arith.addf %521, %522 : vector<8x128xf32>
    %c3_293 = arith.constant 3 : index
    %c0_294 = arith.constant 0 : index
    %c0_295 = arith.constant 0 : index
    %524 = vector.load %arg3[%c3_293, %c0_294, %c0_295] : memref<5x128x128xf32, #tpu.memory_space<vmem>>, vector<1x128x128xf32>
    %525 = vector.shape_cast %524 : vector<1x128x128xf32> to vector<128x128xf32>
    %cst_296 = arith.constant dense<0.000000e+00> : vector<8x128xf32>
    %526 = tpu.matmul %523, %525, %cst_296 {dimension_numbers = #tpu.dot_dimension_numbers<[1], [0], [0], [1], [0, 0, 1, 1], [], []>} : vector<8x128xf32>, vector<128x128xf32>, vector<8x128xf32> -> vector<8x128xf32>
    %527 = arith.addf %526, %31 : vector<8x128xf32>
    %528 = math.tanh %527 : vector<8x128xf32>
    %cst_297 = arith.constant 5.000000e-01 : f32
    %529 = vector.broadcast %cst_297 : f32 to vector<8x128xf32>
    %530 = arith.mulf %529, %528 : vector<8x128xf32>
    %cst_298 = arith.constant 5.000000e-01 : f32
    %531 = vector.broadcast %cst_298 : f32 to vector<8x128xf32>
    %532 = arith.addf %530, %531 : vector<8x128xf32>
    %c96_i32_299 = arith.constant 96 : i32
    %533 = tpu.dynamic_rotate %532 by %c96_i32_299 dim 1 : vector<8x128xf32>, i32 -> vector<8x128xf32>
    %c64_i32_300 = arith.constant 64 : i32
    %534 = tpu.dynamic_rotate %528 by %c64_i32_300 dim 1 : vector<8x128xf32>, i32 -> vector<8x128xf32>
    %c32_i32_301 = arith.constant 32 : i32
    %535 = tpu.dynamic_rotate %532 by %c32_i32_301 dim 1 : vector<8x128xf32>, i32 -> vector<8x128xf32>
    %536 = arith.mulf %532, %534 : vector<8x128xf32>
    %cst_302 = arith.constant 0.000000e+00 : f32
    %537 = vector.broadcast %cst_302 : f32 to vector<8x128xf32>
    %538 = arith.select %2, %536, %537 : vector<8x128xi1>, vector<8x128xf32>
    %539 = arith.mulf %533, %434 : vector<8x128xf32>
    %540 = arith.addf %539, %538 : vector<8x128xf32>
    %541 = math.tanh %540 : vector<8x128xf32>
    %542 = arith.mulf %535, %541 : vector<8x128xf32>
    %c8_i32_303 = arith.constant 8 : i32
    %543 = tpu.dynamic_rotate %457 by %c8_i32_303 dim 1 : vector<8x128xf32>, i32 -> vector<8x128xf32>
    %544 = arith.addf %542, %543 : vector<8x128xf32>
    %c4_304 = arith.constant 4 : index
    %c0_305 = arith.constant 0 : index
    %c0_306 = arith.constant 0 : index
    %545 = vector.load %arg3[%c4_304, %c0_305, %c0_306] : memref<5x128x128xf32, #tpu.memory_space<vmem>>, vector<1x128x128xf32>
    %546 = vector.shape_cast %545 : vector<1x128x128xf32> to vector<128x128xf32>
    %cst_307 = arith.constant dense<0.000000e+00> : vector<8x128xf32>
    %547 = tpu.matmul %544, %546, %cst_307 {dimension_numbers = #tpu.dot_dimension_numbers<[1], [0], [0], [1], [0, 0, 1, 1], [], []>} : vector<8x128xf32>, vector<128x128xf32>, vector<8x128xf32> -> vector<8x128xf32>
    %548 = arith.addf %547, %33 : vector<8x128xf32>
    %549 = math.tanh %548 : vector<8x128xf32>
    %cst_308 = arith.constant 5.000000e-01 : f32
    %550 = vector.broadcast %cst_308 : f32 to vector<8x128xf32>
    %551 = arith.mulf %550, %549 : vector<8x128xf32>
    %cst_309 = arith.constant 5.000000e-01 : f32
    %552 = vector.broadcast %cst_309 : f32 to vector<8x128xf32>
    %553 = arith.addf %551, %552 : vector<8x128xf32>
    %c96_i32_310 = arith.constant 96 : i32
    %554 = tpu.dynamic_rotate %553 by %c96_i32_310 dim 1 : vector<8x128xf32>, i32 -> vector<8x128xf32>
    %c64_i32_311 = arith.constant 64 : i32
    %555 = tpu.dynamic_rotate %549 by %c64_i32_311 dim 1 : vector<8x128xf32>, i32 -> vector<8x128xf32>
    %c32_i32_312 = arith.constant 32 : i32
    %556 = tpu.dynamic_rotate %553 by %c32_i32_312 dim 1 : vector<8x128xf32>, i32 -> vector<8x128xf32>
    %557 = arith.mulf %553, %555 : vector<8x128xf32>
    %cst_313 = arith.constant 0.000000e+00 : f32
    %558 = vector.broadcast %cst_313 : f32 to vector<8x128xf32>
    %559 = arith.select %2, %557, %558 : vector<8x128xi1>, vector<8x128xf32>
    %560 = arith.mulf %554, %455 : vector<8x128xf32>
    %561 = arith.addf %560, %559 : vector<8x128xf32>
    %562 = math.tanh %561 : vector<8x128xf32>
    %563 = arith.mulf %556, %562 : vector<8x128xf32>
    %564 = arith.addf %458, %563 : vector<8x128xf32>
    %c0_314 = arith.constant 0 : index
    %c0_315 = arith.constant 0 : index
    %565 = vector.load %arg5[%c0_314, %c0_315] : memref<128x128xf32, #tpu.memory_space<vmem>>, vector<128x128xf32>
    %566 = arith.truncf %565 : vector<128x128xf32> to vector<128x128xbf16>
    %567 = arith.extf %566 : vector<128x128xbf16> to vector<128x128xf32>
    %568 = arith.subf %565, %567 : vector<128x128xf32>
    %569 = arith.truncf %564 : vector<8x128xf32> to vector<8x128xbf16>
    %570 = arith.extf %569 : vector<8x128xbf16> to vector<8x128xf32>
    %571 = arith.subf %564, %570 : vector<8x128xf32>
    %cst_316 = arith.constant dense<0.000000e+00> : vector<8x128xf32>
    %572 = tpu.matmul %570, %567, %cst_316 {dimension_numbers = #tpu.dot_dimension_numbers<[1], [0], [0], [1], [0, 0, 1, 1], [], []>} : vector<8x128xf32>, vector<128x128xf32>, vector<8x128xf32> -> vector<8x128xf32>
    %cst_317 = arith.constant dense<0.000000e+00> : vector<8x128xf32>
    %573 = tpu.matmul %571, %567, %cst_317 {dimension_numbers = #tpu.dot_dimension_numbers<[1], [0], [0], [1], [0, 0, 1, 1], [], []>} : vector<8x128xf32>, vector<128x128xf32>, vector<8x128xf32> -> vector<8x128xf32>
    %574 = arith.addf %572, %573 : vector<8x128xf32>
    %cst_318 = arith.constant dense<0.000000e+00> : vector<8x128xf32>
    %575 = tpu.matmul %570, %568, %cst_318 {dimension_numbers = #tpu.dot_dimension_numbers<[1], [0], [0], [1], [0, 0, 1, 1], [], []>} : vector<8x128xf32>, vector<128x128xf32>, vector<8x128xf32> -> vector<8x128xf32>
    %576 = arith.addf %574, %575 : vector<8x128xf32>
    %c0_319 = arith.constant 0 : index
    %c0_320 = arith.constant 0 : index
    %577 = vector.load %arg6[%c0_319, %c0_320] : memref<8x128xf32, #tpu.memory_space<vmem>>, vector<8x128xf32>
    tpu.vector_store %arg6[%c0_319, %c0_320], %576 {strides = array<i32>} : memref<8x128xf32, #tpu.memory_space<vmem>>, vector<8x128xf32>,
    return
  }
}

</mosaic_0001>

<bundles_post_ra>
// kernel: visual_servoing_forward.1
= control target key start
LH: loop header
LB: loop body
LE: loop exit
PB: predicated region body
PF: predicated region fallthrough
CT: control target
= control target key end

     0   :  { %11 = vsyncpa [#allocation3], 0  ;;  %s1472_s24 = smov [#allocation2]   ;;  %s1473_s26 = smov 128   ;;  %s2483_s0 = inlined_call_operand.vmem [shape: f32[8,128], index: 0, kind: input, shape index: {}]   ;;  %s2484_s1 = inlined_call_operand.vmem [shape: f32[5,8,128], index: 1, kind: input, shape index: {}]   ;;  %s2485_s2 = inlined_call_operand.vmem [shape: f32[5,8,128], index: 2, kind: input, shape index: {}]   ;;  %s2486_s3 = inlined_call_operand.hbm [shape: f32[5,128,128], index: 3, kind: input, shape index: {}]   ;;  %s2487_s4 = inlined_call_operand.vmem [shape: f32[5,8,128], index: 4, kind: input, shape index: {}]   ;;  %s2488_s5 = inlined_call_operand.vmem [shape: f32[128,128], index: 5, kind: input, shape index: {}]   ;;  %s2489_s6 = inlined_call_operand.vmem [shape: f32[8,128], index: 6, kind: output, shape index: {}]  }
   0x1   :  { %s22_s23 = sshll.u32 %s2486_s3, 4  ;;  %s24_s25 = sshll.u32 %s1472_s24, 4  ;;  %s23_s23 = int_to_ptr.hbm [resolvable:$true] %s22_s23  ;;  %s25_s25 = int_to_ptr.vmem [resolvable:$true] %s24_s25 }
   0x2   :  { %s1474_s27 = smov 8  }
   0x3   :  { %30 = dma.hbm_to_vmem [thread:$0]  %s23_s23, 10240, %s25_s25, [#allocation3], %s1473_s26, %s1473_s26, %s1474_s27  }
   0x4   :  { %1470 = dma.done.wait [#allocation3], 10240  }
   0x5   :  { %1471 = vsyncadd [#allocation3], 4294957056  ;;  %v43_v0 = vld [vmem:[%s2484_s1] sm:$0xff]  ;;  %v1520_v1 = vld [vmem:[#allocation2 + $0x78] sm:$0xff]  ;;  %s1475_s10 = smov 64   ;;  %s1476_s11 = smov 96   ;;  %v39_v43 = vlaneseq }
   0x6   :  { %2535 = vst [vmem:[#allocation5_spill] sm:$0xff] %v1520_v1  ;;  %v1522_v2 = vld [vmem:[#allocation2 + $0x70] sm:$0xff]  ;;  %70 = vrot.lane.b32.xlu0 %v43_v0, %s1474_s27  ;;  %89 = vmatpush.msra.mxu0 %v1520_v1  ;;  %v1526_v3 = vld [vmem:[#allocation2 + $0x68] sm:$0xff]  ;;  %v1529_v4 = vld [vmem:[#allocation2 + $0x60] sm:$0xff]  ;;  %s1477_s12 = smov 32  }
   0x7   :  { %2536 = vst [vmem:[#allocation6_spill] sm:$0xff] %v1522_v2  ;;  %v1532_v5 = vld [vmem:[#allocation2 + $0x58] sm:$0xff]  ;;  %v1535_v6 = vld [vmem:[#allocation2 + $0x50] sm:$0xff]  ;;  %v1538_v7 = vld [vmem:[#allocation2 + $0x48] sm:$0xff]  ;;  %v1639_v44 = vand.u32 127, %v39_v43 }
   0x8   :  { %2537 = vst [vmem:[#allocation7_spill] sm:$0xff] %v1526_v3  ;;  %90 = vmatpush.msra.mxu0 %v1522_v2  ;;  %v1541_v8 = vld [vmem:[#allocation2 + $0x40] sm:$0xff]  ;;  %v1544_v9 = vld [vmem:[#allocation2 + $0x38] sm:$0xff]  ;;  %v1547_v10 = vld [vmem:[#allocation2 + $0x30] sm:$0xff] }
   0x9   :  { %2538 = vst [vmem:[#allocation8_spill] sm:$0xff] %v1529_v4  ;;  %v1550_v11 = vld [vmem:[#allocation2 + $0x28] sm:$0xff]  ;;  %v1553_v12 = vld [vmem:[#allocation2 + $0x20] sm:$0xff]  ;;  %v1556_v13 = vld [vmem:[#allocation2 + $0x18] sm:$0xff]  ;;  %vm41_vm0 = vcmp.lt.s32.totalorder %v1639_v44, 32 }
   0xa   :  { %91 = vmatpush.msra.mxu0 %v1526_v3  ;;  %2539 = vst [vmem:[#allocation9_spill] sm:$0xff] %v1532_v5  ;;  %v1559_v14 = vld [vmem:[#allocation2 + $0x10] sm:$0xff]  ;;  %v1562_v15 = vld [vmem:[#allocation2 + $0x8] sm:$0xff]  ;;  %v1566_v16 = vld [vmem:[#allocation2] sm:$0xff] }
   0xb   :  { %2540 = vst [vmem:[#allocation10_spill] sm:$0xff] %v1535_v6  ;;  %v42_v17 = vld [vmem:[%s2483_s0] sm:$0xff]  ;;  %v1243_v20 = vld [vmem:[%s2484_s1 + $0x8] sm:$0xff]  ;;  %v1575_v21 = vld [vmem:[#allocation2 + $0xf8] sm:$0xff] }
   0xc   :  { %92 = vmatpush.msra.mxu0 %v1529_v4  ;;  %2541 = vst [vmem:[#allocation11_spill] sm:$0xff] %v1538_v7  ;;  %v1577_v22 = vld [vmem:[#allocation2 + $0xf0] sm:$0xff]  ;;  %124 = vrot.lane.b32.xlu2 %v1243_v20, %s1474_s27  ;;  %v1581_v23 = vld [vmem:[#allocation2 + $0xe8] sm:$0xff]  ;;  %v1584_v24 = vld [vmem:[#allocation2 + $0xe0] sm:$0xff] }
   0xd   :  { %2542 = vst [vmem:[#allocation12_spill] sm:$0xff] %v1541_v8  ;;  %144 = vmatpush.msra.mxu1 %v1575_v21  ;;  %v1587_v25 = vld [vmem:[#allocation2 + $0xd8] sm:$0xff]  ;;  %v1593_v26 = vld [vmem:[%s2487_s4] sm:$0xff]  ;;  %v1595_v27 = vld [vmem:[#allocation2 + $0xd0] sm:$0xff] }
   0xe   :  { %93 = vmatpush.msra.mxu0 %v1532_v5  ;;  %2543 = vst [vmem:[#allocation13_spill] sm:$0xff] %v1544_v9  ;;  %v1603_v33 = vld [vmem:[#allocation2 + $0xc8] sm:$0xff]  ;;  %v1606_v34 = vld [vmem:[#allocation2 + $0xc0] sm:$0xff]  ;;  %v1609_v35 = vld [vmem:[#allocation2 + $0xb8] sm:$0xff] }
   0xf   :  { %2544 = vst [vmem:[#allocation14_spill] sm:$0xff] %v1547_v10  ;;  %145 = vmatpush.msra.mxu1 %v1577_v22  ;;  %v1612_v36 = vld [vmem:[#allocation2 + $0xb0] sm:$0xff]  ;;  %v1615_v37 = vld [vmem:[#allocation2 + $0xa8] sm:$0xff]  ;;  %v1618_v38 = vld [vmem:[#allocation2 + $0xa0] sm:$0xff] }
  0x10   :  { %94 = vmatpush.msra.mxu0 %v1535_v6  ;;  %2545 = vst [vmem:[#allocation15_spill] sm:$0xff] %v1550_v11  ;;  %v1621_v39 = vld [vmem:[#allocation2 + $0x98] sm:$0xff]  ;;  %v1624_v40 = vld [vmem:[#allocation2 + $0x90] sm:$0xff]  ;;  %v1627_v41 = vld [vmem:[#allocation2 + $0x88] sm:$0xff] }
  0x11   :  { %2546 = vst [vmem:[#allocation16_spill] sm:$0xff] %v1553_v12  ;;  %146 = vmatpush.msra.mxu1 %v1581_v23  ;;  %v1630_v42 = vld [vmem:[#allocation2 + $0x80] sm:$0xff]  ;;  %v1666_v57 = vld [vmem:[%s2487_s4 + $0x8] sm:$0xff]  ;;  %v1244_v63 = vld [vmem:[%s2484_s1 + $0x10] sm:$0xff] }
  0x12   :  { %95 = vmatpush.msra.mxu0 %v1538_v7  ;;  %2547 = vst [vmem:[#allocation17_spill] sm:$0xff] %v1556_v13  ;;  %v52_v47 = vld [vmem:[%s2485_s2] sm:$0xff]  ;;  %v1676_v0 = vld [vmem:[#allocation2 + $0x178] sm:$0xff]  ;;  %v1706_v43 = vld [vmem:[#allocation2 + $0x128] sm:$0xff] }
  0x13   :  { %2548 = vst [vmem:[#allocation18_spill] sm:$0xff] %v1559_v14  ;;  %147 = vmatpush.msra.mxu1 %v1584_v24  ;;  %199 = vmatpush.msra.mxu2 %v1676_v0  ;;  %v1687_v20 = vld [vmem:[#allocation2 + $0x158] sm:$0xff] }
  0x14   :  { %96 = vmatpush.msra.mxu0 %v1541_v8  ;;  %2549 = vst [vmem:[#allocation19_spill] sm:$0xff] %v1562_v15 }
  0x15   :  { %2550 = vst [vmem:[#allocation20_spill] sm:$0xff] %v1566_v16  ;;  %148 = vmatpush.msra.mxu1 %v1587_v25 }
  0x16   :  { %97 = vmatpush.msra.mxu0 %v1544_v9  ;;  %2551 = vst [vmem:[#allocation21_spill] sm:$0xff] %v1575_v21 }
  0x17   :  { %2552 = vst [vmem:[#allocation22_spill] sm:$0xff] %v1577_v22  ;;  %149 = vmatpush.msra.mxu1 %v1595_v27 }
  0x18   :  { %98 = vmatpush.msra.mxu0 %v1547_v10  ;;  %2553 = vst [vmem:[#allocation23_spill] sm:$0xff] %v1581_v23 }
  0x19   :  { %2554 = vst [vmem:[#allocation24_spill] sm:$0xff] %v1584_v24  ;;  %150 = vmatpush.msra.mxu1 %v1603_v33 }
  0x1a   :  { %99 = vmatpush.msra.mxu0 %v1550_v11  ;;  %2555 = vst [vmem:[#allocation25_spill] sm:$0xff] %v1587_v25 }
  0x1b   :  { %2556 = vst [vmem:[#allocation26_spill] sm:$0xff] %v1595_v27  ;;  %151 = vmatpush.msra.mxu1 %v1606_v34 }
  0x1c   :  { %100 = vmatpush.msra.mxu0 %v1553_v12  ;;  %2557 = vst [vmem:[#allocation27_spill] sm:$0xff] %v1603_v33 }
  0x1d   :  { %2558 = vst [vmem:[#allocation28_spill] sm:$0xff] %v1606_v34  ;;  %152 = vmatpush.msra.mxu1 %v1609_v35 }
  0x1e   :  { %101 = vmatpush.msra.mxu0 %v1556_v13  ;;  %2559 = vst [vmem:[#allocation29_spill] sm:$0xff] %v1609_v35 }
  0x1f   :  { %2560 = vst [vmem:[#allocation30_spill] sm:$0xff] %v1612_v36  ;;  %153 = vmatpush.msra.mxu1 %v1612_v36 }
  0x20   :  { %102 = vmatpush.msra.mxu0 %v1559_v14  ;;  %2561 = vst [vmem:[#allocation31_spill] sm:$0xff] %v1615_v37 }
  0x21   :  { %154 = vmatpush.msra.mxu1 %v1615_v37  ;;  %2562 = vst [vmem:[#allocation32_spill] sm:$0xff] %v1618_v38 }
  0x22   :  { %103 = vmatpush.msra.mxu0 %v1562_v15  ;;  %2563 = vst [vmem:[#allocation33_spill] sm:$0xff] %v1621_v39 }
  0x23   :  { %155 = vmatpush.msra.mxu1 %v1618_v38  ;;  %2564 = vst [vmem:[#allocation34_spill] sm:$0xff] %v1624_v40 }
  0x24   :  { %104 = vmatpush.msra.mxu0 %v1566_v16  ;;  %2565 = vst [vmem:[#allocation35_spill] sm:$0xff] %v1627_v41 }
  0x25   :  { %156 = vmatpush.msra.mxu1 %v1621_v39  ;;  %2566 = vst [vmem:[#allocation36_spill] sm:$0xff] %v1630_v42 }
  0x27   :  { %157 = vmatpush.msra.mxu1 %v1624_v40 }
  0x29   :  { %158 = vmatpush.msra.mxu1 %v1627_v41 }
  0x2b   :  { %159 = vmatpush.msra.mxu1 %v1630_v42 }
  0x2d   :  { %348 = vmatpush.msrb.mxu1 %v1520_v1 }
  0x2f   :  { %349 = vmatpush.msrb.mxu1 %v1522_v2 }
  0x31   :  { %350 = vmatpush.msrb.mxu1 %v1526_v3 }
  0x33   :  { %351 = vmatpush.msrb.mxu1 %v1529_v4 }
  0x35   :  { %352 = vmatpush.msrb.mxu1 %v1532_v5 }
  0x37   :  { %353 = vmatpush.msrb.mxu1 %v1535_v6 }
  0x39   :  { %354 = vmatpush.msrb.mxu1 %v1538_v7 }
  0x3b   :  { %355 = vmatpush.msrb.mxu1 %v1541_v8 }
  0x3d   :  { %356 = vmatpush.msrb.mxu1 %v1544_v9 }
  0x3f   :  { %357 = vmatpush.msrb.mxu1 %v1547_v10 }
  0x41   :  { %358 = vmatpush.msrb.mxu1 %v1550_v11 }
  0x43   :  { %359 = vmatpush.msrb.mxu1 %v1553_v12 }
  0x45   :  { %360 = vmatpush.msrb.mxu1 %v1556_v13 }
  0x47   :  { %361 = vmatpush.msrb.mxu1 %v1559_v14 }
  0x49   :  { %362 = vmatpush.msrb.mxu1 %v1562_v15 }
  0x4b   :  { %363 = vmatpush.msrb.mxu1 %v1566_v16 }
  0x66   :  { %v125_v54 = vpop.permute.xlu2 %124 }
  0x78   :  { %v71_v18 = vpop.permute.xlu0 %70 }
  0x79   :  { %v72_v19 = vadd.f32 %v71_v18, %v42_v17  ;;  %v1678_v17 = vld [vmem:[#allocation2 + $0x170] sm:$0xff]  ;;  %v1681_v18 = vld [vmem:[#allocation2 + $0x168] sm:$0xff] }
  0x7a   :  { %200 = vmatpush.msra.mxu2 %v1678_v17 }
  0x7b   :  { %105 = vmatmul.f32.vlgmr.msra.gmra.mxu0 %v72_v19  ;;  %v1684_v19 = vld [vmem:[#allocation2 + $0x160] sm:$0xff] }
  0x7c   :  { %201 = vmatpush.msra.mxu2 %v1681_v18 }
  0x7e   :  { %202 = vmatpush.msra.mxu2 %v1684_v19 }
  0x80   :  { %203 = vmatpush.msra.mxu2 %v1687_v20 }
  0xf8   :  { %v106_v28 = vpop.f32.mrf.mxu0 }
  0xf9   :  { %v107_v29 = vadd.f32 %v106_v28, %v1593_v26  ;;  %v1690_v28 = vld [vmem:[#allocation2 + $0x150] sm:$0xff] }
  0xfa   :  { %204 = vmatpush.msra.mxu2 %v1690_v28 }
  0xfb   :  { %1261 = vtanh.f32 %v107_v29  ;;  %v1693_v29 = vld [vmem:[#allocation2 + $0x148] sm:$0xff] }
  0xfc   :  { %205 = vmatpush.msra.mxu2 %v1693_v29 }
 0x101   :  { %v1262_v30 = vpop.eup %1261 }
 0x102   :  { %114 = vrot.lane.b32.xlu0 %v1262_v30, %s1475_s10  ;;  %v110_v31 = vmul.f32 0.5, %v1262_v30  ;;  %v1696_v30 = vld [vmem:[#allocation2 + $0x140] sm:$0xff] }
 0x103   :  { %206 = vmatpush.msra.mxu2 %v1696_v30 }
 0x104   :  { %v111_v32 = vadd.f32 0.5, %v110_v31  ;;  %v1700_v31 = vld [vmem:[#allocation2 + $0x138] sm:$0xff] }
 0x105   :  { %207 = vmatpush.msra.mxu2 %v1700_v31 }
 0x106   :  { %112 = vrot.lane.b32.xlu1 %v111_v32, %s1476_s11 }
 0x10e   :  { %116 = vrot.lane.b32.xlu1 %v111_v32, %s1477_s12 }
 0x174   :  { %v115_v45 = vpop.permute.xlu0 %114 }
 0x175   :  { %v118_v46 = vmul.f32 %v115_v45, %v111_v32  ;;  %v1703_v32 = vld [vmem:[#allocation2 + $0x130] sm:$0xff]  ;;  %v1709_v45 = vld [vmem:[#allocation2 + $0x120] sm:$0xff] }
 0x176   :  { %208 = vmatpush.msra.mxu2 %v1703_v32  ;;  %2567 = vst [vmem:[#allocation37_spill] sm:$0xff] %v1709_v45 }
 0x177   :  { %v119_v50 = vsel %vm41_vm0, %v118_v46, 0.0  ;;  %v1711_v46 = vld [vmem:[#allocation2 + $0x118] sm:$0xff] }
 0x178   :  { %v113_v48 = vpop.permute.xlu1 %112  ;;  %209 = vmatpush.msra.mxu2 %v1706_v43  ;;  %2568 = vst [vmem:[#allocation38_spill] sm:$0xff] %v1711_v46 }
 0x179   :  { %v120_v49 = vmul.f32 %v113_v48, %v52_v47  ;;  %v1714_v47 = vld [vmem:[#allocation2 + $0x110] sm:$0xff]  ;;  %v1717_v48 = vld [vmem:[#allocation2 + $0x108] sm:$0xff] }
 0x17a   :  { %210 = vmatpush.msra.mxu2 %v1709_v45  ;;  %2569 = vst [vmem:[#allocation39_spill] sm:$0xff] %v1714_v47 }
 0x17b   :  { %v1651_v51 = vadd.f32 %v120_v49, %v119_v50  ;;  %2570 = vst [vmem:[#allocation40_spill] sm:$0xff] %v1717_v48  ;;  %v1721_v49 = vld [vmem:[#allocation2 + $0x100] sm:$0xff] }
 0x17c   :  { %211 = vmatpush.msra.mxu2 %v1711_v46  ;;  %2571 = vst [vmem:[#allocation41_spill] sm:$0xff] %v1721_v49 }
 0x17d   :  { %1263 = vtanh.f32 %v1651_v51 }
 0x17e   :  { %212 = vmatpush.msra.mxu2 %v1714_v47 }
 0x180   :  { %v117_v53 = vpop.permute.xlu1 %116  ;;  %213 = vmatpush.msra.mxu2 %v1717_v48 }
 0x182   :  { %214 = vmatpush.msra.mxu2 %v1721_v49 }
 0x183   :  { %v1264_v52 = vpop.eup %1263 }
 0x184   :  { %v1658_v55 = vmul.f32 %v1264_v52, %v117_v53  ;;  %386 = vmatpush.msrb.mxu2 %v1575_v21  ;;  %v1247_v53 = vld [vmem:[%s2485_s2 + $0x8] sm:$0xff] }
 0x186   :  { %v126_v56 = vadd.f32 %v125_v54, %v1658_v55  ;;  %387 = vmatpush.msrb.mxu2 %v1577_v22 }
 0x188   :  { %160 = vmatmul.f32.vlgmr.msra.gmra.mxu1 %v126_v56  ;;  %388 = vmatpush.msrb.mxu2 %v1581_v23 }
 0x18a   :  { %389 = vmatpush.msrb.mxu2 %v1584_v24 }
 0x18c   :  { %390 = vmatpush.msrb.mxu2 %v1587_v25 }
 0x18e   :  { %391 = vmatpush.msrb.mxu2 %v1595_v27 }
 0x190   :  { %392 = vmatpush.msrb.mxu2 %v1603_v33 }
 0x192   :  { %393 = vmatpush.msrb.mxu2 %v1606_v34 }
 0x194   :  { %394 = vmatpush.msrb.mxu2 %v1609_v35 }
 0x196   :  { %395 = vmatpush.msrb.mxu2 %v1612_v36 }
 0x198   :  { %396 = vmatpush.msrb.mxu2 %v1615_v37 }
 0x19a   :  { %397 = vmatpush.msrb.mxu2 %v1618_v38 }
 0x19c   :  { %398 = vmatpush.msrb.mxu2 %v1621_v39 }
 0x19e   :  { %399 = vmatpush.msrb.mxu2 %v1624_v40 }
 0x1a0   :  { %400 = vmatpush.msrb.mxu2 %v1627_v41 }
 0x1a2   :  { %401 = vmatpush.msrb.mxu2 %v1630_v42 }
 0x205   :  { %v161_v58 = vpop.f32.mrf.mxu1 }
 0x206   :  { %v162_v59 = vadd.f32 %v1666_v57, %v161_v58 }
 0x208   :  { %1265 = vtanh.f32 %v162_v59 }
 0x20e   :  { %v1266_v60 = vpop.eup %1265 }
 0x20f   :  { %169 = vrot.lane.b32.xlu2 %v1266_v60, %s1475_s10  ;;  %v165_v61 = vmul.f32 0.5, %v1266_v60 }
 0x211   :  { %v166_v62 = vadd.f32 0.5, %v165_v61 }
 0x213   :  { %171 = vrot.lane.b32.xlu1 %v166_v62, %s1477_s12  ;;  %167 = vrot.lane.b32.xlu0 %v166_v62, %s1476_s11 }
 0x217   :  { %179 = vrot.lane.b32.xlu2 %v1244_v63, %s1474_s27 }
 0x269   :  { %v170_v50 = vpop.permute.xlu2 %169 }
 0x26a   :  { %v173_v52 = vmul.f32 %v170_v50, %v166_v62 }
 0x26c   :  { %v174_v58 = vsel %vm41_vm0, %v173_v52, 0.0  ;;  %v1770_v52 = vld [vmem:[%s2487_s4 + $0x10] sm:$0xff] }
 0x26d   :  { %2572 = vst [vmem:[#allocation42_spill] sm:$0xff] %v1770_v52 }
 0x271   :  { %v180_v62 = vpop.permute.xlu2 %179 }
 0x285   :  { %v168_v54 = vpop.permute.xlu0 %167  ;;  %v172_v61 = vpop.permute.xlu1 %171 }
 0x286   :  { %v175_v56 = vmul.f32 %v1247_v53, %v168_v54 }
 0x288   :  { %v1739_v59 = vadd.f32 %v175_v56, %v174_v58 }
 0x28a   :  { %1267 = vtanh.f32 %v1739_v59 }
 0x290   :  { %v1268_v60 = vpop.eup %1267 }
 0x291   :  { %v1746_v63 = vmul.f32 %v1268_v60, %v172_v61  ;;  %v1245_v61 = vld [vmem:[%s2484_s1 + $0x18] sm:$0xff] }
 0x293   :  { %v181_v50 = vadd.f32 %v180_v62, %v1746_v63  ;;  %v1780_v62 = vld [vmem:[#allocation2 + $0x1f8] sm:$0xff] }
 0x294   :  { %254 = vmatpush.msra.mxu3 %v1780_v62 }
 0x295   :  { %215 = vmatmul.f32.vlgmr.msra.gmra.mxu2 %v181_v50  ;;  %v1782_v50 = vld [vmem:[#allocation2 + $0x1f0] sm:$0xff] }
 0x296   :  { %539 = vmatpush.msra.mxu2 %v1520_v1  ;;  %255 = vmatpush.msra.mxu3 %v1782_v50 }
 0x298   :  { %540 = vmatpush.msra.mxu2 %v1522_v2 }
 0x29a   :  { %541 = vmatpush.msra.mxu2 %v1526_v3 }
 0x29c   :  { %542 = vmatpush.msra.mxu2 %v1529_v4 }
 0x29e   :  { %543 = vmatpush.msra.mxu2 %v1532_v5 }
 0x2a0   :  { %544 = vmatpush.msra.mxu2 %v1535_v6  ;;  %v1248_v6 = vld [vmem:[%s2485_s2 + $0x10] sm:$0xff] }
 0x2a2   :  { %545 = vmatpush.msra.mxu2 %v1538_v7 }
 0x2a4   :  { %546 = vmatpush.msra.mxu2 %v1541_v8 }
 0x2a6   :  { %547 = vmatpush.msra.mxu2 %v1544_v9  ;;  %v1825_v9 = vld [vmem:[#allocation2 + $0x180] sm:$0xff] }
 0x2a7   :  { %2573 = vst [vmem:[#allocation43_spill] sm:$0xff] %v1825_v9 }
 0x2a8   :  { %548 = vmatpush.msra.mxu2 %v1547_v10  ;;  %v1821_v10 = vld [vmem:[#allocation2 + $0x188] sm:$0xff] }
 0x2aa   :  { %549 = vmatpush.msra.mxu2 %v1550_v11  ;;  %v1818_v11 = vld [vmem:[#allocation2 + $0x190] sm:$0xff] }
 0x2ac   :  { %550 = vmatpush.msra.mxu2 %v1553_v12  ;;  %v1815_v12 = vld [vmem:[#allocation2 + $0x198] sm:$0xff] }
 0x2ae   :  { %551 = vmatpush.msra.mxu2 %v1556_v13  ;;  %v1813_v13 = vld [vmem:[#allocation2 + $0x1a0] sm:$0xff] }
 0x2b0   :  { %552 = vmatpush.msra.mxu2 %v1559_v14  ;;  %v1810_v14 = vld [vmem:[#allocation2 + $0x1a8] sm:$0xff] }
 0x2b2   :  { %553 = vmatpush.msra.mxu2 %v1562_v15  ;;  %v1807_v15 = vld [vmem:[#allocation2 + $0x1b0] sm:$0xff] }
 0x2b4   :  { %554 = vmatpush.msra.mxu2 %v1566_v16  ;;  %v1804_v16 = vld [vmem:[#allocation2 + $0x1b8] sm:$0xff] }
 0x318   :  { %v216_v53 = vpop.f32.mrf.mxu2 }
 0x319   :  { %v217_v54 = vadd.f32 %v1770_v52, %v216_v53  ;;  %v1785_v53 = vld [vmem:[#allocation2 + $0x1e8] sm:$0xff]  ;;  %v1801_v52 = vld [vmem:[#allocation2 + $0x1c0] sm:$0xff] }
 0x31a   :  { %256 = vmatpush.msra.mxu3 %v1785_v53 }
 0x31b   :  { %1269 = vtanh.f32 %v217_v54  ;;  %v1788_v54 = vld [vmem:[#allocation2 + $0x1e0] sm:$0xff] }
 0x31c   :  { %257 = vmatpush.msra.mxu3 %v1788_v54 }
 0x321   :  { %v1270_v56 = vpop.eup %1269 }
 0x322   :  { %224 = vrot.lane.b32.xlu0 %v1270_v56, %s1475_s10  ;;  %v220_v58 = vmul.f32 0.5, %v1270_v56  ;;  %v1791_v56 = vld [vmem:[#allocation2 + $0x1d8] sm:$0xff] }
 0x323   :  { %258 = vmatpush.msra.mxu3 %v1791_v56 }
 0x324   :  { %v221_v60 = vadd.f32 0.5, %v220_v58  ;;  %v1794_v58 = vld [vmem:[#allocation2 + $0x1d0] sm:$0xff] }
 0x325   :  { %259 = vmatpush.msra.mxu3 %v1794_v58 }
 0x326   :  { %226 = vrot.lane.b32.xlu2 %v221_v60, %s1477_s12  ;;  %222 = vrot.lane.b32.xlu1 %v221_v60, %s1476_s11 }
 0x32a   :  { %234 = vrot.lane.b32.xlu0 %v1245_v61, %s1474_s27  ;;  %v1798_v61 = vld [vmem:[#allocation2 + $0x1c8] sm:$0xff] }
 0x32b   :  { %260 = vmatpush.msra.mxu3 %v1798_v61 }
 0x32d   :  { %261 = vmatpush.msra.mxu3 %v1801_v52 }
 0x32f   :  { %262 = vmatpush.msra.mxu3 %v1804_v16 }
 0x331   :  { %263 = vmatpush.msra.mxu3 %v1807_v15 }
 0x333   :  { %264 = vmatpush.msra.mxu3 %v1810_v14 }
 0x335   :  { %265 = vmatpush.msra.mxu3 %v1813_v13 }
 0x337   :  { %266 = vmatpush.msra.mxu3 %v1815_v12 }
 0x339   :  { %267 = vmatpush.msra.mxu3 %v1818_v11 }
 0x33b   :  { %268 = vmatpush.msra.mxu3 %v1821_v10 }
 0x33d   :  { %269 = vmatpush.msra.mxu3 %v1825_v9 }
 0x33f   :  { %424 = vmatpush.msrb.mxu3 %v1676_v0 }
 0x341   :  { %425 = vmatpush.msrb.mxu3 %v1678_v17 }
 0x343   :  { %426 = vmatpush.msrb.mxu3 %v1681_v18 }
 0x345   :  { %427 = vmatpush.msrb.mxu3 %v1684_v19 }
 0x347   :  { %428 = vmatpush.msrb.mxu3 %v1687_v20 }
 0x349   :  { %429 = vmatpush.msrb.mxu3 %v1690_v28 }
 0x34b   :  { %430 = vmatpush.msrb.mxu3 %v1693_v29 }
 0x34d   :  { %431 = vmatpush.msrb.mxu3 %v1696_v30 }
 0x34f   :  { %432 = vmatpush.msrb.mxu3 %v1700_v31 }
 0x351   :  { %433 = vmatpush.msrb.mxu3 %v1703_v32 }
 0x353   :  { %434 = vmatpush.msrb.mxu3 %v1706_v43 }
 0x355   :  { %435 = vmatpush.msrb.mxu3 %v1709_v45 }
 0x357   :  { %436 = vmatpush.msrb.mxu3 %v1711_v46 }
 0x359   :  { %437 = vmatpush.msrb.mxu3 %v1714_v47 }
 0x35b   :  { %438 = vmatpush.msrb.mxu3 %v1717_v48 }
 0x35d   :  { %439 = vmatpush.msrb.mxu3 %v1721_v49 }
 0x394   :  { %v225_v8 = vpop.permute.xlu0 %224 }
 0x395   :  { %v228_v7 = vmul.f32 %v225_v8, %v221_v60  ;;  %v227_v60 = vpop.permute.xlu2 %226 }
 0x397   :  { %v229_v3 = vsel %vm41_vm0, %v228_v7, 0.0 }
 0x398   :  { %v223_v5 = vpop.permute.xlu1 %222 }
 0x399   :  { %v230_v4 = vmul.f32 %v1248_v6, %v223_v5 }
 0x39b   :  { %v1843_v2 = vadd.f32 %v230_v4, %v229_v3  ;;  %v1874_v4 = vld [vmem:[%s2487_s4 + $0x18] sm:$0xff] }
 0x39c   :  { %v235_v5 = vpop.permute.xlu0 %234  ;;  %2575 = vst [vmem:[#allocation45_spill] sm:$0xff] %v1874_v4 }
 0x39d   :  { %2574 = vst [vmem:[#allocation44_spill] sm:$0xff] %v1843_v2  ;;  %1271 = vtanh.f32 %v1843_v2 }
 0x3a3   :  { %v1272_v8 = vpop.eup %1271 }
 0x3a4   :  { %v1850_v6 = vmul.f32 %v1272_v8, %v227_v60 }
 0x3a6   :  { %v236_v3 = vadd.f32 %v235_v5, %v1850_v6 }
 0x3a8   :  { %270 = vmatmul.f32.vlgmr.msra.gmra.mxu3 %v236_v3 }
 0x3a9   :  { %577 = vmatpush.msra.mxu3 %v1575_v21 }
 0x3ab   :  { %578 = vmatpush.msra.mxu3 %v1577_v22 }
 0x3ad   :  { %579 = vmatpush.msra.mxu3 %v1581_v23 }
 0x3af   :  { %580 = vmatpush.msra.mxu3 %v1584_v24 }
 0x3b1   :  { %581 = vmatpush.msra.mxu3 %v1587_v25  ;;  %v1249_v25 = vld [vmem:[%s2485_s2 + $0x18] sm:$0xff] }
 0x3b3   :  { %582 = vmatpush.msra.mxu3 %v1595_v27  ;;  %v1948_v27 = vld [vmem:[#allocation2 + $0x200] sm:$0xff] }
 0x3b5   :  { %583 = vmatpush.msra.mxu3 %v1603_v33  ;;  %v1944_v33 = vld [vmem:[#allocation2 + $0x208] sm:$0xff] }
 0x3b7   :  { %584 = vmatpush.msra.mxu3 %v1606_v34  ;;  %v1940_v34 = vld [vmem:[#allocation2 + $0x210] sm:$0xff] }
 0x3b9   :  { %585 = vmatpush.msra.mxu3 %v1609_v35  ;;  %v1936_v35 = vld [vmem:[#allocation2 + $0x218] sm:$0xff] }
 0x3bb   :  { %586 = vmatpush.msra.mxu3 %v1612_v36  ;;  %v1932_v36 = vld [vmem:[#allocation2 + $0x220] sm:$0xff] }
 0x3bd   :  { %587 = vmatpush.msra.mxu3 %v1615_v37  ;;  %v1928_v37 = vld [vmem:[#allocation2 + $0x228] sm:$0xff] }
 0x3bf   :  { %588 = vmatpush.msra.mxu3 %v1618_v38  ;;  %v1924_v38 = vld [vmem:[#allocation2 + $0x230] sm:$0xff] }
 0x3c1   :  { %589 = vmatpush.msra.mxu3 %v1621_v39  ;;  %v1920_v39 = vld [vmem:[#allocation2 + $0x238] sm:$0xff] }
 0x3c3   :  { %590 = vmatpush.msra.mxu3 %v1624_v40  ;;  %v1914_v40 = vld [vmem:[#allocation2 + $0x240] sm:$0xff] }
 0x3c5   :  { %591 = vmatpush.msra.mxu3 %v1627_v41  ;;  %v1910_v41 = vld [vmem:[#allocation2 + $0x248] sm:$0xff] }
 0x3c7   :  { %592 = vmatpush.msra.mxu3 %v1630_v42  ;;  %v1246_v42 = vld [vmem:[%s2484_s1 + $0x20] sm:$0xff] }
 0x42b   :  { %v271_v7 = vpop.f32.mrf.mxu3 }
 0x42c   :  { %v272_v8 = vadd.f32 %v1874_v4, %v271_v7  ;;  %v1888_v7 = vld [vmem:[#allocation2 + $0x278] sm:$0xff]  ;;  %v1906_v4 = vld [vmem:[#allocation2 + $0x250] sm:$0xff] }
 0x42d   :  { %309 = vmatpush.msrb.mxu0 %v1888_v7  ;;  %500 = vmatpush.msra.mxu1 %v1888_v7 }
 0x42e   :  { %1273 = vtanh.f32 %v272_v8  ;;  %v1890_v8 = vld [vmem:[#allocation2 + $0x270] sm:$0xff] }
 0x42f   :  { %310 = vmatpush.msrb.mxu0 %v1890_v8  ;;  %501 = vmatpush.msra.mxu1 %v1890_v8 }
 0x434   :  { %v1274_v60 = vpop.eup %1273 }
 0x435   :  { %279 = vrot.lane.b32.xlu1 %v1274_v60, %s1475_s10  ;;  %v275_v5 = vmul.f32 0.5, %v1274_v60  ;;  %v1894_v60 = vld [vmem:[#allocation2 + $0x268] sm:$0xff] }
 0x436   :  { %311 = vmatpush.msrb.mxu0 %v1894_v60  ;;  %502 = vmatpush.msra.mxu1 %v1894_v60 }
 0x437   :  { %v1878_v3 = vadd.f32 0.5, %v275_v5  ;;  %v1898_v5 = vld [vmem:[#allocation2 + $0x260] sm:$0xff] }
 0x438   :  { %312 = vmatpush.msrb.mxu0 %v1898_v5  ;;  %503 = vmatpush.msra.mxu1 %v1898_v5 }
 0x439   :  { %281 = vrot.lane.b32.xlu0 %v1878_v3, %s1477_s12  ;;  %277 = vrot.lane.b32.xlu2 %v1878_v3, %s1476_s11 }
 0x43d   :  { %289 = vrot.lane.b32.xlu1 %v1246_v42, %s1474_s27  ;;  %v1902_v42 = vld [vmem:[#allocation2 + $0x258] sm:$0xff] }
 0x43e   :  { %313 = vmatpush.msrb.mxu0 %v1902_v42  ;;  %504 = vmatpush.msra.mxu1 %v1902_v42 }
 0x440   :  { %314 = vmatpush.msrb.mxu0 %v1906_v4  ;;  %505 = vmatpush.msra.mxu1 %v1906_v4 }
 0x442   :  { %315 = vmatpush.msrb.mxu0 %v1910_v41  ;;  %506 = vmatpush.msra.mxu1 %v1910_v41 }
 0x444   :  { %316 = vmatpush.msrb.mxu0 %v1914_v40  ;;  %507 = vmatpush.msra.mxu1 %v1914_v40 }
 0x446   :  { %317 = vmatpush.msrb.mxu0 %v1920_v39  ;;  %508 = vmatpush.msra.mxu1 %v1920_v39 }
 0x448   :  { %318 = vmatpush.msrb.mxu0 %v1924_v38  ;;  %509 = vmatpush.msra.mxu1 %v1924_v38 }
 0x44a   :  { %319 = vmatpush.msrb.mxu0 %v1928_v37  ;;  %510 = vmatpush.msra.mxu1 %v1928_v37 }
 0x44c   :  { %320 = vmatpush.msrb.mxu0 %v1932_v36  ;;  %511 = vmatpush.msra.mxu1 %v1932_v36 }
 0x44e   :  { %321 = vmatpush.msrb.mxu0 %v1936_v35  ;;  %512 = vmatpush.msra.mxu1 %v1936_v35 }
 0x450   :  { %322 = vmatpush.msrb.mxu0 %v1940_v34  ;;  %513 = vmatpush.msra.mxu1 %v1940_v34 }
 0x452   :  { %323 = vmatpush.msrb.mxu0 %v1944_v33  ;;  %514 = vmatpush.msra.mxu1 %v1944_v33 }
 0x454   :  { %324 = vmatpush.msrb.mxu0 %v1948_v27  ;;  %515 = vmatpush.msra.mxu1 %v1948_v27 }
 0x456   :  { %462 = vmatpush.msra.mxu0 %v1780_v62 }
 0x458   :  { %463 = vmatpush.msra.mxu0 %v1782_v50 }
 0x45a   :  { %464 = vmatpush.msra.mxu0 %v1785_v53 }
 0x45c   :  { %465 = vmatpush.msra.mxu0 %v1788_v54 }
 0x45e   :  { %466 = vmatpush.msra.mxu0 %v1791_v56 }
 0x460   :  { %467 = vmatpush.msra.mxu0 %v1794_v58 }
 0x462   :  { %468 = vmatpush.msra.mxu0 %v1798_v61 }
 0x464   :  { %469 = vmatpush.msra.mxu0 %v1801_v52 }
 0x466   :  { %470 = vmatpush.msra.mxu0 %v1804_v16 }
 0x468   :  { %471 = vmatpush.msra.mxu0 %v1807_v15 }
 0x46a   :  { %472 = vmatpush.msra.mxu0 %v1810_v14 }
 0x46c   :  { %473 = vmatpush.msra.mxu0 %v1813_v13 }
 0x46e   :  { %474 = vmatpush.msra.mxu0 %v1815_v12 }
 0x470   :  { %475 = vmatpush.msra.mxu0 %v1818_v11 }
 0x472   :  { %476 = vmatpush.msra.mxu0 %v1821_v10 }
 0x474   :  { %477 = vmatpush.msra.mxu0 %v1825_v9 }
 0x493   :  { %v278_v24 = vpop.permute.xlu2 %277 }
 0x494   :  { %v285_v21 = vmul.f32 %v1249_v25, %v278_v24 }
 0x4a7   :  { %v280_v23 = vpop.permute.xlu1 %279 }
 0x4a8   :  { %v283_v22 = vmul.f32 %v280_v23, %v1878_v3 }
 0x4aa   :  { %v284_v2 = vsel %vm41_vm0, %v283_v22, 0.0 }
 0x4ab   :  { %v1968_v1 = vadd.f32 %v285_v21, %v284_v2  ;;  %v282_v3 = vpop.permute.xlu0 %281  ;;  %v1999_v21 = vld [vmem:[%s2487_s4 + $0x20] sm:$0xff] }
 0x4ac   :  { %2576 = vst [vmem:[#allocation46_spill] sm:$0xff] %v1999_v21 }
 0x4ad   :  { %1275 = vtanh.f32 %v1968_v1 }
 0x4af   :  { %v290_v24 = vpop.permute.xlu1 %289 }
 0x4b3   :  { %v1276_v23 = vpop.eup %1275 }
 0x4b4   :  { %v1975_v25 = vmul.f32 %v1276_v23, %v282_v3 }
 0x4b6   :  { %v291_v2 = vadd.f32 %v290_v24, %v1975_v25 }
 0x4b8   :  { %325 = vmatmul.f32.vlgmr.msrb.gmra.mxu0 %v291_v2 }
 0x4b9   :  { %615 = vmatpush.msrb.mxu0 %v1676_v0 }
 0x4bb   :  { %616 = vmatpush.msrb.mxu0 %v1678_v17 }
 0x4bd   :  { %617 = vmatpush.msrb.mxu0 %v1681_v18 }
 0x4bf   :  { %618 = vmatpush.msrb.mxu0 %v1684_v19 }
 0x4c1   :  { %619 = vmatpush.msrb.mxu0 %v1687_v20 }
 0x4c3   :  { %620 = vmatpush.msrb.mxu0 %v1690_v28 }
 0x4c5   :  { %621 = vmatpush.msrb.mxu0 %v1693_v29 }
 0x4c7   :  { %622 = vmatpush.msrb.mxu0 %v1696_v30 }
 0x4c9   :  { %623 = vmatpush.msrb.mxu0 %v1700_v31 }
 0x4cb   :  { %624 = vmatpush.msrb.mxu0 %v1703_v32 }
 0x4cd   :  { %625 = vmatpush.msrb.mxu0 %v1706_v43 }
 0x4cf   :  { %626 = vmatpush.msrb.mxu0 %v1709_v45 }
 0x4d1   :  { %627 = vmatpush.msrb.mxu0 %v1711_v46 }
 0x4d3   :  { %628 = vmatpush.msrb.mxu0 %v1714_v47  ;;  %v1250_v47 = vld [vmem:[%s2485_s2 + $0x20] sm:$0xff] }
 0x4d5   :  { %629 = vmatpush.msrb.mxu0 %v1717_v48 }
 0x4d7   :  { %630 = vmatpush.msrb.mxu0 %v1721_v49 }
 0x535   :  { %v326_v22 = vpop.f32.mrf.mxu0 }
 0x536   :  { %v327_v23 = vadd.f32 %v1999_v21, %v326_v22 }
 0x538   :  { %1277 = vtanh.f32 %v327_v23 }
 0x53e   :  { %v1278_v3 = vpop.eup %1277 }
 0x53f   :  { %334 = vrot.lane.b32.xlu2 %v1278_v3, %s1475_s10  ;;  %v330_v24 = vmul.f32 0.5, %v1278_v3 }
 0x541   :  { %v331_v2 = vadd.f32 0.5, %v330_v24 }
 0x543   :  { %336 = vrot.lane.b32.xlu1 %v331_v2, %s1477_s12  ;;  %332 = vrot.lane.b32.xlu0 %v331_v2, %s1476_s11 }
 0x547   :  { %345 = vrot.lane.b32.xlu2 %v1658_v55, %s1474_s27 }
 0x599   :  { %v335_v49 = vpop.permute.xlu2 %334 }
 0x59a   :  { %v338_v48 = vmul.f32 %v335_v49, %v331_v2 }
 0x59c   :  { %v339_v21 = vsel %vm41_vm0, %v338_v48, 0.0 }
 0x5a1   :  { %v346_v55 = vpop.permute.xlu2 %345 }
 0x5b5   :  { %v333_v22 = vpop.permute.xlu0 %332  ;;  %v337_v46 = vpop.permute.xlu1 %336 }
 0x5b6   :  { %v340_v23 = vmul.f32 %v1250_v47, %v333_v22 }
 0x5b8   :  { %v2012_v3 = vadd.f32 %v340_v23, %v339_v21 }
 0x5ba   :  { %1279 = vtanh.f32 %v2012_v3 }
 0x5c0   :  { %v1280_v24 = vpop.eup %1279 }
 0x5c1   :  { %v2015_v45 = vmul.f32 %v1280_v24, %v337_v46 }
 0x5c3   :  { %v347_v49 = vadd.f32 %v346_v55, %v2015_v45 }
 0x5c5   :  { %364 = vmatmul.f32.vlgmr.msrb.gmra.mxu1 %v347_v49 }
 0x5c6   :  { %653 = vmatpush.msrb.mxu1 %v1780_v62 }
 0x5c8   :  { %654 = vmatpush.msrb.mxu1 %v1782_v50 }
 0x5ca   :  { %655 = vmatpush.msrb.mxu1 %v1785_v53 }
 0x5cc   :  { %656 = vmatpush.msrb.mxu1 %v1788_v54 }
 0x5ce   :  { %657 = vmatpush.msrb.mxu1 %v1791_v56 }
 0x5d0   :  { %658 = vmatpush.msrb.mxu1 %v1794_v58 }
 0x5d2   :  { %659 = vmatpush.msrb.mxu1 %v1798_v61 }
 0x5d4   :  { %660 = vmatpush.msrb.mxu1 %v1801_v52 }
 0x5d6   :  { %661 = vmatpush.msrb.mxu1 %v1804_v16 }
 0x5d8   :  { %662 = vmatpush.msrb.mxu1 %v1807_v15 }
 0x5da   :  { %663 = vmatpush.msrb.mxu1 %v1810_v14 }
 0x5dc   :  { %664 = vmatpush.msrb.mxu1 %v1813_v13 }
 0x5de   :  { %665 = vmatpush.msrb.mxu1 %v1815_v12 }
 0x5e0   :  { %666 = vmatpush.msrb.mxu1 %v1818_v11 }
 0x5e2   :  { %667 = vmatpush.msrb.mxu1 %v1821_v10 }
 0x5e4   :  { %668 = vmatpush.msrb.mxu1 %v1825_v9 }
 0x642   :  { %v365_v46 = vpop.f32.mrf.mxu1 }
 0x643   :  { %v366_v47 = vadd.f32 %v365_v46, %v1593_v26 }
 0x645   :  { %1281 = vtanh.f32 %v366_v47 }
 0x64b   :  { %v1282_v48 = vpop.eup %1281 }
 0x64c   :  { %373 = vrot.lane.b32.xlu0 %v1282_v48, %s1475_s10  ;;  %v369_v21 = vmul.f32 0.5, %v1282_v48 }
 0x64e   :  { %v370_v2 = vadd.f32 0.5, %v369_v21 }
 0x650   :  { %375 = vrot.lane.b32.xlu2 %v370_v2, %s1477_s12  ;;  %371 = vrot.lane.b32.xlu1 %v370_v2, %s1476_s11 }
 0x654   :  { %383 = vrot.lane.b32.xlu0 %v1746_v63, %s1474_s27 }
 0x6aa   :  { %v376_v47 = vpop.permute.xlu2 %375 }
 0x6be   :  { %v374_v22 = vpop.permute.xlu0 %373 }
 0x6bf   :  { %v377_v23 = vmul.f32 %v374_v22, %v370_v2 }
 0x6c1   :  { %v378_v26 = vsel %vm41_vm0, %v377_v23, 0.0 }
 0x6c2   :  { %v372_v24 = vpop.permute.xlu1 %371 }
 0x6c3   :  { %v379_v55 = vmul.f32 %v372_v24, %v1651_v51 }
 0x6c5   :  { %v2043_v49 = vadd.f32 %v379_v55, %v378_v26 }
 0x6c6   :  { %v384_v21 = vpop.permute.xlu0 %383 }
 0x6c7   :  { %1283 = vtanh.f32 %v2043_v49 }
 0x6cd   :  { %v1284_v46 = vpop.eup %1283 }
 0x6ce   :  { %v2046_v48 = vmul.f32 %v1284_v46, %v376_v47 }
 0x6d0   :  { %v385_v9 = vadd.f32 %v384_v21, %v2046_v48 }
 0x6d2   :  { %402 = vmatmul.f32.vlgmr.msrb.gmra.mxu2 %v385_v9 }
 0x6d3   :  { %691 = vmatpush.msrb.mxu2 %v1888_v7 }
 0x6d5   :  { %692 = vmatpush.msrb.mxu2 %v1890_v8 }
 0x6d7   :  { %693 = vmatpush.msrb.mxu2 %v1894_v60 }
 0x6d9   :  { %694 = vmatpush.msrb.mxu2 %v1898_v5 }
 0x6db   :  { %695 = vmatpush.msrb.mxu2 %v1902_v42 }
 0x6dd   :  { %696 = vmatpush.msrb.mxu2 %v1906_v4 }
 0x6df   :  { %697 = vmatpush.msrb.mxu2 %v1910_v41 }
 0x6e1   :  { %698 = vmatpush.msrb.mxu2 %v1914_v40 }
 0x6e3   :  { %699 = vmatpush.msrb.mxu2 %v1920_v39 }
 0x6e5   :  { %700 = vmatpush.msrb.mxu2 %v1924_v38 }
 0x6e7   :  { %701 = vmatpush.msrb.mxu2 %v1928_v37 }
 0x6e9   :  { %702 = vmatpush.msrb.mxu2 %v1932_v36 }
 0x6eb   :  { %703 = vmatpush.msrb.mxu2 %v1936_v35 }
 0x6ed   :  { %704 = vmatpush.msrb.mxu2 %v1940_v34 }
 0x6ef   :  { %705 = vmatpush.msrb.mxu2 %v1944_v33 }
 0x6f1   :  { %706 = vmatpush.msrb.mxu2 %v1948_v27 }
 0x755   :  { %v403_v9 = vpop.f32.mrf.mxu2 }
 0x756   :  { %v404_v51 = vadd.f32 %v1666_v57, %v403_v9 }
 0x758   :  { %1285 = vtanh.f32 %v404_v51 }
 0x75e   :  { %v1286_v63 = vpop.eup %1285 }
 0x75f   :  { %411 = vrot.lane.b32.xlu1 %v1286_v63, %s1475_s10  ;;  %v407_v2 = vmul.f32 0.5, %v1286_v63 }
 0x761   :  { %v408_v22 = vadd.f32 0.5, %v407_v2  ;;  %v2578_v2 = vld [vmem:[#allocation6_spill] sm:$0xff] }
 0x763   :  { %413 = vrot.lane.b32.xlu0 %v408_v22, %s1477_s12  ;;  %409 = vrot.lane.b32.xlu2 %v408_v22, %s1476_s11 }
 0x767   :  { %421 = vrot.lane.b32.xlu1 %v1850_v6, %s1474_s27  ;;  %v2577_v6 = vld [vmem:[#allocation5_spill] sm:$0xff] }
 0x7bd   :  { %v410_v23 = vpop.permute.xlu2 %409 }
 0x7be   :  { %v417_v26 = vmul.f32 %v410_v23, %v1739_v59  ;;  %v2579_v59 = vld [vmem:[#allocation7_spill] sm:$0xff]  ;;  %v2581_v23 = vld [vmem:[#allocation9_spill] sm:$0xff] }
 0x7d1   :  { %v412_v24 = vpop.permute.xlu1 %411 }
 0x7d2   :  { %v415_v55 = vmul.f32 %v412_v24, %v408_v22  ;;  %v2580_v22 = vld [vmem:[#allocation8_spill] sm:$0xff]  ;;  %v2582_v24 = vld [vmem:[#allocation10_spill] sm:$0xff] }
 0x7d4   :  { %v416_v57 = vsel %vm41_vm0, %v415_v55, 0.0  ;;  %v2583_v55 = vld [vmem:[#allocation11_spill] sm:$0xff] }
 0x7d5   :  { %v2074_v46 = vadd.f32 %v417_v26, %v416_v57  ;;  %v414_v21 = vpop.permute.xlu0 %413  ;;  %v2584_v26 = vld [vmem:[#allocation12_spill] sm:$0xff]  ;;  %v2585_v57 = vld [vmem:[#allocation13_spill] sm:$0xff] }
 0x7d7   :  { %1287 = vtanh.f32 %v2074_v46 }
 0x7d9   :  { %v422_v51 = vpop.permute.xlu1 %421 }
 0x7dd   :  { %v1288_v47 = vpop.eup %1287 }
 0x7de   :  { %v2077_v9 = vmul.f32 %v1288_v47, %v414_v21  ;;  %v2586_v47 = vld [vmem:[#allocation14_spill] sm:$0xff]  ;;  %v2587_v21 = vld [vmem:[#allocation15_spill] sm:$0xff] }
 0x7e0   :  { %v423_v63 = vadd.f32 %v422_v51, %v2077_v9  ;;  %v2588_v51 = vld [vmem:[#allocation16_spill] sm:$0xff] }
 0x7e2   :  { %440 = vmatmul.f32.vlgmr.msrb.gmra.mxu3 %v423_v63  ;;  %v2589_v63 = vld [vmem:[#allocation17_spill] sm:$0xff] }
 0x7e3   :  { %730 = vmatpush.msrb.mxu3 %v2577_v6  ;;  %v2590_v6 = vld [vmem:[#allocation18_spill] sm:$0xff] }
 0x7e5   :  { %731 = vmatpush.msrb.mxu3 %v2578_v2  ;;  %v2591_v2 = vld [vmem:[#allocation19_spill] sm:$0xff] }
 0x7e7   :  { %732 = vmatpush.msrb.mxu3 %v2579_v59  ;;  %v2592_v59 = vld [vmem:[#allocation20_spill] sm:$0xff] }
 0x7e9   :  { %733 = vmatpush.msrb.mxu3 %v2580_v22 }
 0x7eb   :  { %734 = vmatpush.msrb.mxu3 %v2581_v23  ;;  %v2593_v23 = vld [vmem:[#allocation42_spill] sm:$0xff] }
 0x7ed   :  { %735 = vmatpush.msrb.mxu3 %v2582_v24 }
 0x7ef   :  { %736 = vmatpush.msrb.mxu3 %v2583_v55 }
 0x7f1   :  { %737 = vmatpush.msrb.mxu3 %v2584_v26 }
 0x7f3   :  { %738 = vmatpush.msrb.mxu3 %v2585_v57 }
 0x7f5   :  { %739 = vmatpush.msrb.mxu3 %v2586_v47 }
 0x7f7   :  { %740 = vmatpush.msrb.mxu3 %v2587_v21 }
 0x7f9   :  { %741 = vmatpush.msrb.mxu3 %v2588_v51 }
 0x7fb   :  { %742 = vmatpush.msrb.mxu3 %v2589_v63  ;;  %v2594_v63 = vld [vmem:[#allocation44_spill] sm:$0xff] }
 0x7fd   :  { %743 = vmatpush.msrb.mxu3 %v2590_v6 }
 0x7ff   :  { %744 = vmatpush.msrb.mxu3 %v2591_v2 }
 0x801   :  { %745 = vmatpush.msrb.mxu3 %v2592_v59 }
 0x865   :  { %v441_v22 = vpop.f32.mrf.mxu3 }
 0x866   :  { %v442_v24 = vadd.f32 %v2593_v23, %v441_v22 }
 0x868   :  { %1289 = vtanh.f32 %v442_v24 }
 0x86e   :  { %v1290_v55 = vpop.eup %1289 }
 0x86f   :  { %449 = vrot.lane.b32.xlu2 %v1290_v55, %s1475_s10  ;;  %v445_v26 = vmul.f32 0.5, %v1290_v55 }
 0x871   :  { %v446_v57 = vadd.f32 0.5, %v445_v26 }
 0x873   :  { %451 = vrot.lane.b32.xlu1 %v446_v57, %s1477_s12  ;;  %447 = vrot.lane.b32.xlu0 %v446_v57, %s1476_s11 }
 0x877   :  { %459 = vrot.lane.b32.xlu2 %v1975_v25, %s1474_s27  ;;  %v2595_v25 = vld [vmem:[#allocation21_spill] sm:$0xff] }
 0x8c9   :  { %v450_v47 = vpop.permute.xlu2 %449 }
 0x8ca   :  { %v453_v21 = vmul.f32 %v450_v47, %v446_v57  ;;  %v2596_v57 = vld [vmem:[#allocation22_spill] sm:$0xff]  ;;  %v2597_v47 = vld [vmem:[#allocation23_spill] sm:$0xff] }
 0x8cc   :  { %v454_v2 = vsel %vm41_vm0, %v453_v21, 0.0  ;;  %v2599_v21 = vld [vmem:[#allocation25_spill] sm:$0xff] }
 0x8d1   :  { %v460_v26 = vpop.permute.xlu2 %459 }
 0x8e5   :  { %v448_v51 = vpop.permute.xlu0 %447  ;;  %v452_v24 = vpop.permute.xlu1 %451 }
 0x8e6   :  { %v455_v6 = vmul.f32 %v448_v51, %v2594_v63  ;;  %v2598_v51 = vld [vmem:[#allocation24_spill] sm:$0xff]  ;;  %v2600_v63 = vld [vmem:[#allocation26_spill] sm:$0xff] }
 0x8e8   :  { %v2105_v59 = vadd.f32 %v455_v6, %v454_v2  ;;  %v2601_v6 = vld [vmem:[#allocation27_spill] sm:$0xff]  ;;  %v2602_v2 = vld [vmem:[#allocation28_spill] sm:$0xff] }
 0x8ea   :  { %1291 = vtanh.f32 %v2105_v59 }
 0x8f0   :  { %v1292_v22 = vpop.eup %1291 }
 0x8f1   :  { %v2108_v55 = vmul.f32 %v1292_v22, %v452_v24  ;;  %v2603_v22 = vld [vmem:[#allocation29_spill] sm:$0xff]  ;;  %v2604_v24 = vld [vmem:[#allocation30_spill] sm:$0xff] }
 0x8f3   :  { %v461_v23 = vadd.f32 %v460_v26, %v2108_v55  ;;  %v2606_v26 = vld [vmem:[#allocation32_spill] sm:$0xff] }
 0x8f5   :  { %478 = vmatmul.f32.vlgmr.msra.gmra.mxu0 %v461_v23  ;;  %v2605_v23 = vld [vmem:[#allocation31_spill] sm:$0xff] }
 0x8f6   :  { %768 = vmatpush.msra.mxu0 %v2595_v25  ;;  %v2607_v25 = vld [vmem:[#allocation33_spill] sm:$0xff] }
 0x8f8   :  { %769 = vmatpush.msra.mxu0 %v2596_v57  ;;  %v2608_v57 = vld [vmem:[#allocation34_spill] sm:$0xff] }
 0x8fa   :  { %770 = vmatpush.msra.mxu0 %v2597_v47  ;;  %v2609_v47 = vld [vmem:[#allocation35_spill] sm:$0xff] }
 0x8fc   :  { %771 = vmatpush.msra.mxu0 %v2598_v51  ;;  %v2610_v51 = vld [vmem:[#allocation36_spill] sm:$0xff] }
 0x8fe   :  { %772 = vmatpush.msra.mxu0 %v2599_v21 }
 0x900   :  { %773 = vmatpush.msra.mxu0 %v2600_v63  ;;  %v2611_v63 = vld [vmem:[#allocation45_spill] sm:$0xff] }
 0x902   :  { %774 = vmatpush.msra.mxu0 %v2601_v6 }
 0x904   :  { %775 = vmatpush.msra.mxu0 %v2602_v2 }
 0x906   :  { %776 = vmatpush.msra.mxu0 %v2603_v22 }
 0x908   :  { %777 = vmatpush.msra.mxu0 %v2604_v24 }
 0x90a   :  { %778 = vmatpush.msra.mxu0 %v2605_v23 }
 0x90c   :  { %779 = vmatpush.msra.mxu0 %v2606_v26 }
 0x90e   :  { %780 = vmatpush.msra.mxu0 %v2607_v25 }
 0x910   :  { %781 = vmatpush.msra.mxu0 %v2608_v57 }
 0x912   :  { %782 = vmatpush.msra.mxu0 %v2609_v47 }
 0x914   :  { %783 = vmatpush.msra.mxu0 %v2610_v51 }
 0x972   :  { %v479_v21 = vpop.f32.mrf.mxu0 }
 0x973   :  { %v480_v6 = vadd.f32 %v2611_v63, %v479_v21 }
 0x975   :  { %1293 = vtanh.f32 %v480_v6 }
 0x97b   :  { %v1294_v2 = vpop.eup %1293 }
 0x97c   :  { %487 = vrot.lane.b32.xlu0 %v1294_v2, %s1475_s10  ;;  %v483_v22 = vmul.f32 0.5, %v1294_v2 }
 0x97e   :  { %v484_v24 = vadd.f32 0.5, %v483_v22 }
 0x980   :  { %489 = vrot.lane.b32.xlu2 %v484_v24, %s1477_s12  ;;  %485 = vrot.lane.b32.xlu1 %v484_v24, %s1476_s11 }
 0x984   :  { %497 = vrot.lane.b32.xlu0 %v2015_v45, %s1474_s27 }
 0x9da   :  { %v490_v6 = vpop.permute.xlu2 %489 }
 0x9ee   :  { %v488_v23 = vpop.permute.xlu0 %487 }
 0x9ef   :  { %v491_v26 = vmul.f32 %v488_v23, %v484_v24 }
 0x9f1   :  { %v492_v47 = vsel %vm41_vm0, %v491_v26, 0.0 }
 0x9f2   :  { %v486_v25 = vpop.permute.xlu1 %485 }
 0x9f3   :  { %v493_v57 = vmul.f32 %v486_v25, %v1968_v1  ;;  %v2612_v1 = vld [vmem:[#allocation37_spill] sm:$0xff] }
 0x9f5   :  { %v2136_v51 = vadd.f32 %v493_v57, %v492_v47 }
 0x9f6   :  { %v498_v22 = vpop.permute.xlu0 %497 }
 0x9f7   :  { %1295 = vtanh.f32 %v2136_v51 }
 0x9fd   :  { %v1296_v21 = vpop.eup %1295 }
 0x9fe   :  { %v2139_v2 = vmul.f32 %v1296_v21, %v490_v6 }
 0xa00   :  { %v499_v63 = vadd.f32 %v498_v22, %v2139_v2 }
 0xa02   :  { %516 = vmatmul.f32.vlgmr.msra.gmra.mxu1 %v499_v63 }
 0xa03   :  { %806 = vmatpush.msra.mxu1 %v1676_v0  ;;  %v2613_v0 = vld [vmem:[#allocation38_spill] sm:$0xff] }
 0xa05   :  { %807 = vmatpush.msra.mxu1 %v1678_v17  ;;  %v2614_v17 = vld [vmem:[#allocation39_spill] sm:$0xff] }
 0xa07   :  { %808 = vmatpush.msra.mxu1 %v1681_v18  ;;  %v2615_v18 = vld [vmem:[#allocation40_spill] sm:$0xff] }
 0xa09   :  { %809 = vmatpush.msra.mxu1 %v1684_v19  ;;  %v2616_v19 = vld [vmem:[#allocation41_spill] sm:$0xff] }
 0xa0b   :  { %810 = vmatpush.msra.mxu1 %v1687_v20 }
 0xa0d   :  { %811 = vmatpush.msra.mxu1 %v1690_v28  ;;  %v2617_v28 = vld [vmem:[#allocation46_spill] sm:$0xff] }
 0xa0f   :  { %812 = vmatpush.msra.mxu1 %v1693_v29 }
 0xa11   :  { %813 = vmatpush.msra.mxu1 %v1696_v30 }
 0xa13   :  { %814 = vmatpush.msra.mxu1 %v1700_v31 }
 0xa15   :  { %815 = vmatpush.msra.mxu1 %v1703_v32 }
 0xa17   :  { %816 = vmatpush.msra.mxu1 %v1706_v43 }
 0xa19   :  { %817 = vmatpush.msra.mxu1 %v2612_v1 }
 0xa1b   :  { %818 = vmatpush.msra.mxu1 %v2613_v0  ;;  %v1366_v0 = vld [vmem:[#allocation2 + $0x60] sm:$0xff] }
 0xa1d   :  { %819 = vmatpush.msra.mxu1 %v2614_v17  ;;  %v1367_v17 = vld [vmem:[#allocation2 + $0x58] sm:$0xff] }
 0xa1f   :  { %820 = vmatpush.msra.mxu1 %v2615_v18  ;;  %v1368_v18 = vld [vmem:[#allocation2 + $0x50] sm:$0xff] }
 0xa21   :  { %821 = vmatpush.msra.mxu1 %v2616_v19  ;;  %v1369_v19 = vld [vmem:[#allocation2 + $0x48] sm:$0xff] }
 0xa7f   :  { %v517_v20 = vpop.f32.mrf.mxu1 }
 0xa80   :  { %v518_v29 = vadd.f32 %v2617_v28, %v517_v20  ;;  %v1370_v20 = vld [vmem:[#allocation2 + $0x40] sm:$0xff] }
 0xa82   :  { %1297 = vtanh.f32 %v518_v29  ;;  %v1371_v29 = vld [vmem:[#allocation2 + $0x38] sm:$0xff] }
 0xa88   :  { %v1298_v30 = vpop.eup %1297 }
 0xa89   :  { %525 = vrot.lane.b32.xlu1 %v1298_v30, %s1475_s10  ;;  %v521_v31 = vmul.f32 0.5, %v1298_v30  ;;  %v1372_v30 = vld [vmem:[#allocation2 + $0x30] sm:$0xff] }
 0xa8b   :  { %v522_v32 = vadd.f32 0.5, %v521_v31  ;;  %v1373_v31 = vld [vmem:[#allocation2 + $0x28] sm:$0xff] }
 0xa8d   :  { %527 = vrot.lane.b32.xlu0 %v522_v32, %s1477_s12  ;;  %523 = vrot.lane.b32.xlu2 %v522_v32, %s1476_s11 }
 0xa91   :  { %536 = vrot.lane.b32.xlu1 %v2046_v48, %s1474_s27 }
 0xae7   :  { %v524_v43 = vpop.permute.xlu2 %523 }
 0xae8   :  { %v531_v23 = vmul.f32 %v524_v43, %v2012_v3  ;;  %v1375_v43 = vld [vmem:[#allocation2 + $0x18] sm:$0xff] }
 0xafb   :  { %v526_v63 = vpop.permute.xlu1 %525 }
 0xafc   :  { %v529_v24 = vmul.f32 %v526_v63, %v522_v32  ;;  %v1374_v32 = vld [vmem:[#allocation2 + $0x20] sm:$0xff]  ;;  %v1376_v63 = vld [vmem:[#allocation2 + $0x10] sm:$0xff] }
 0xafe   :  { %v530_v26 = vsel %vm41_vm0, %v529_v24, 0.0  ;;  %v1377_v24 = vld [vmem:[#allocation2 + $0x8] sm:$0xff] }
 0xaff   :  { %v2167_v25 = vadd.f32 %v531_v23, %v530_v26  ;;  %v528_v47 = vpop.permute.xlu0 %527  ;;  %v1378_v23 = vld [vmem:[#allocation2] sm:$0xff] }
 0xb01   :  { %1299 = vtanh.f32 %v2167_v25 }
 0xb03   :  { %v537_v6 = vpop.permute.xlu1 %536 }
 0xb07   :  { %v1300_v57 = vpop.eup %1299 }
 0xb08   :  { %v2170_v21 = vmul.f32 %v1300_v57, %v528_v47  ;;  %v2619_v57 = vld [vmem:[#allocation42_spill] sm:$0xff] }
 0xb0a   :  { %v538_v22 = vadd.f32 %v537_v6, %v2170_v21 }
 0xb0c   :  { %555 = vmatmul.f32.vlgmr.msra.gmra.mxu2 %v538_v22 }
 0xb0d   :  { %844 = vmatpush.msra.mxu2 %v1780_v62  ;;  %v2618_v62 = vld [vmem:[#allocation43_spill] sm:$0xff] }
 0xb0f   :  { %845 = vmatpush.msra.mxu2 %v1782_v50 }
 0xb11   :  { %846 = vmatpush.msra.mxu2 %v1785_v53 }
 0xb13   :  { %847 = vmatpush.msra.mxu2 %v1788_v54 }
 0xb15   :  { %848 = vmatpush.msra.mxu2 %v1791_v56 }
 0xb17   :  { %849 = vmatpush.msra.mxu2 %v1794_v58 }
 0xb19   :  { %850 = vmatpush.msra.mxu2 %v1798_v61 }
 0xb1b   :  { %851 = vmatpush.msra.mxu2 %v1801_v52  ;;  %v2192_v52 = vld [vmem:[%s2487_s4] sm:$0xff] }
 0xb1d   :  { %852 = vmatpush.msra.mxu2 %v1804_v16 }
 0xb1f   :  { %853 = vmatpush.msra.mxu2 %v1807_v15 }
 0xb21   :  { %854 = vmatpush.msra.mxu2 %v1810_v14 }
 0xb23   :  { %855 = vmatpush.msra.mxu2 %v1813_v13 }
 0xb25   :  { %856 = vmatpush.msra.mxu2 %v1815_v12 }
 0xb27   :  { %857 = vmatpush.msra.mxu2 %v1818_v11 }
 0xb29   :  { %858 = vmatpush.msra.mxu2 %v1821_v10 }
 0xb2b   :  { %859 = vmatpush.msra.mxu2 %v2618_v62 }
 0xb8f   :  { %v556_v50 = vpop.f32.mrf.mxu2 }
 0xb90   :  { %v557_v15 = vadd.f32 %v2192_v52, %v556_v50 }
 0xb92   :  { %1301 = vtanh.f32 %v557_v15 }
 0xb98   :  { %v1302_v14 = vpop.eup %1301 }
 0xb99   :  { %564 = vrot.lane.b32.xlu2 %v1302_v14, %s1475_s10  ;;  %v560_v13 = vmul.f32 0.5, %v1302_v14 }
 0xb9b   :  { %v561_v12 = vadd.f32 0.5, %v560_v13 }
 0xb9d   :  { %566 = vrot.lane.b32.xlu1 %v561_v12, %s1477_s12  ;;  %562 = vrot.lane.b32.xlu0 %v561_v12, %s1476_s11 }
 0xba1   :  { %574 = vrot.lane.b32.xlu2 %v2077_v9, %s1474_s27  ;;  %v1363_v9 = vld [vmem:[#allocation2 + $0x78] sm:$0xff] }
 0xbf3   :  { %v565_v10 = vpop.permute.xlu2 %564 }
 0xbf4   :  { %v568_v11 = vmul.f32 %v565_v10, %v561_v12 }
 0xbf6   :  { %v569_v54 = vsel %vm41_vm0, %v568_v11, 0.0 }
 0xbfb   :  { %v575_v48 = vpop.permute.xlu2 %574 }
 0xc0f   :  { %v563_v16 = vpop.permute.xlu0 %562  ;;  %v567_v61 = vpop.permute.xlu1 %566 }
 0xc10   :  { %v570_v53 = vmul.f32 %v563_v16, %v2043_v49 }
 0xc12   :  { %v2203_v56 = vadd.f32 %v570_v53, %v569_v54 }
 0xc14   :  { %1303 = vtanh.f32 %v2203_v56 }
 0xc1a   :  { %v1304_v58 = vpop.eup %1303 }
 0xc1b   :  { %v2206_v3 = vmul.f32 %v1304_v58, %v567_v61  ;;  %v1380_v61 = vld [vmem:[#allocation2 + $0xf0] sm:$0xff] }
 0xc1d   :  { %v576_v1 = vadd.f32 %v575_v48, %v2206_v3  ;;  %v1382_v48 = vld [vmem:[#allocation2 + $0xe0] sm:$0xff] }
 0xc1f   :  { %593 = vmatmul.f32.vlgmr.msra.gmra.mxu3 %v576_v1  ;;  %v1383_v1 = vld [vmem:[#allocation2 + $0xd8] sm:$0xff] }
 0xc20   :  { %882 = vmatpush.msra.mxu3 %v1888_v7 }
 0xc22   :  { %883 = vmatpush.msra.mxu3 %v1890_v8 }
 0xc24   :  { %884 = vmatpush.msra.mxu3 %v1894_v60 }
 0xc26   :  { %885 = vmatpush.msra.mxu3 %v1898_v5 }
 0xc28   :  { %886 = vmatpush.msra.mxu3 %v1902_v42 }
 0xc2a   :  { %887 = vmatpush.msra.mxu3 %v1906_v4 }
 0xc2c   :  { %888 = vmatpush.msra.mxu3 %v1910_v41 }
 0xc2e   :  { %889 = vmatpush.msra.mxu3 %v1914_v40  ;;  %v2228_v40 = vld [vmem:[%s2487_s4 + $0x8] sm:$0xff] }
 0xc30   :  { %890 = vmatpush.msra.mxu3 %v1920_v39 }
 0xc32   :  { %891 = vmatpush.msra.mxu3 %v1924_v38 }
 0xc34   :  { %892 = vmatpush.msra.mxu3 %v1928_v37 }
 0xc36   :  { %893 = vmatpush.msra.mxu3 %v1932_v36 }
 0xc38   :  { %894 = vmatpush.msra.mxu3 %v1936_v35 }
 0xc3a   :  { %895 = vmatpush.msra.mxu3 %v1940_v34 }
 0xc3c   :  { %896 = vmatpush.msra.mxu3 %v1944_v33 }
 0xc3e   :  { %897 = vmatpush.msra.mxu3 %v1948_v27 }
 0xca2   :  { %v594_v4 = vpop.f32.mrf.mxu3 }
 0xca3   :  { %v595_v38 = vadd.f32 %v2228_v40, %v594_v4  ;;  %v1384_v4 = vld [vmem:[#allocation2 + $0xd0] sm:$0xff] }
 0xca5   :  { %1305 = vtanh.f32 %v595_v38  ;;  %v1385_v38 = vld [vmem:[#allocation2 + $0xc8] sm:$0xff] }
 0xcab   :  { %v1306_v37 = vpop.eup %1305 }
 0xcac   :  { %602 = vrot.lane.b32.xlu0 %v1306_v37, %s1475_s10  ;;  %v598_v36 = vmul.f32 0.5, %v1306_v37  ;;  %v1386_v37 = vld [vmem:[#allocation2 + $0xc0] sm:$0xff] }
 0xcae   :  { %v599_v35 = vadd.f32 0.5, %v598_v36  ;;  %v1387_v36 = vld [vmem:[#allocation2 + $0xb8] sm:$0xff] }
 0xcb0   :  { %604 = vrot.lane.b32.xlu2 %v599_v35, %s1477_s12  ;;  %600 = vrot.lane.b32.xlu1 %v599_v35, %s1476_s11 }
 0xcb4   :  { %612 = vrot.lane.b32.xlu0 %v2108_v55, %s1474_s27  ;;  %v1364_v55 = vld [vmem:[#allocation2 + $0x70] sm:$0xff] }
 0xd0a   :  { %v605_v60 = vpop.permute.xlu2 %604 }
 0xd1e   :  { %v603_v27 = vpop.permute.xlu0 %602 }
 0xd1f   :  { %v606_v33 = vmul.f32 %v603_v27, %v599_v35  ;;  %v1388_v35 = vld [vmem:[#allocation2 + $0xb0] sm:$0xff]  ;;  %v1389_v27 = vld [vmem:[#allocation2 + $0xa8] sm:$0xff] }
 0xd21   :  { %v607_v41 = vsel %vm41_vm0, %v606_v33, 0.0  ;;  %v1390_v33 = vld [vmem:[#allocation2 + $0xa0] sm:$0xff] }
 0xd22   :  { %v601_v34 = vpop.permute.xlu1 %600 }
 0xd23   :  { %v608_v39 = vmul.f32 %v601_v34, %v2074_v46  ;;  %v1365_v46 = vld [vmem:[#allocation2 + $0x68] sm:$0xff]  ;;  %v1391_v34 = vld [vmem:[#allocation2 + $0x98] sm:$0xff] }
 0xd25   :  { %v2239_v7 = vadd.f32 %v608_v39, %v607_v41  ;;  %v1392_v39 = vld [vmem:[#allocation2 + $0x90] sm:$0xff]  ;;  %v1393_v41 = vld [vmem:[#allocation2 + $0x88] sm:$0xff] }
 0xd26   :  { %v613_v42 = vpop.permute.xlu0 %612 }
 0xd27   :  { %1307 = vtanh.f32 %v2239_v7 }
 0xd2d   :  { %v1308_v8 = vpop.eup %1307 }
 0xd2e   :  { %v2242_v5 = vmul.f32 %v1308_v8, %v605_v60  ;;  %v1394_v8 = vld [vmem:[#allocation2 + $0x80] sm:$0xff] }
 0xd30   :  { %v614_v49 = vadd.f32 %v613_v42, %v2242_v5  ;;  %v2620_v42 = vld [vmem:[#allocation45_spill] sm:$0xff] }
 0xd32   :  { %631 = vmatmul.f32.vlgmr.msrb.gmra.mxu0 %v614_v49 }
 0xd33   :  { %921 = vmatpush.msrb.mxu0 %v1363_v9 }
 0xd35   :  { %922 = vmatpush.msrb.mxu0 %v1364_v55 }
 0xd37   :  { %923 = vmatpush.msrb.mxu0 %v1365_v46 }
 0xd39   :  { %924 = vmatpush.msrb.mxu0 %v1366_v0 }
 0xd3b   :  { %925 = vmatpush.msrb.mxu0 %v1367_v17 }
 0xd3d   :  { %926 = vmatpush.msrb.mxu0 %v1368_v18 }
 0xd3f   :  { %927 = vmatpush.msrb.mxu0 %v1369_v19 }
 0xd41   :  { %928 = vmatpush.msrb.mxu0 %v1370_v20 }
 0xd43   :  { %929 = vmatpush.msrb.mxu0 %v1371_v29 }
 0xd45   :  { %930 = vmatpush.msrb.mxu0 %v1372_v30 }
 0xd47   :  { %931 = vmatpush.msrb.mxu0 %v1373_v31 }
 0xd49   :  { %932 = vmatpush.msrb.mxu0 %v1374_v32 }
 0xd4b   :  { %933 = vmatpush.msrb.mxu0 %v1375_v43 }
 0xd4d   :  { %934 = vmatpush.msrb.mxu0 %v1376_v63 }
 0xd4f   :  { %935 = vmatpush.msrb.mxu0 %v1377_v24  ;;  %v1395_v24 = vld [vmem:[#allocation2 + $0x178] sm:$0xff] }
 0xd51   :  { %936 = vmatpush.msrb.mxu0 %v1378_v23  ;;  %v1396_v23 = vld [vmem:[#allocation2 + $0x170] sm:$0xff] }
 0xdaf   :  { %v632_v26 = vpop.f32.mrf.mxu0 }
 0xdb0   :  { %v633_v47 = vadd.f32 %v2619_v57, %v632_v26  ;;  %v1398_v26 = vld [vmem:[#allocation2 + $0x160] sm:$0xff]  ;;  %v1399_v57 = vld [vmem:[#allocation2 + $0x158] sm:$0xff] }
 0xdb2   :  { %1309 = vtanh.f32 %v633_v47  ;;  %v1400_v47 = vld [vmem:[#allocation2 + $0x150] sm:$0xff] }
 0xdb8   :  { %v1310_v6 = vpop.eup %1309 }
 0xdb9   :  { %640 = vrot.lane.b32.xlu1 %v1310_v6, %s1475_s10  ;;  %v636_v22 = vmul.f32 0.5, %v1310_v6  ;;  %v1401_v6 = vld [vmem:[#allocation2 + $0x148] sm:$0xff] }
 0xdbb   :  { %v637_v62 = vadd.f32 0.5, %v636_v22  ;;  %v1402_v22 = vld [vmem:[#allocation2 + $0x140] sm:$0xff] }
 0xdbd   :  { %642 = vrot.lane.b32.xlu0 %v637_v62, %s1477_s12  ;;  %638 = vrot.lane.b32.xlu2 %v637_v62, %s1476_s11 }
 0xdc1   :  { %650 = vrot.lane.b32.xlu1 %v2139_v2, %s1474_s27  ;;  %v1379_v2 = vld [vmem:[#allocation2 + $0xf8] sm:$0xff] }
 0xe17   :  { %v639_v50 = vpop.permute.xlu2 %638 }
 0xe18   :  { %v646_v13 = vmul.f32 %v639_v50, %v2105_v59  ;;  %v1381_v59 = vld [vmem:[#allocation2 + $0xe8] sm:$0xff]  ;;  %v1404_v50 = vld [vmem:[#allocation2 + $0x130] sm:$0xff] }
 0xe2b   :  { %v641_v15 = vpop.permute.xlu1 %640 }
 0xe2c   :  { %v644_v14 = vmul.f32 %v641_v15, %v637_v62  ;;  %v1403_v62 = vld [vmem:[#allocation2 + $0x138] sm:$0xff]  ;;  %v1405_v15 = vld [vmem:[#allocation2 + $0x128] sm:$0xff] }
 0xe2e   :  { %v645_v12 = vsel %vm41_vm0, %v644_v14, 0.0  ;;  %v1406_v14 = vld [vmem:[#allocation2 + $0x120] sm:$0xff] }
 0xe2f   :  { %v2254_v10 = vadd.f32 %v646_v13, %v645_v12  ;;  %v643_v16 = vpop.permute.xlu0 %642  ;;  %v1407_v13 = vld [vmem:[#allocation2 + $0x118] sm:$0xff]  ;;  %v1408_v12 = vld [vmem:[#allocation2 + $0x110] sm:$0xff] }
 0xe31   :  { %1311 = vtanh.f32 %v2254_v10 }
 0xe33   :  { %v651_v54 = vpop.permute.xlu1 %650 }
 0xe37   :  { %v1312_v11 = vpop.eup %1311 }
 0xe38   :  { %v2257_v53 = vmul.f32 %v1312_v11, %v643_v16  ;;  %v1409_v11 = vld [vmem:[#allocation2 + $0x108] sm:$0xff]  ;;  %v1410_v16 = vld [vmem:[#allocation2 + $0x100] sm:$0xff] }
 0xe3a   :  { %v652_v58 = vadd.f32 %v651_v54, %v2257_v53 }
 0xe3c   :  { %669 = vmatmul.f32.vlgmr.msrb.gmra.mxu1 %v652_v58 }
 0xe3d   :  { %959 = vmatpush.msrb.mxu1 %v1379_v2 }
 0xe3f   :  { %960 = vmatpush.msrb.mxu1 %v1380_v61 }
 0xe41   :  { %961 = vmatpush.msrb.mxu1 %v1381_v59 }
 0xe43   :  { %962 = vmatpush.msrb.mxu1 %v1382_v48 }
 0xe45   :  { %963 = vmatpush.msrb.mxu1 %v1383_v1 }
 0xe47   :  { %964 = vmatpush.msrb.mxu1 %v1384_v4 }
 0xe49   :  { %965 = vmatpush.msrb.mxu1 %v1385_v38 }
 0xe4b   :  { %966 = vmatpush.msrb.mxu1 %v1386_v37 }
 0xe4d   :  { %967 = vmatpush.msrb.mxu1 %v1387_v36 }
 0xe4f   :  { %968 = vmatpush.msrb.mxu1 %v1388_v35 }
 0xe51   :  { %969 = vmatpush.msrb.mxu1 %v1389_v27 }
 0xe53   :  { %970 = vmatpush.msrb.mxu1 %v1390_v33 }
 0xe55   :  { %971 = vmatpush.msrb.mxu1 %v1391_v34 }
 0xe57   :  { %972 = vmatpush.msrb.mxu1 %v1392_v39  ;;  %v1412_v39 = vld [vmem:[#allocation2 + $0x1f0] sm:$0xff] }
 0xe59   :  { %973 = vmatpush.msrb.mxu1 %v1393_v41  ;;  %v1414_v41 = vld [vmem:[#allocation2 + $0x1e0] sm:$0xff] }
 0xe5b   :  { %974 = vmatpush.msrb.mxu1 %v1394_v8  ;;  %v1415_v8 = vld [vmem:[#allocation2 + $0x1d8] sm:$0xff] }
 0xeb9   :  { %v670_v60 = vpop.f32.mrf.mxu1 }
 0xeba   :  { %v671_v49 = vadd.f32 %v2620_v42, %v670_v60  ;;  %v1416_v60 = vld [vmem:[#allocation2 + $0x1d0] sm:$0xff]  ;;  %v1417_v42 = vld [vmem:[#allocation2 + $0x1c8] sm:$0xff] }
 0xebc   :  { %1313 = vtanh.f32 %v671_v49  ;;  %v1418_v49 = vld [vmem:[#allocation2 + $0x1c0] sm:$0xff] }
 0xec2   :  { %v1314_v9 = vpop.eup %1313 }
 0xec3   :  { %678 = vrot.lane.b32.xlu2 %v1314_v9, %s1475_s10  ;;  %v674_v55 = vmul.f32 0.5, %v1314_v9  ;;  %v1419_v9 = vld [vmem:[#allocation2 + $0x1b8] sm:$0xff] }
 0xec5   :  { %v675_v46 = vadd.f32 0.5, %v674_v55  ;;  %v1420_v55 = vld [vmem:[#allocation2 + $0x1b0] sm:$0xff] }
 0xec7   :  { %680 = vrot.lane.b32.xlu1 %v675_v46, %s1477_s12  ;;  %676 = vrot.lane.b32.xlu0 %v675_v46, %s1476_s11 }
 0xecb   :  { %688 = vrot.lane.b32.xlu2 %v2170_v21, %s1474_s27 }
 0xf1d   :  { %v679_v0 = vpop.permute.xlu2 %678 }
 0xf1e   :  { %v682_v17 = vmul.f32 %v679_v0, %v675_v46  ;;  %v1421_v46 = vld [vmem:[#allocation2 + $0x1a8] sm:$0xff]  ;;  %v1422_v0 = vld [vmem:[#allocation2 + $0x1a0] sm:$0xff] }
 0xf20   :  { %v683_v20 = vsel %vm41_vm0, %v682_v17, 0.0  ;;  %v1423_v17 = vld [vmem:[#allocation2 + $0x198] sm:$0xff] }
 0xf25   :  { %v689_v43 = vpop.permute.xlu2 %688 }
 0xf39   :  { %v677_v18 = vpop.permute.xlu0 %676  ;;  %v681_v31 = vpop.permute.xlu1 %680 }
 0xf3a   :  { %v684_v19 = vmul.f32 %v677_v18, %v2136_v51  ;;  %v1397_v51 = vld [vmem:[#allocation2 + $0x168] sm:$0xff]  ;;  %v1424_v18 = vld [vmem:[#allocation2 + $0x190] sm:$0xff] }
 0xf3c   :  { %v2269_v29 = vadd.f32 %v684_v19, %v683_v20  ;;  %v1425_v19 = vld [vmem:[#allocation2 + $0x188] sm:$0xff]  ;;  %v1426_v20 = vld [vmem:[#allocation2 + $0x180] sm:$0xff] }
 0xf3e   :  { %1315 = vtanh.f32 %v2269_v29 }
 0xf44   :  { %v1316_v30 = vpop.eup %1315 }
 0xf45   :  { %v2272_v32 = vmul.f32 %v1316_v30, %v681_v31 }
 0xf47   :  { %v690_v63 = vadd.f32 %v689_v43, %v2272_v32 }
 0xf49   :  { %707 = vmatmul.f32.vlgmr.msrb.gmra.mxu2 %v690_v63 }
 0xf4a   :  { %997 = vmatpush.msrb.mxu2 %v1395_v24 }
 0xf4c   :  { %998 = vmatpush.msrb.mxu2 %v1396_v23 }
 0xf4e   :  { %999 = vmatpush.msrb.mxu2 %v1397_v51 }
 0xf50   :  { %1000 = vmatpush.msrb.mxu2 %v1398_v26 }
 0xf52   :  { %1001 = vmatpush.msrb.mxu2 %v1399_v57 }
 0xf54   :  { %1002 = vmatpush.msrb.mxu2 %v1400_v47 }
 0xf56   :  { %1003 = vmatpush.msrb.mxu2 %v1401_v6 }
 0xf58   :  { %1004 = vmatpush.msrb.mxu2 %v1402_v22 }
 0xf5a   :  { %1005 = vmatpush.msrb.mxu2 %v1403_v62 }
 0xf5c   :  { %1006 = vmatpush.msrb.mxu2 %v1404_v50 }
 0xf5e   :  { %1007 = vmatpush.msrb.mxu2 %v1405_v15 }
 0xf60   :  { %1008 = vmatpush.msrb.mxu2 %v1406_v14 }
 0xf62   :  { %1009 = vmatpush.msrb.mxu2 %v1407_v13  ;;  %v1428_v13 = vld [vmem:[#allocation2 + $0x270] sm:$0xff] }
 0xf64   :  { %1010 = vmatpush.msrb.mxu2 %v1408_v12  ;;  %v1430_v12 = vld [vmem:[#allocation2 + $0x260] sm:$0xff] }
 0xf66   :  { %1011 = vmatpush.msrb.mxu2 %v1409_v11  ;;  %v1431_v11 = vld [vmem:[#allocation2 + $0x258] sm:$0xff] }
 0xf68   :  { %1012 = vmatpush.msrb.mxu2 %v1410_v16  ;;  %v1432_v16 = vld [vmem:[#allocation2 + $0x250] sm:$0xff] }
 0xfcc   :  { %v708_v54 = vpop.f32.mrf.mxu2 }
 0xfcd   :  { %v709_v58 = vadd.f32 %v2617_v28, %v708_v54  ;;  %v1433_v54 = vld [vmem:[#allocation2 + $0x248] sm:$0xff] }
 0xfcf   :  { %1317 = vtanh.f32 %v709_v58  ;;  %v1434_v58 = vld [vmem:[#allocation2 + $0x240] sm:$0xff] }
 0xfd5   :  { %v1318_v2 = vpop.eup %1317 }
 0xfd6   :  { %716 = vrot.lane.b32.xlu0 %v1318_v2, %s1475_s10  ;;  %v712_v61 = vmul.f32 0.5, %v1318_v2  ;;  %v1435_v2 = vld [vmem:[#allocation2 + $0x238] sm:$0xff] }
 0xfd8   :  { %v713_v59 = vadd.f32 0.5, %v712_v61  ;;  %v1436_v61 = vld [vmem:[#allocation2 + $0x230] sm:$0xff] }
 0xfda   :  { %718 = vrot.lane.b32.xlu2 %v713_v59, %s1477_s12  ;;  %714 = vrot.lane.b32.xlu1 %v713_v59, %s1476_s11 }
 0xfde   :  { %727 = vrot.lane.b32.xlu0 %v2206_v3, %s1474_s27  ;;  %v1411_v3 = vld [vmem:[#allocation2 + $0x1f8] sm:$0xff] }
0x1034   :  { %v719_v35 = vpop.permute.xlu2 %718 }
0x1048   :  { %v717_v48 = vpop.permute.xlu0 %716 }
0x1049   :  { %v720_v1 = vmul.f32 %v717_v48, %v713_v59  ;;  %v1437_v59 = vld [vmem:[#allocation2 + $0x228] sm:$0xff]  ;;  %v1438_v48 = vld [vmem:[#allocation2 + $0x220] sm:$0xff] }
0x104b   :  { %v721_v28 = vsel %vm41_vm0, %v720_v1, 0.0  ;;  %v1439_v1 = vld [vmem:[#allocation2 + $0x218] sm:$0xff] }
0x104c   :  { %v715_v4 = vpop.permute.xlu1 %714 }
0x104d   :  { %v722_v38 = vmul.f32 %v715_v4, %v2167_v25  ;;  %v1413_v25 = vld [vmem:[#allocation2 + $0x1e8] sm:$0xff]  ;;  %v1440_v4 = vld [vmem:[#allocation2 + $0x210] sm:$0xff] }
0x104f   :  { %v2284_v37 = vadd.f32 %v722_v38, %v721_v28  ;;  %v1441_v38 = vld [vmem:[#allocation2 + $0x208] sm:$0xff]  ;;  %v1442_v28 = vld [vmem:[#allocation2 + $0x200] sm:$0xff] }
0x1050   :  { %v728_v33 = vpop.permute.xlu0 %727 }
0x1051   :  { %1319 = vtanh.f32 %v2284_v37 }
0x1057   :  { %v1320_v36 = vpop.eup %1319 }
0x1058   :  { %v2287_v27 = vmul.f32 %v1320_v36, %v719_v35 }
0x105a   :  { %v729_v34 = vadd.f32 %v728_v33, %v2287_v27 }
0x105c   :  { %746 = vmatmul.f32.vlgmr.msrb.gmra.mxu3 %v729_v34 }
0x105d   :  { %1035 = vmatpush.msrb.mxu3 %v1411_v3 }
0x105f   :  { %1036 = vmatpush.msrb.mxu3 %v1412_v39 }
0x1061   :  { %1037 = vmatpush.msrb.mxu3 %v1413_v25 }
0x1063   :  { %1038 = vmatpush.msrb.mxu3 %v1414_v41 }
0x1065   :  { %1039 = vmatpush.msrb.mxu3 %v1415_v8 }
0x1067   :  { %1040 = vmatpush.msrb.mxu3 %v1416_v60 }
0x1069   :  { %1041 = vmatpush.msrb.mxu3 %v1417_v42 }
0x106b   :  { %1042 = vmatpush.msrb.mxu3 %v1418_v49 }
0x106d   :  { %1043 = vmatpush.msrb.mxu3 %v1419_v9 }
0x106f   :  { %1044 = vmatpush.msrb.mxu3 %v1420_v55 }
0x1071   :  { %1045 = vmatpush.msrb.mxu3 %v1421_v46 }
0x1073   :  { %1046 = vmatpush.msrb.mxu3 %v1422_v0 }
0x1075   :  { %1047 = vmatpush.msrb.mxu3 %v1423_v17 }
0x1077   :  { %1048 = vmatpush.msrb.mxu3 %v1424_v18 }
0x1079   :  { %1049 = vmatpush.msrb.mxu3 %v1425_v19 }
0x107b   :  { %1050 = vmatpush.msrb.mxu3 %v1426_v20 }
0x10df   :  { %v747_v30 = vpop.f32.mrf.mxu3 }
0x10e0   :  { %v748_v31 = vadd.f32 %v2192_v52, %v747_v30 }
0x10e2   :  { %1321 = vtanh.f32 %v748_v31 }
0x10e8   :  { %v1322_v43 = vpop.eup %1321 }
0x10e9   :  { %755 = vrot.lane.b32.xlu1 %v1322_v43, %s1475_s10  ;;  %v751_v63 = vmul.f32 0.5, %v1322_v43 }
0x10eb   :  { %v752_v24 = vadd.f32 0.5, %v751_v63 }
0x10ed   :  { %757 = vrot.lane.b32.xlu0 %v752_v24, %s1477_s12  ;;  %753 = vrot.lane.b32.xlu2 %v752_v24, %s1476_s11 }
0x10f1   :  { %765 = vrot.lane.b32.xlu1 %v2242_v5, %s1474_s27  ;;  %v1427_v5 = vld [vmem:[#allocation2 + $0x278] sm:$0xff] }
0x1147   :  { %v754_v23 = vpop.permute.xlu2 %753 }
0x1148   :  { %v761_v57 = vmul.f32 %v754_v23, %v2203_v56  ;;  %v1429_v56 = vld [vmem:[#allocation2 + $0x268] sm:$0xff] }
0x115b   :  { %v756_v51 = vpop.permute.xlu1 %755 }
0x115c   :  { %v759_v26 = vmul.f32 %v756_v51, %v752_v24 }
0x115e   :  { %v760_v47 = vsel %vm41_vm0, %v759_v26, 0.0 }
0x115f   :  { %v2299_v6 = vadd.f32 %v761_v57, %v760_v47  ;;  %v758_v62 = vpop.permute.xlu0 %757 }
0x1161   :  { %1323 = vtanh.f32 %v2299_v6 }
0x1163   :  { %v766_v15 = vpop.permute.xlu1 %765 }
0x1167   :  { %v1324_v22 = vpop.eup %1323 }
0x1168   :  { %v2302_v50 = vmul.f32 %v1324_v22, %v758_v62 }
0x116a   :  { %v767_v14 = vadd.f32 %v766_v15, %v2302_v50 }
0x116c   :  { %784 = vmatmul.f32.vlgmr.msra.gmra.mxu0 %v767_v14 }
0x116d   :  { %1073 = vmatpush.msra.mxu0 %v1427_v5 }
0x116f   :  { %1074 = vmatpush.msra.mxu0 %v1428_v13 }
0x1171   :  { %1075 = vmatpush.msra.mxu0 %v1429_v56 }
0x1173   :  { %1076 = vmatpush.msra.mxu0 %v1430_v12 }
0x1175   :  { %1077 = vmatpush.msra.mxu0 %v1431_v11 }
0x1177   :  { %1078 = vmatpush.msra.mxu0 %v1432_v16 }
0x1179   :  { %1079 = vmatpush.msra.mxu0 %v1433_v54 }
0x117b   :  { %1080 = vmatpush.msra.mxu0 %v1434_v58 }
0x117d   :  { %1081 = vmatpush.msra.mxu0 %v1435_v2 }
0x117f   :  { %1082 = vmatpush.msra.mxu0 %v1436_v61 }
0x1181   :  { %1083 = vmatpush.msra.mxu0 %v1437_v59 }
0x1183   :  { %1084 = vmatpush.msra.mxu0 %v1438_v48 }
0x1185   :  { %1085 = vmatpush.msra.mxu0 %v1439_v1 }
0x1187   :  { %1086 = vmatpush.msra.mxu0 %v1440_v4 }
0x1189   :  { %1087 = vmatpush.msra.mxu0 %v1441_v38 }
0x118b   :  { %1088 = vmatpush.msra.mxu0 %v1442_v28 }
0x11e9   :  { %v785_v36 = vpop.f32.mrf.mxu0 }
0x11ea   :  { %v786_v35 = vadd.f32 %v2228_v40, %v785_v36 }
0x11ec   :  { %1325 = vtanh.f32 %v786_v35 }
0x11f2   :  { %v1326_v33 = vpop.eup %1325 }
0x11f3   :  { %793 = vrot.lane.b32.xlu2 %v1326_v33, %s1475_s10  ;;  %v789_v34 = vmul.f32 0.5, %v1326_v33 }
0x11f5   :  { %v790_v3 = vadd.f32 0.5, %v789_v34 }
0x11f7   :  { %795 = vrot.lane.b32.xlu1 %v790_v3, %s1477_s12  ;;  %791 = vrot.lane.b32.xlu0 %v790_v3, %s1476_s11 }
0x11fb   :  { %803 = vrot.lane.b32.xlu2 %v2257_v53, %s1474_s27 }
0x124d   :  { %v794_v39 = vpop.permute.xlu2 %793 }
0x124e   :  { %v797_v25 = vmul.f32 %v794_v39, %v790_v3 }
0x1250   :  { %v798_v60 = vsel %vm41_vm0, %v797_v25, 0.0 }
0x1255   :  { %v804_v46 = vpop.permute.xlu2 %803 }
0x1269   :  { %v792_v41 = vpop.permute.xlu0 %791  ;;  %v796_v9 = vpop.permute.xlu1 %795 }
0x126a   :  { %v799_v8 = vmul.f32 %v792_v41, %v2239_v7  ;;  %v2323_v7 = vld [vmem:[%s2487_s4 + $0x10] sm:$0xff] }
0x126c   :  { %v2314_v42 = vadd.f32 %v799_v8, %v798_v60 }
0x126e   :  { %1327 = vtanh.f32 %v2314_v42 }
0x1274   :  { %v1328_v49 = vpop.eup %1327 }
0x1275   :  { %v2317_v55 = vmul.f32 %v1328_v49, %v796_v9 }
0x1277   :  { %v805_v0 = vadd.f32 %v804_v46, %v2317_v55 }
0x1279   :  { %822 = vmatmul.f32.vlgmr.msra.gmra.mxu1 %v805_v0 }
0x12f6   :  { %v823_v53 = vpop.f32.mrf.mxu1 }
0x12f7   :  { %v824_v17 = vadd.f32 %v2323_v7, %v823_v53 }
0x12f9   :  { %1329 = vtanh.f32 %v824_v17 }
0x12ff   :  { %v1330_v18 = vpop.eup %1329 }
0x1300   :  { %831 = vrot.lane.b32.xlu0 %v1330_v18, %s1475_s10  ;;  %v827_v19 = vmul.f32 0.5, %v1330_v18 }
0x1302   :  { %v828_v20 = vadd.f32 0.5, %v827_v19 }
0x1304   :  { %833 = vrot.lane.b32.xlu2 %v828_v20, %s1477_s12  ;;  %829 = vrot.lane.b32.xlu1 %v828_v20, %s1476_s11 }
0x1308   :  { %841 = vrot.lane.b32.xlu0 %v2272_v32, %s1474_s27 }
0x135e   :  { %v834_v26 = vpop.permute.xlu2 %833 }
0x1372   :  { %v832_v30 = vpop.permute.xlu0 %831 }
0x1373   :  { %v835_v31 = vmul.f32 %v832_v30, %v828_v20 }
0x1375   :  { %v836_v24 = vsel %vm41_vm0, %v835_v31, 0.0 }
0x1376   :  { %v830_v43 = vpop.permute.xlu1 %829 }
0x1377   :  { %v837_v63 = vmul.f32 %v830_v43, %v2254_v10  ;;  %v2343_v10 = vld [vmem:[%s2487_s4 + $0x18] sm:$0xff] }
0x1379   :  { %v2334_v23 = vadd.f32 %v837_v63, %v836_v24 }
0x137a   :  { %v842_v47 = vpop.permute.xlu0 %841 }
0x137b   :  { %1331 = vtanh.f32 %v2334_v23 }
0x1381   :  { %v1332_v51 = vpop.eup %1331 }
0x1382   :  { %v2337_v57 = vmul.f32 %v1332_v51, %v834_v26 }
0x1384   :  { %v843_v22 = vadd.f32 %v842_v47, %v2337_v57 }
0x1386   :  { %860 = vmatmul.f32.vlgmr.msra.gmra.mxu2 %v843_v22 }
0x1409   :  { %v861_v32 = vpop.f32.mrf.mxu2 }
0x140a   :  { %v862_v62 = vadd.f32 %v2343_v10, %v861_v32 }
0x140c   :  { %1333 = vtanh.f32 %v862_v62 }
0x1412   :  { %v1334_v15 = vpop.eup %1333 }
0x1413   :  { %869 = vrot.lane.b32.xlu1 %v1334_v15, %s1475_s10  ;;  %v865_v14 = vmul.f32 0.5, %v1334_v15 }
0x1415   :  { %v866_v5 = vadd.f32 0.5, %v865_v14 }
0x1417   :  { %871 = vrot.lane.b32.xlu0 %v866_v5, %s1477_s12  ;;  %867 = vrot.lane.b32.xlu2 %v866_v5, %s1476_s11 }
0x141b   :  { %879 = vrot.lane.b32.xlu1 %v2287_v27, %s1474_s27 }
0x1471   :  { %v868_v13 = vpop.permute.xlu2 %867 }
0x1472   :  { %v875_v11 = vmul.f32 %v868_v13, %v2269_v29  ;;  %v2363_v29 = vld [vmem:[%s2487_s4 + $0x20] sm:$0xff] }
0x1485   :  { %v870_v56 = vpop.permute.xlu1 %869 }
0x1486   :  { %v873_v12 = vmul.f32 %v870_v56, %v866_v5 }
0x1488   :  { %v874_v16 = vsel %vm41_vm0, %v873_v12, 0.0 }
0x1489   :  { %v2354_v54 = vadd.f32 %v875_v11, %v874_v16  ;;  %v872_v2 = vpop.permute.xlu0 %871 }
0x148b   :  { %1335 = vtanh.f32 %v2354_v54 }
0x148d   :  { %v880_v59 = vpop.permute.xlu1 %879 }
0x1491   :  { %v1336_v58 = vpop.eup %1335 }
0x1492   :  { %v2357_v61 = vmul.f32 %v1336_v58, %v872_v2 }
0x1494   :  { %v881_v48 = vadd.f32 %v880_v59, %v2357_v61 }
0x1496   :  { %898 = vmatmul.f32.vlgmr.msra.gmra.mxu3 %v881_v48 }
0x1519   :  { %v899_v1 = vpop.f32.mrf.mxu3 }
0x151a   :  { %v900_v4 = vadd.f32 %v2363_v29, %v899_v1 }
0x151c   :  { %1337 = vtanh.f32 %v900_v4 }
0x1522   :  { %v1338_v38 = vpop.eup %1337 }
0x1523   :  { %907 = vrot.lane.b32.xlu2 %v1338_v38, %s1475_s10  ;;  %v903_v28 = vmul.f32 0.5, %v1338_v38 }
0x1525   :  { %v904_v36 = vadd.f32 0.5, %v903_v28 }
0x1527   :  { %909 = vrot.lane.b32.xlu1 %v904_v36, %s1477_s12  ;;  %905 = vrot.lane.b32.xlu0 %v904_v36, %s1476_s11 }
0x152b   :  { %918 = vrot.lane.b32.xlu2 %v2302_v50, %s1474_s27 }
0x157d   :  { %v908_v35 = vpop.permute.xlu2 %907 }
0x157e   :  { %v911_v33 = vmul.f32 %v908_v35, %v904_v36 }
0x1580   :  { %v912_v39 = vsel %vm41_vm0, %v911_v33, 0.0 }
0x1585   :  { %v919_v49 = vpop.permute.xlu2 %918 }
0x1599   :  { %v906_v34 = vpop.permute.xlu0 %905  ;;  %v910_v8 = vpop.permute.xlu1 %909 }
0x159a   :  { %v913_v3 = vmul.f32 %v906_v34, %v2284_v37 }
0x159c   :  { %v2374_v25 = vadd.f32 %v913_v3, %v912_v39 }
0x159e   :  { %1339 = vtanh.f32 %v2374_v25 }
0x15a4   :  { %v1340_v41 = vpop.eup %1339 }
0x15a5   :  { %v2377_v60 = vmul.f32 %v1340_v41, %v910_v8 }
0x15a7   :  { %v920_v9 = vadd.f32 %v919_v49, %v2377_v60 }
0x15a9   :  { %937 = vmatmul.f32.vlgmr.msrb.gmra.mxu0 %v920_v9 }
0x1626   :  { %v938_v50 = vpop.f32.mrf.mxu0 }
0x1627   :  { %v939_v46 = vadd.f32 %v2192_v52, %v938_v50 }
0x1629   :  { %1341 = vtanh.f32 %v939_v46 }
0x162f   :  { %v1342_v37 = vpop.eup %1341 }
0x1630   :  { %946 = vrot.lane.b32.xlu0 %v1342_v37, %s1475_s10  ;;  %v942_v0 = vmul.f32 0.5, %v1342_v37 }
0x1632   :  { %v943_v53 = vadd.f32 0.5, %v942_v0 }
0x1634   :  { %948 = vrot.lane.b32.xlu2 %v943_v53, %s1477_s12  ;;  %944 = vrot.lane.b32.xlu1 %v943_v53, %s1476_s11 }
0x1638   :  { %956 = vrot.lane.b32.xlu0 %v2317_v55, %s1474_s27 }
0x168e   :  { %v949_v43 = vpop.permute.xlu2 %948 }
0x16a2   :  { %v947_v17 = vpop.permute.xlu0 %946 }
0x16a3   :  { %v950_v18 = vmul.f32 %v947_v17, %v943_v53 }
0x16a5   :  { %v951_v52 = vsel %vm41_vm0, %v950_v18, 0.0 }
0x16a6   :  { %v945_v19 = vpop.permute.xlu1 %944 }
0x16a7   :  { %v952_v20 = vmul.f32 %v945_v19, %v2299_v6 }
0x16a9   :  { %v953_v30 = vadd.f32 %v952_v20, %v951_v52 }
0x16aa   :  { %v957_v24 = vpop.permute.xlu0 %956 }
0x16ab   :  { %1343 = vtanh.f32 %v953_v30 }
0x16b1   :  { %v1344_v31 = vpop.eup %1343 }
0x16b2   :  { %v955_v63 = vmul.f32 %v1344_v31, %v949_v43  ;;  %v1124_v43 = vld [vmem:[%s2488_s5 + $0x78] sm:$0xff] }
0x16b4   :  { %v958_v51 = vadd.f32 %v957_v24, %v955_v63  ;;  %v1122_v63 = vld [vmem:[%s2488_s5 + $0x68] sm:$0xff]  ;;  %v1140_v24 = vpack.c.bf16 %v1124_v43, %v1124_v43 }
0x16b6   :  { %975 = vmatmul.f32.vlgmr.msrb.gmra.mxu1 %v958_v51 }
0x1733   :  { %v976_v26 = vpop.f32.mrf.mxu1 }
0x1734   :  { %v977_v47 = vadd.f32 %v2228_v40, %v976_v26  ;;  %v1138_v26 = vpack.c.bf16 %v1122_v63, %v1122_v63 }
0x1736   :  { %1345 = vtanh.f32 %v977_v47  ;;  %v1121_v47 = vld [vmem:[%s2488_s5 + $0x60] sm:$0xff] }
0x173c   :  { %v1346_v55 = vpop.eup %1345 }
0x173d   :  { %984 = vrot.lane.b32.xlu1 %v1346_v55, %s1475_s10  ;;  %v980_v22 = vmul.f32 0.5, %v1346_v55  ;;  %v1120_v55 = vld [vmem:[%s2488_s5 + $0x58] sm:$0xff] }
0x173f   :  { %v981_v6 = vadd.f32 0.5, %v980_v22  ;;  %v1137_v22 = vpack.c.bf16 %v1121_v47, %v1121_v47 }
0x1741   :  { %986 = vrot.lane.b32.xlu0 %v981_v6, %s1477_s12  ;;  %982 = vrot.lane.b32.xlu2 %v981_v6, %s1476_s11 }
0x1745   :  { %994 = vrot.lane.b32.xlu1 %v2337_v57, %s1474_s27 }
0x179b   :  { %v983_v32 = vpop.permute.xlu2 %982 }
0x179c   :  { %v990_v14 = vmul.f32 %v983_v32, %v2314_v42  ;;  %v1156_v32 = vunpack.c.l.bf16 %v1140_v24 }
0x179e   :  { %1196 = vmatpush.msra.mxu2 %v1156_v32  ;;  %1176 = vmatpush.msra.mxu1 %v1156_v32 }
0x17af   :  { %v985_v62 = vpop.permute.xlu1 %984 }
0x17b0   :  { %v988_v15 = vmul.f32 %v985_v62, %v981_v6  ;;  %v1119_v6 = vld [vmem:[%s2488_s5 + $0x50] sm:$0xff] }
0x17b2   :  { %v989_v40 = vsel %vm41_vm0, %v988_v15, 0.0  ;;  %v1154_v15 = vunpack.c.l.bf16 %v1138_v26 }
0x17b3   :  { %v991_v5 = vadd.f32 %v990_v14, %v989_v40  ;;  %v987_v56 = vpop.permute.xlu0 %986  ;;  %v1136_v14 = vpack.c.bf16 %v1120_v55, %v1120_v55  ;;  %v1172_v40 = vsub.f32 %v1124_v43, %v1156_v32  ;;  %v1109_v43 = vld [vmem:[%s2488_s5] sm:$0xff] }
0x17b4   :  { %v1125_v24 = vpack.c.bf16 %v1109_v43, %v1109_v43 }
0x17b5   :  { %1347 = vtanh.f32 %v991_v5  ;;  %1216 = vmatpush.msra.mxu3 %v1172_v40 }
0x17b6   :  { %v1141_v26 = vunpack.c.l.bf16 %v1125_v24 }
0x17b7   :  { %v995_v11 = vpop.permute.xlu1 %994 }
0x17bb   :  { %v1348_v13 = vpop.eup %1347 }
0x17bc   :  { %v993_v12 = vmul.f32 %v1348_v13, %v987_v56  ;;  %v1153_v13 = vunpack.c.l.bf16 %v1137_v22  ;;  %v1135_v56 = vpack.c.bf16 %v1119_v6, %v1119_v6 }
0x17be   :  { %v996_v16 = vadd.f32 %v995_v11, %v993_v12  ;;  %v1170_v12 = vsub.f32 %v1122_v63, %v1154_v15  ;;  %v1152_v11 = vunpack.c.l.bf16 %v1136_v14  ;;  %v535_v14 = vadd.f32 %v2170_v21, %v2015_v45 }
0x17c0   :  { %1013 = vmatmul.f32.vlgmr.msrb.gmra.mxu2 %v996_v16  ;;  %v1169_v16 = vsub.f32 %v1121_v47, %v1153_v13  ;;  %v1157_v47 = vsub.f32 %v1109_v43, %v1141_v26  ;;  %v726_v40 = vadd.f32 %v2287_v27, %v535_v14 }
0x1843   :  { %v1014_v58 = vpop.f32.mrf.mxu2 }
0x1844   :  { %v1015_v2 = vadd.f32 %v2323_v7, %v1014_v58  ;;  %v1151_v58 = vunpack.c.l.bf16 %v1135_v56  ;;  %v917_v56 = vadd.f32 %v2377_v60, %v726_v40 }
0x1846   :  { %1349 = vtanh.f32 %v1015_v2  ;;  %v1168_v2 = vsub.f32 %v1120_v55, %v1152_v11 }
0x184c   :  { %v1350_v57 = vpop.eup %1349 }
0x184d   :  { %1022 = vrot.lane.b32.xlu2 %v1350_v57, %s1475_s10  ;;  %v1018_v59 = vmul.f32 0.5, %v1350_v57  ;;  %v1167_v57 = vsub.f32 %v1119_v6, %v1151_v58 }
0x184f   :  { %v1019_v42 = vadd.f32 0.5, %v1018_v59  ;;  %v1118_v59 = vld [vmem:[%s2488_s5 + $0x48] sm:$0xff] }
0x1851   :  { %1024 = vrot.lane.b32.xlu1 %v1019_v42, %s1477_s12  ;;  %1020 = vrot.lane.b32.xlu0 %v1019_v42, %s1476_s11 }
0x1855   :  { %1032 = vrot.lane.b32.xlu2 %v2357_v61, %s1474_s27 }
0x18a7   :  { %v1023_v48 = vpop.permute.xlu2 %1022 }
0x18a8   :  { %v1026_v1 = vmul.f32 %v1023_v48, %v1019_v42  ;;  %v1134_v42 = vpack.c.bf16 %v1118_v59, %v1118_v59  ;;  %v1117_v48 = vld [vmem:[%s2488_s5 + $0x40] sm:$0xff] }
0x18aa   :  { %v1027_v7 = vsel %vm41_vm0, %v1026_v1, 0.0  ;;  %v1150_v1 = vunpack.c.l.bf16 %v1134_v42 }
0x18af   :  { %v1033_v34 = vpop.permute.xlu2 %1032 }
0x18c3   :  { %v1021_v4 = vpop.permute.xlu0 %1020  ;;  %v1025_v35 = vpop.permute.xlu1 %1024 }
0x18c4   :  { %v1028_v38 = vmul.f32 %v1021_v4, %v2334_v23  ;;  %v1133_v4 = vpack.c.bf16 %v1117_v48, %v1117_v48 }
0x18c6   :  { %v1029_v28 = vadd.f32 %v1028_v38, %v1027_v7  ;;  %v1116_v38 = vld [vmem:[%s2488_s5 + $0x38] sm:$0xff]  ;;  %v1166_v7 = vsub.f32 %v1118_v59, %v1150_v1 }
0x18c8   :  { %1351 = vtanh.f32 %v1029_v28  ;;  %v1149_v28 = vunpack.c.l.bf16 %v1133_v4 }
0x18ce   :  { %v1352_v36 = vpop.eup %1351 }
0x18cf   :  { %v1031_v33 = vmul.f32 %v1352_v36, %v1025_v35  ;;  %v1132_v36 = vpack.c.bf16 %v1116_v38, %v1116_v38  ;;  %v1115_v35 = vld [vmem:[%s2488_s5 + $0x30] sm:$0xff] }
0x18d1   :  { %v1034_v3 = vadd.f32 %v1033_v34, %v1031_v33  ;;  %v1165_v33 = vsub.f32 %v1117_v48, %v1149_v28  ;;  %v1148_v34 = vunpack.c.l.bf16 %v1132_v36 }
0x18d3   :  { %1051 = vmatmul.f32.vlgmr.msrb.gmra.mxu3 %v1034_v3  ;;  %v1131_v3 = vpack.c.bf16 %v1115_v35, %v1115_v35 }
0x1956   :  { %v1052_v39 = vpop.f32.mrf.mxu3 }
0x1957   :  { %v1053_v41 = vadd.f32 %v2343_v10, %v1052_v39  ;;  %v1114_v39 = vld [vmem:[%s2488_s5 + $0x28] sm:$0xff] }
0x1959   :  { %1353 = vtanh.f32 %v1053_v41  ;;  %v1164_v41 = vsub.f32 %v1116_v38, %v1148_v34 }
0x195f   :  { %v1354_v61 = vpop.eup %1353 }
0x1960   :  { %1060 = vrot.lane.b32.xlu0 %v1354_v61, %s1475_s10  ;;  %v1056_v8 = vmul.f32 0.5, %v1354_v61  ;;  %v1147_v61 = vunpack.c.l.bf16 %v1131_v3 }
0x1962   :  { %v1057_v23 = vadd.f32 0.5, %v1056_v8  ;;  %v1130_v8 = vpack.c.bf16 %v1114_v39, %v1114_v39 }
0x1964   :  { %1062 = vrot.lane.b32.xlu2 %v1057_v23, %s1477_s12  ;;  %1058 = vrot.lane.b32.xlu1 %v1057_v23, %s1476_s11 }
0x1968   :  { %1070 = vrot.lane.b32.xlu0 %v2377_v60, %s1474_s27 }
0x19be   :  { %v1063_v53 = vpop.permute.xlu2 %1062 }
0x19d2   :  { %v1061_v49 = vpop.permute.xlu0 %1060 }
0x19d3   :  { %v1064_v9 = vmul.f32 %v1061_v49, %v1057_v23  ;;  %v1113_v23 = vld [vmem:[%s2488_s5 + $0x20] sm:$0xff]  ;;  %v1163_v49 = vsub.f32 %v1115_v35, %v1147_v61 }
0x19d5   :  { %v1065_v10 = vsel %vm41_vm0, %v1064_v9, 0.0  ;;  %v1146_v9 = vunpack.c.l.bf16 %v1130_v8 }
0x19d6   :  { %v1059_v50 = vpop.permute.xlu1 %1058 }
0x19d7   :  { %v1066_v46 = vmul.f32 %v1059_v50, %v2354_v54  ;;  %v1129_v50 = vpack.c.bf16 %v1113_v23, %v1113_v23 }
0x19d9   :  { %v1067_v37 = vadd.f32 %v1066_v46, %v1065_v10  ;;  %v1112_v46 = vld [vmem:[%s2488_s5 + $0x18] sm:$0xff]  ;;  %v1162_v10 = vsub.f32 %v1114_v39, %v1146_v9 }
0x19da   :  { %v1071_v18 = vpop.permute.xlu0 %1070 }
0x19db   :  { %1355 = vtanh.f32 %v1067_v37  ;;  %v1145_v37 = vunpack.c.l.bf16 %v1129_v50 }
0x19e1   :  { %v1356_v0 = vpop.eup %1355 }
0x19e2   :  { %v1069_v17 = vmul.f32 %v1356_v0, %v1063_v53  ;;  %v1128_v0 = vpack.c.bf16 %v1112_v46, %v1112_v46  ;;  %v1111_v53 = vld [vmem:[%s2488_s5 + $0x10] sm:$0xff] }
0x19e4   :  { %v1072_v19 = vadd.f32 %v1071_v18, %v1069_v17  ;;  %v1161_v17 = vsub.f32 %v1113_v23, %v1145_v37  ;;  %v1144_v18 = vunpack.c.l.bf16 %v1128_v0 }
0x19e6   :  { %1089 = vmatmul.f32.vlgmr.msra.gmra.mxu0 %v1072_v19  ;;  %v1127_v19 = vpack.c.bf16 %v1111_v53, %v1111_v53 }
0x1a63   :  { %v1090_v20 = vpop.f32.mrf.mxu0 }
0x1a64   :  { %v1091_v52 = vadd.f32 %v2363_v29, %v1090_v20  ;;  %v1123_v29 = vld [vmem:[%s2488_s5 + $0x70] sm:$0xff]  ;;  %v1110_v20 = vld [vmem:[%s2488_s5 + $0x8] sm:$0xff] }
0x1a65   :  { %v1139_v51 = vpack.c.bf16 %v1123_v29, %v1123_v29 }
0x1a66   :  { %1357 = vtanh.f32 %v1091_v52  ;;  %v1160_v52 = vsub.f32 %v1112_v46, %v1144_v18 }
0x1a67   :  { %v1155_v62 = vunpack.c.l.bf16 %v1139_v51 }
0x1a69   :  { %v1171_v5 = vsub.f32 %v1123_v29, %v1155_v62  ;;  %1197 = vmatpush.msra.mxu2 %v1155_v62  ;;  %1177 = vmatpush.msra.mxu1 %v1155_v62 }
0x1a6b   :  { %1217 = vmatpush.msra.mxu3 %v1171_v5  ;;  %1198 = vmatpush.msra.mxu2 %v1154_v15 }
0x1a6c   :  { %v1358_v30 = vpop.eup %1357  ;;  %1178 = vmatpush.msra.mxu1 %v1154_v15 }
0x1a6d   :  { %1098 = vrot.lane.b32.xlu1 %v1358_v30, %s1475_s10  ;;  %v1094_v31 = vmul.f32 0.5, %v1358_v30  ;;  %1218 = vmatpush.msra.mxu3 %v1170_v12  ;;  %v1143_v30 = vunpack.c.l.bf16 %v1127_v19 }
0x1a6e   :  { %1199 = vmatpush.msra.mxu2 %v1153_v13  ;;  %1179 = vmatpush.msra.mxu1 %v1153_v13 }
0x1a6f   :  { %v2418_v54 = vadd.f32 0.5, %v1094_v31  ;;  %1219 = vmatpush.msra.mxu3 %v1169_v16  ;;  %v1126_v31 = vpack.c.bf16 %v1110_v20, %v1110_v20  ;;  %v1159_v29 = vsub.f32 %v1111_v53, %v1143_v30 }
0x1a70   :  { %1200 = vmatpush.msra.mxu2 %v1152_v11  ;;  %1180 = vmatpush.msra.mxu1 %v1152_v11 }
0x1a71   :  { %1100 = vrot.lane.b32.xlu0 %v2418_v54, %s1477_s12  ;;  %1096 = vrot.lane.b32.xlu2 %v2418_v54, %s1476_s11  ;;  %v1142_v63 = vunpack.c.l.bf16 %v1126_v31 }
0x1a72   :  { %1220 = vmatpush.msra.mxu3 %v1168_v2  ;;  %1201 = vmatpush.msra.mxu2 %v1151_v58 }
0x1a73   :  { %1181 = vmatpush.msra.mxu1 %v1151_v58  ;;  %v1158_v51 = vsub.f32 %v1110_v20, %v1142_v63 }
0x1a74   :  { %1221 = vmatpush.msra.mxu3 %v1167_v57  ;;  %1202 = vmatpush.msra.mxu2 %v1150_v1 }
0x1a75   :  { %1182 = vmatpush.msra.mxu1 %v1150_v1 }
0x1a76   :  { %1222 = vmatpush.msra.mxu3 %v1166_v7  ;;  %1203 = vmatpush.msra.mxu2 %v1149_v28 }
0x1a77   :  { %1183 = vmatpush.msra.mxu1 %v1149_v28 }
0x1a78   :  { %1223 = vmatpush.msra.mxu3 %v1165_v33  ;;  %1204 = vmatpush.msra.mxu2 %v1148_v34 }
0x1a79   :  { %1184 = vmatpush.msra.mxu1 %v1148_v34 }
0x1a7a   :  { %1224 = vmatpush.msra.mxu3 %v1164_v41  ;;  %1205 = vmatpush.msra.mxu2 %v1147_v61 }
0x1a7b   :  { %1185 = vmatpush.msra.mxu1 %v1147_v61 }
0x1a7c   :  { %1225 = vmatpush.msra.mxu3 %v1163_v49  ;;  %1206 = vmatpush.msra.mxu2 %v1146_v9 }
0x1a7d   :  { %1186 = vmatpush.msra.mxu1 %v1146_v9 }
0x1a7e   :  { %1226 = vmatpush.msra.mxu3 %v1162_v10  ;;  %1207 = vmatpush.msra.mxu2 %v1145_v37 }
0x1a7f   :  { %1187 = vmatpush.msra.mxu1 %v1145_v37 }
0x1a80   :  { %1227 = vmatpush.msra.mxu3 %v1161_v17  ;;  %1208 = vmatpush.msra.mxu2 %v1144_v18 }
0x1a81   :  { %1188 = vmatpush.msra.mxu1 %v1144_v18 }
0x1a82   :  { %1228 = vmatpush.msra.mxu3 %v1160_v52  ;;  %1209 = vmatpush.msra.mxu2 %v1143_v30 }
0x1a83   :  { %1189 = vmatpush.msra.mxu1 %v1143_v30 }
0x1a84   :  { %1229 = vmatpush.msra.mxu3 %v1159_v29  ;;  %1210 = vmatpush.msra.mxu2 %v1142_v63 }
0x1a85   :  { %1190 = vmatpush.msra.mxu1 %v1142_v63 }
0x1a86   :  { %1230 = vmatpush.msra.mxu3 %v1158_v51  ;;  %1211 = vmatpush.msra.mxu2 %v1141_v26 }
0x1a87   :  { %1191 = vmatpush.msra.mxu1 %v1141_v26 }
0x1a88   :  { %1231 = vmatpush.msra.mxu3 %v1157_v47 }
0x1acb   :  { %v1097_v55 = vpop.permute.xlu2 %1096 }
0x1acc   :  { %v1104_v32 = vmul.f32 %v1097_v55, %v2374_v25 }
0x1adf   :  { %v1099_v22 = vpop.permute.xlu1 %1098 }
0x1ae0   :  { %v1102_v6 = vmul.f32 %v1099_v22, %v2418_v54 }
0x1ae2   :  { %v1103_v62 = vsel %vm41_vm0, %v1102_v6, 0.0 }
0x1ae3   :  { %v1105_v15 = vadd.f32 %v1104_v32, %v1103_v62  ;;  %v1101_v13 = vpop.permute.xlu0 %1100 }
0x1ae5   :  { %1359 = vtanh.f32 %v1105_v15 }
0x1aeb   :  { %v1360_v5 = vpop.eup %1359 }
0x1aec   :  { %v1107_v12 = vmul.f32 %v1360_v5, %v1101_v13 }
0x1aee   :  { %v1108_v11 = vadd.f32 %v1107_v12, %v917_v56 }
0x1af0   :  { %v1173_v16 = vpack.c.bf16 %v1108_v11, %v1108_v11 }
0x1af2   :  { %v1174_v54 = vunpack.c.l.bf16 %v1173_v16 }
0x1af4   :  { %v1175_v58 = vsub.f32 %v1108_v11, %v1174_v54  ;;  %1212 = vmatmul.f32.vlgmr.msra.gmra.mxu2 %v1174_v54  ;;  %1232 = vmatmul.f32.vlgmr.msra.gmra.mxu3 %v1174_v54 }
0x1af6   :  { %1192 = vmatmul.f32.vlgmr.msra.gmra.mxu1 %v1175_v58 }
0x1b73   :  { %v1193_v44 = vpop.f32.mrf.mxu1 }
0x1b77   :  { %v1213_v25 = vpop.f32.mrf.mxu2  ;;  %v1233_v57 = vpop.f32.mrf.mxu3 }
0x1b78   :  { %v1214_v2 = vadd.f32 %v1213_v25, %v1193_v44 }
0x1b7a   :  { %v1236_v59 = vadd.f32 %v1233_v57, %v1214_v2 }
0x1b7c   :  { %1237 = vst [vmem:[%s2489_s6] sm:$0xff] %v1236_v59 }
0x1b7d   :  { %1242 = vsyncpa [#allocation3], 1 }

</bundles_post_ra>
